<compile_context>
chip_gen: v5e
topology: v5e:2x2
jax: 0.10.0
libtpu: 0.0.40
codegen_flags: <defaults>
</compile_context>

<pallas_src>
import jax
import jax.numpy as jnp
from jax import lax
from jax.experimental import pallas as pl
from jax.experimental.pallas import tpu as pltpu


# ----------------------------- model config ---------------------------------
B, C, H, W = 2, 4, 16, 16          # small synthetic "office" input (B, C, H, W)
PATCH = (4, 4)                     # patch size
EMBED_DIM = 32                     # d_model
NUM_HEADS = 4
HIDDEN_DIM = 64                    # dim_feedforward
NUM_LAYERS = 2
NUM_CLASSES = 5

HP, WP = H // PATCH[0], W // PATCH[1]
NUM_PATCHES = HP * WP
PATCH_DIM = C * PATCH[0] * PATCH[1]
SEQ = NUM_PATCHES + 1
HEAD_DIM = EMBED_DIM // NUM_HEADS
LN_EPS = 1e-5


def _layernorm(x, g, b, eps=LN_EPS):
    mu = jnp.mean(x, axis=-1, keepdims=True)
    var = jnp.mean((x - mu) ** 2, axis=-1, keepdims=True)
    return (x - mu) * lax.rsqrt(var + eps) * g + b


# ------------------------------ Pallas kernel --------------------------------
def _make_vit_kernel(num_layers, num_heads, embed_dim, hidden_dim, seq, batch):
    Hn = num_heads
    D = embed_dim
    dh = D // Hn
    S = seq
    Bk = batch
    f32 = jnp.float32

    def kernel(p_ref, tb_ref, mask_ref, pe_w_ref,
               wqkv_ref, bqkv_ref, wo_ref, dvec_ref,
               ff1_w_ref, ff1_b_ref, ff2_w_ref,
               hln_ref, head_w_ref, head_b_ref,
               out_ref):
        # ---- patch embedding + (CLS | patch bias | pos) token bias (folded) ----
        # single lane-dense 2-D matmul over all B*S rows
        x = jnp.dot(p_ref[...], pe_w_ref[...],
                    preferred_element_type=f32) + tb_ref[...]        # (B*S, D)
        mask = mask_ref[...]        # (B*S, B*S) additive 0 / -1e30 batch-block mask

        # ---- transformer encoder (post-LN, ReLU FF; PyTorch defaults) ----
        for l in range(num_layers):
            dv = dvec_ref[l]   # (6, D): attn_ob, ln1_g, ln1_b, ff2_b, ln2_g, ln2_b

            # fused QKV: ONE lane-dense matmul; 1/sqrt(dh) already folded into q cols
            qkv = jnp.dot(x, wqkv_ref[l],
                          preferred_element_type=f32) + bqkv_ref[l:l + 1]   # (B*S, 3D)

            # split heads with static 8-lane slices stacked on a leading axis
            q = jnp.stack([qkv[:, 0 * D + h * dh: 0 * D + (h + 1) * dh]
                           for h in range(Hn)])                      # (Hn, B*S, dh)
            k = jnp.stack([qkv[:, 1 * D + h * dh: 1 * D + (h + 1) * dh]
                           for h in range(Hn)])
            v = jnp.stack([qkv[:, 2 * D + h * dh: 2 * D + (h + 1) * dh]
                           for h in range(Hn)])

            # attention: ONE batched softmax chain over all heads; the additive
            # block-diagonal mask kills cross-image attention.
            s = jnp.einsum('hqd,hkd->hqk', q, k,
                           preferred_element_type=f32) + mask[None]  # (Hn, B*S, B*S)
            s = s - jnp.max(s, axis=-1, keepdims=True)
            e = jnp.exp(s)
            pr = e * pl.reciprocal(jnp.sum(e, axis=-1, keepdims=True),
                                   approx=True)
            o = jnp.einsum('hqk,hkd->hqd', pr, v,
                           preferred_element_type=f32)               # (Hn, B*S, dh)

            # repack heads onto lanes -> (B*S, D), then ONE lane-dense out-projection
            o2 = jnp.concatenate([o[h] for h in range(Hn)], axis=1)  # (B*S, D)
            attn = jnp.dot(o2, wo_ref[l],
                           preferred_element_type=f32) + dv[0:1]     # + out-proj bias
            x = _layernorm(x + attn, dv[1:2], dv[2:3])

            # feed-forward (ReLU): two lane-dense 2-D matmuls
            h1 = jnp.dot(x, ff1_w_ref[l],
                         preferred_element_type=f32) + ff1_b_ref[l:l + 1]
            h1 = jnp.maximum(h1, 0.0)
            ff = jnp.dot(h1, ff2_w_ref[l],
                         preferred_element_type=f32) + dv[3:4]
            x = _layernorm(x + ff, dv[4:5], dv[5:6])

        # ---- MLP head on the CLS rows (row b*S of each image) ----
        cls = jnp.concatenate([x[b * S: b * S + 1, :] for b in range(Bk)],
                              axis=0)                                # (B, D)
        y = _layernorm(cls, hln_ref[0:1], hln_ref[1:2])
        out_ref[...] = jnp.dot(y, head_w_ref[...],
                               preferred_element_type=f32) + head_b_ref[...]

    return kernel


# ------------------------------ wrapper / glue --------------------------------
def _patchify(img):
    """Matches torch unfold/permute/view: -> (B, num_patches, C*ph*pw)."""
    b, c, h, w = img.shape
    ph, pw = PATCH
    x = img.reshape(b, c, h // ph, ph, w // pw, pw)
    x = x.transpose(0, 2, 4, 1, 3, 5)                        # (B, Hp, Wp, C, ph, pw)
    return x.reshape(b, (h // ph) * (w // pw), c * ph * pw)


def vit_office_forward(img, params):
    b = img.shape[0]
    D, Fd, L, Cc = EMBED_DIM, HIDDEN_DIM, NUM_LAYERS, NUM_CLASSES
    Hn, dh = NUM_HEADS, HEAD_DIM
    S = SEQ
    BS = b * S
    scale = 1.0 / (dh ** 0.5)

    # patches with a zero row in each image's CLS slot; flattened to (B*S, P)
    patches = _patchify(img)                                         # (B, N, P)
    patches_ext = jnp.concatenate(
        [jnp.zeros((b, 1, PATCH_DIM), patches.dtype), patches], axis=1)
    patches2 = patches_ext.reshape(BS, PATCH_DIM)

    # token bias: row 0 = cls_token + pos[0]; rows 1.. = patch-embed bias + pos[1:]
    tok_bias = params['pos_emb'] + jnp.concatenate(
        [params['cls_token'],
         jnp.broadcast_to(params['pe_b'][None, :], (NUM_PATCHES, D))], axis=0)
    tok_bias2 = jnp.tile(tok_bias, (b, 1))                           # (B*S, D)

    # additive block-diagonal mask: 0 within an image, -1e30 across images
    row_img = jnp.arange(BS) // S
    attn_mask = jnp.where(row_img[:, None] == row_img[None, :],
                          0.0, -1e30).astype(jnp.float32)            # (B*S, B*S)

    # fold 1/sqrt(dh) into the q columns of the fused QKV weight/bias
    scale_vec = jnp.concatenate([jnp.full((D,), scale, jnp.float32),
                                 jnp.ones((2 * D,), jnp.float32)])   # (3D,)
    wqkv = params['qkv_w'] * scale_vec                               # (L, D, 3D)
    bqkv = params['qkv_b'][:, 0, :] * scale_vec                      # (L, 3D)

    # small per-layer vectors packed without size-1 sublane dims
    dvec = jnp.stack([params['attn_ob'][:, 0], params['ln1_g'][:, 0],
                      params['ln1_b'][:, 0], params['ff2_b'][:, 0],
                      params['ln2_g'][:, 0], params['ln2_b'][:, 0]], axis=1)  # (L,6,D)
    ff1_b = params['ff1_b'][:, 0, :]                                 # (L, F)
    hln = jnp.concatenate([params['hln_g'], params['hln_b']], axis=0)  # (2, D)

    kernel = _make_vit_kernel(L, Hn, D, Fd, S, b)

    def full(shape):
        nd = len(shape)
        return pl.BlockSpec(shape, lambda *_: (0,) * nd)

    in_specs = [
        full((BS, PATCH_DIM)),          # patches2
        full((BS, D)),                  # tok_bias2 (cls + pe_b + pos folded)
        full((BS, BS)),                 # attention batch-block mask
        full((PATCH_DIM, D)),           # pe_w
        full((L, D, 3 * D)),            # wqkv  (q-scale folded)
        full((L, 3 * D)),               # bqkv  (q-scale folded)
        full((L, D, D)),                # attn out-proj weight
        full((L, 6, D)),                # packed per-layer vectors
        full((L, D, Fd)),               # ff1_w
        full((L, Fd)),                  # ff1_b
        full((L, Fd, D)),               # ff2_w
        full((2, D)),                   # head LN gamma/beta
        full((D, Cc)),                  # head_w
        full((1, Cc)),                  # head_b
    ]

    out = pl.pallas_call(
        kernel,
        out_shape=jax.ShapeDtypeStruct((b, Cc), jnp.float32),
        grid=(1,),
        in_specs=in_specs,
        out_specs=pl.BlockSpec((b, Cc), lambda *_: (0, 0)),
        compiler_params=pltpu.CompilerParams(dimension_semantics=("arbitrary",)),
    )(patches2, tok_bias2, attn_mask, params['pe_w'], wqkv, bqkv,
      params['attn_ow'], dvec, params['ff1_w'], ff1_b, params['ff2_w'],
      hln, params['head_w'], params['head_b'])
    return out                                                       # (B, num_classes)


# --------------------------- pure-JAX reference -------------------------------
def vit_office_reference(img, params):
    b = img.shape[0]
    D = EMBED_DIM
    dh = HEAD_DIM
    scale = 1.0 / (dh ** 0.5)
    patches = _patchify(img)
    x = patches @ params['pe_w'] + params['pe_b']
    cls = jnp.broadcast_to(params['cls_token'][None], (b, 1, D))
    x = jnp.concatenate([cls, x], axis=1) + params['pos_emb'][None]
    for l in range(NUM_LAYERS):
        qkv = x @ params['qkv_w'][l] + params['qkv_b'][l]
        q, k, v = jnp.split(qkv, 3, axis=-1)
        q = q.reshape(b, SEQ, NUM_HEADS, dh).transpose(0, 2, 1, 3)
        k = k.reshape(b, SEQ, NUM_HEADS, dh).transpose(0, 2, 1, 3)
        v = v.reshape(b, SEQ, NUM_HEADS, dh).transpose(0, 2, 1, 3)
        s = jnp.einsum('bhqd,bhkd->bhqk', q, k) * scale
        a = jax.nn.softmax(s, axis=-1)
        o = jnp.einsum('bhqk,bhkd->bhqd', a, v)
        o = o.transpose(0, 2, 1, 3).reshape(b, SEQ, D)
        o = o @ params['attn_ow'][l] + params['attn_ob'][l]
        x = _layernorm(x + o, params['ln1_g'][l], params['ln1_b'][l])
        h1 = jax.nn.relu(x @ params['ff1_w'][l] + params['ff1_b'][l])
        ff = h1 @ params['ff2_w'][l] + params['ff2_b'][l]
        x = _layernorm(x + ff, params['ln2_g'][l], params['ln2_b'][l])
    cls_final = x[:, 0]
    y = _layernorm(cls_final, params['hln_g'][0], params['hln_b'][0])
    return y @ params['head_w'] + params['head_b']


# ------------------------------- param init ----------------------------------
def init_params(key):
    D, F, L, Cc = EMBED_DIM, HIDDEN_DIM, NUM_LAYERS, NUM_CLASSES
    ks = jax.random.split(key, 16)

    def nrm(k, shape, s=0.02):
        return s * jax.random.normal(k, shape, jnp.float32)

    return dict(
        pe_w=nrm(ks[0], (PATCH_DIM, D)),
        pe_b=nrm(ks[1], (D,)),
        cls_token=jax.random.normal(ks[2], (1, D), jnp.float32),
        pos_emb=jax.random.normal(ks[3], (SEQ, D), jnp.float32),
        qkv_w=nrm(ks[4], (L, D, 3 * D)),
        qkv_b=nrm(ks[5], (L, 1, 3 * D)),
        attn_ow=nrm(ks[6], (L, D, D)),
        attn_ob=nrm(ks[7], (L, 1, D)),
        ln1_g=jnp.ones((L, 1, D), jnp.float32),
        ln1_b=jnp.zeros((L, 1, D), jnp.float32),
        ff1_w=nrm(ks[8], (L, D, F)),
        ff1_b=nrm(ks[9], (L, 1, F)),
        ff2_w=nrm(ks[10], (L, F, D)),
        ff2_b=nrm(ks[11], (L, 1, D)),
        ln2_g=jnp.ones((L, 1, D), jnp.float32),
        ln2_b=jnp.zeros((L, 1, D), jnp.float32),
        hln_g=jnp.ones((1, D), jnp.float32),
        hln_b=jnp.zeros((1, D), jnp.float32),
        head_w=nrm(ks[12], (D, Cc)),
        head_b=nrm(ks[13], (1, Cc)),
    )


# ---------------------------------- main --------------------------------------
if __name__ == "__main__":
    key = jax.random.PRNGKey(0)
    pkey, xkey = jax.random.split(key)
    params = init_params(pkey)
    img = jax.random.normal(xkey, (B, C, H, W), jnp.float32)

    out = jax.block_until_ready(vit_office_forward(img, params))
    ref = jax.block_until_ready(vit_office_reference(img, params))

    assert out.shape == (B, NUM_CLASSES), out.shape
    assert jnp.allclose(out, ref, atol=1e-3, rtol=1e-3), (out, ref)
    print("KERNEL_OK")
</pallas_src>

<mosaic_0001>
module attributes {stable_mosaic.version = 11 : i64} {
  func.func @kernel(%arg0: i32, %arg1: memref<34x64xf32, #tpu.memory_space<vmem>>, %arg2: memref<34x32xf32, #tpu.memory_space<vmem>>, %arg3: memref<34x34xf32, #tpu.memory_space<vmem>>, %arg4: memref<64x32xf32, #tpu.memory_space<vmem>>, %arg5: memref<2x32x96xf32, #tpu.memory_space<vmem>>, %arg6: memref<2x96xf32, #tpu.memory_space<vmem>>, %arg7: memref<2x32x32xf32, #tpu.memory_space<vmem>>, %arg8: memref<2x6x32xf32, #tpu.memory_space<vmem>>, %arg9: memref<2x32x64xf32, #tpu.memory_space<vmem>>, %arg10: memref<2x64xf32, #tpu.memory_space<vmem>>, %arg11: memref<2x64x32xf32, #tpu.memory_space<vmem>>, %arg12: memref<2x32xf32, #tpu.memory_space<vmem>>, %arg13: memref<32x5xf32, #tpu.memory_space<vmem>>, %arg14: memref<1x5xf32, #tpu.memory_space<vmem>>, %arg15: memref<2x5xf32, #tpu.memory_space<vmem>>) attributes {dimension_semantics = [#tpu.dimension_semantics<arbitrary>], iteration_bounds = array<i64: 1>, scalar_prefetch = 0 : i64, scratch_operands = 0 : i64, tpu.core_type = #tpu.core_type<tc>, window_params = [{pipeline_mode = #tpu.pipeline_mode<synchronous>, transform_indices = @transform_0, window_bounds = array<i64: 34, 64>}, {pipeline_mode = #tpu.pipeline_mode<synchronous>, transform_indices = @transform_1, window_bounds = array<i64: 34, 32>}, {pipeline_mode = #tpu.pipeline_mode<synchronous>, transform_indices = @transform_2, window_bounds = array<i64: 34, 34>}, {pipeline_mode = #tpu.pipeline_mode<synchronous>, transform_indices = @transform_3, window_bounds = array<i64: 64, 32>}, {pipeline_mode = #tpu.pipeline_mode<synchronous>, transform_indices = @transform_4, window_bounds = array<i64: 2, 32, 96>}, {pipeline_mode = #tpu.pipeline_mode<synchronous>, transform_indices = @transform_5, window_bounds = array<i64: 2, 96>}, {pipeline_mode = #tpu.pipeline_mode<synchronous>, transform_indices = @transform_6, window_bounds = array<i64: 2, 32, 32>}, {pipeline_mode = #tpu.pipeline_mode<synchronous>, transform_indices = @transform_7, window_bounds = array<i64: 2, 6, 32>}, {pipeline_mode = #tpu.pipeline_mode<synchronous>, transform_indices = @transform_8, window_bounds = array<i64: 2, 32, 64>}, {pipeline_mode = #tpu.pipeline_mode<synchronous>, transform_indices = @transform_9, window_bounds = array<i64: 2, 64>}, {pipeline_mode = #tpu.pipeline_mode<synchronous>, transform_indices = @transform_10, window_bounds = array<i64: 2, 64, 32>}, {pipeline_mode = #tpu.pipeline_mode<synchronous>, transform_indices = @transform_11, window_bounds = array<i64: 2, 32>}, {pipeline_mode = #tpu.pipeline_mode<synchronous>, transform_indices = @transform_12, window_bounds = array<i64: 32, 5>}, {pipeline_mode = #tpu.pipeline_mode<synchronous>, transform_indices = @transform_13, window_bounds = array<i64: 1, 5>}, {pipeline_mode = #tpu.pipeline_mode<synchronous>, transform_indices = @transform_14, window_bounds = array<i64: 2, 5>}]} {
    %c0 = arith.constant 0 : index
    %c0_0 = arith.constant 0 : index
    %0 = vector.load %arg1[%c0, %c0_0] : memref<34x64xf32, #tpu.memory_space<vmem>>, vector<34x64xf32>
    %c0_1 = arith.constant 0 : index
    %c0_2 = arith.constant 0 : index
    %1 = vector.load %arg4[%c0_1, %c0_2] : memref<64x32xf32, #tpu.memory_space<vmem>>, vector<64x32xf32>
    %cst = arith.constant dense<0.000000e+00> : vector<34x32xf32>
    %2 = tpu.matmul %0, %1, %cst {dimension_numbers = #tpu.dot_dimension_numbers<[1], [0], [0], [1], [0, 0, 1, 1], [], []>} : vector<34x64xf32>, vector<64x32xf32>, vector<34x32xf32> -> vector<34x32xf32>
    %c0_3 = arith.constant 0 : index
    %c0_4 = arith.constant 0 : index
    %3 = vector.load %arg2[%c0_3, %c0_4] : memref<34x32xf32, #tpu.memory_space<vmem>>, vector<34x32xf32>
    %4 = arith.addf %2, %3 : vector<34x32xf32>
    %c0_5 = arith.constant 0 : index
    %c0_6 = arith.constant 0 : index
    %5 = vector.load %arg3[%c0_5, %c0_6] : memref<34x34xf32, #tpu.memory_space<vmem>>, vector<34x34xf32>
    %c0_7 = arith.constant 0 : index
    %c0_8 = arith.constant 0 : index
    %c0_9 = arith.constant 0 : index
    %6 = vector.load %arg8[%c0_7, %c0_8, %c0_9] : memref<2x6x32xf32, #tpu.memory_space<vmem>>, vector<1x6x32xf32>
    %7 = vector.shape_cast %6 : vector<1x6x32xf32> to vector<6x32xf32>
    %c0_10 = arith.constant 0 : index
    %c0_11 = arith.constant 0 : index
    %c0_12 = arith.constant 0 : index
    %8 = vector.load %arg5[%c0_10, %c0_11, %c0_12] : memref<2x32x96xf32, #tpu.memory_space<vmem>>, vector<1x32x96xf32>
    %9 = vector.shape_cast %8 : vector<1x32x96xf32> to vector<32x96xf32>
    %cst_13 = arith.constant dense<0.000000e+00> : vector<34x96xf32>
    %10 = tpu.matmul %4, %9, %cst_13 {dimension_numbers = #tpu.dot_dimension_numbers<[1], [0], [0], [1], [0, 0, 1, 1], [], []>} : vector<34x32xf32>, vector<32x96xf32>, vector<34x96xf32> -> vector<34x96xf32>
    %c0_14 = arith.constant 0 : index
    %c0_15 = arith.constant 0 : index
    %11 = vector.load %arg6[%c0_14, %c0_15] : memref<2x96xf32, #tpu.memory_space<vmem>>, vector<1x96xf32>
    %12 = vector.broadcast %11 : vector<1x96xf32> to vector<34x96xf32>
    %13 = arith.addf %10, %12 : vector<34x96xf32>
    %14 = vector.extract_strided_slice %13 {offsets = [0, 0], sizes = [34, 8], strides = [1, 1]} : vector<34x96xf32> to vector<34x8xf32>
    %15 = vector.extract_strided_slice %13 {offsets = [0, 8], sizes = [34, 8], strides = [1, 1]} : vector<34x96xf32> to vector<34x8xf32>
    %16 = vector.extract_strided_slice %13 {offsets = [0, 16], sizes = [34, 8], strides = [1, 1]} : vector<34x96xf32> to vector<34x8xf32>
    %17 = vector.extract_strided_slice %13 {offsets = [0, 24], sizes = [34, 8], strides = [1, 1]} : vector<34x96xf32> to vector<34x8xf32>
    %18 = vector.shape_cast %14 : vector<34x8xf32> to vector<1x34x8xf32>
    %19 = vector.shape_cast %15 : vector<34x8xf32> to vector<1x34x8xf32>
    %20 = vector.shape_cast %16 : vector<34x8xf32> to vector<1x34x8xf32>
    %21 = vector.shape_cast %17 : vector<34x8xf32> to vector<1x34x8xf32>
    %22 = tpu.concatenate %18, %19, %20, %21 in 0 : vector<1x34x8xf32>, vector<1x34x8xf32>, vector<1x34x8xf32>, vector<1x34x8xf32> -> vector<4x34x8xf32>
    %23 = vector.extract_strided_slice %13 {offsets = [0, 32], sizes = [34, 8], strides = [1, 1]} : vector<34x96xf32> to vector<34x8xf32>
    %24 = vector.extract_strided_slice %13 {offsets = [0, 40], sizes = [34, 8], strides = [1, 1]} : vector<34x96xf32> to vector<34x8xf32>
    %25 = vector.extract_strided_slice %13 {offsets = [0, 48], sizes = [34, 8], strides = [1, 1]} : vector<34x96xf32> to vector<34x8xf32>
    %26 = vector.extract_strided_slice %13 {offsets = [0, 56], sizes = [34, 8], strides = [1, 1]} : vector<34x96xf32> to vector<34x8xf32>
    %27 = vector.shape_cast %23 : vector<34x8xf32> to vector<1x34x8xf32>
    %28 = vector.shape_cast %24 : vector<34x8xf32> to vector<1x34x8xf32>
    %29 = vector.shape_cast %25 : vector<34x8xf32> to vector<1x34x8xf32>
    %30 = vector.shape_cast %26 : vector<34x8xf32> to vector<1x34x8xf32>
    %31 = tpu.concatenate %27, %28, %29, %30 in 0 : vector<1x34x8xf32>, vector<1x34x8xf32>, vector<1x34x8xf32>, vector<1x34x8xf32> -> vector<4x34x8xf32>
    %32 = vector.extract_strided_slice %13 {offsets = [0, 64], sizes = [34, 8], strides = [1, 1]} : vector<34x96xf32> to vector<34x8xf32>
    %33 = vector.extract_strided_slice %13 {offsets = [0, 72], sizes = [34, 8], strides = [1, 1]} : vector<34x96xf32> to vector<34x8xf32>
    %34 = vector.extract_strided_slice %13 {offsets = [0, 80], sizes = [34, 8], strides = [1, 1]} : vector<34x96xf32> to vector<34x8xf32>
    %35 = vector.extract_strided_slice %13 {offsets = [0, 88], sizes = [34, 8], strides = [1, 1]} : vector<34x96xf32> to vector<34x8xf32>
    %36 = vector.shape_cast %32 : vector<34x8xf32> to vector<1x34x8xf32>
    %37 = vector.shape_cast %33 : vector<34x8xf32> to vector<1x34x8xf32>
    %38 = vector.shape_cast %34 : vector<34x8xf32> to vector<1x34x8xf32>
    %39 = vector.shape_cast %35 : vector<34x8xf32> to vector<1x34x8xf32>
    %40 = tpu.concatenate %36, %37, %38, %39 in 0 : vector<1x34x8xf32>, vector<1x34x8xf32>, vector<1x34x8xf32>, vector<1x34x8xf32> -> vector<4x34x8xf32>
    "tpu.trace_start"() <{level = 10 : i32, message = "hqd,hkd->hqk"}> : () -> ()
    %cst_16 = arith.constant dense<0.000000e+00> : vector<4x34x34xf32>
    %41 = tpu.matmul %22, %31, %cst_16 {dimension_numbers = #tpu.dot_dimension_numbers<[2], [2], [1], [1], [0, 0, 0, 1, 1, 1], [0], [0]>} : vector<4x34x8xf32>, vector<4x34x8xf32>, vector<4x34x34xf32> -> vector<4x34x34xf32>
    "tpu.trace_stop"() : () -> ()
    %42 = vector.shape_cast %5 : vector<34x34xf32> to vector<1x34x34xf32>
    %43 = vector.broadcast %42 : vector<1x34x34xf32> to vector<4x34x34xf32>
    %44 = arith.addf %41, %43 : vector<4x34x34xf32>
    %cst_17 = arith.constant dense<0xFF800000> : vector<4x34xf32>
    %45 = vector.multi_reduction <maximumf>, %44, %cst_17 [2] : vector<4x34x34xf32> to vector<4x34xf32>
    %46 = vector.shape_cast %45 : vector<4x34xf32> to vector<4x34x1xf32>
    %47 = vector.broadcast %46 : vector<4x34x1xf32> to vector<4x34x34xf32>
    %48 = arith.subf %44, %47 : vector<4x34x34xf32>
    %49 = math.exp %48 : vector<4x34x34xf32>
    %cst_18 = arith.constant dense<0.000000e+00> : vector<4x34xf32>
    %50 = vector.multi_reduction <add>, %49, %cst_18 [2] : vector<4x34x34xf32> to vector<4x34xf32>
    %51 = vector.shape_cast %50 : vector<4x34xf32> to vector<4x34x1xf32>
    %52 = tpu.reciprocal %51 {approx = true} : vector<4x34x1xf32> -> vector<4x34x1xf32>
    %53 = vector.broadcast %52 : vector<4x34x1xf32> to vector<4x34x34xf32>
    %54 = arith.mulf %49, %53 : vector<4x34x34xf32>
    "tpu.trace_start"() <{level = 10 : i32, message = "hqk,hkd->hqd"}> : () -> ()
    %cst_19 = arith.constant dense<0.000000e+00> : vector<4x34x8xf32>
    %55 = tpu.matmul %54, %40, %cst_19 {dimension_numbers = #tpu.dot_dimension_numbers<[2], [1], [1], [2], [0, 0, 0, 1, 1, 2], [0], [0]>} : vector<4x34x34xf32>, vector<4x34x8xf32>, vector<4x34x8xf32> -> vector<4x34x8xf32>
    "tpu.trace_stop"() : () -> ()
    %56 = vector.extract_strided_slice %55 {offsets = [0, 0, 0], sizes = [1, 34, 8], strides = [1, 1, 1]} : vector<4x34x8xf32> to vector<1x34x8xf32>
    %57 = vector.shape_cast %56 : vector<1x34x8xf32> to vector<34x8xf32>
    %58 = vector.extract_strided_slice %55 {offsets = [1, 0, 0], sizes = [1, 34, 8], strides = [1, 1, 1]} : vector<4x34x8xf32> to vector<1x34x8xf32>
    %59 = vector.shape_cast %58 : vector<1x34x8xf32> to vector<34x8xf32>
    %60 = vector.extract_strided_slice %55 {offsets = [2, 0, 0], sizes = [1, 34, 8], strides = [1, 1, 1]} : vector<4x34x8xf32> to vector<1x34x8xf32>
    %61 = vector.shape_cast %60 : vector<1x34x8xf32> to vector<34x8xf32>
    %62 = vector.extract_strided_slice %55 {offsets = [3, 0, 0], sizes = [1, 34, 8], strides = [1, 1, 1]} : vector<4x34x8xf32> to vector<1x34x8xf32>
    %63 = vector.shape_cast %62 : vector<1x34x8xf32> to vector<34x8xf32>
    %64 = tpu.concatenate %57, %59, %61, %63 in 1 : vector<34x8xf32>, vector<34x8xf32>, vector<34x8xf32>, vector<34x8xf32> -> vector<34x32xf32>
    %c0_20 = arith.constant 0 : index
    %c0_21 = arith.constant 0 : index
    %c0_22 = arith.constant 0 : index
    %65 = vector.load %arg7[%c0_20, %c0_21, %c0_22] : memref<2x32x32xf32, #tpu.memory_space<vmem>>, vector<1x32x32xf32>
    %66 = vector.shape_cast %65 : vector<1x32x32xf32> to vector<32x32xf32>
    %cst_23 = arith.constant dense<0.000000e+00> : vector<34x32xf32>
    %67 = tpu.matmul %64, %66, %cst_23 {dimension_numbers = #tpu.dot_dimension_numbers<[1], [0], [0], [1], [0, 0, 1, 1], [], []>} : vector<34x32xf32>, vector<32x32xf32>, vector<34x32xf32> -> vector<34x32xf32>
    %68 = vector.extract_strided_slice %7 {offsets = [0, 0], sizes = [1, 32], strides = [1, 1]} : vector<6x32xf32> to vector<1x32xf32>
    %69 = vector.broadcast %68 : vector<1x32xf32> to vector<34x32xf32>
    %70 = arith.addf %67, %69 : vector<34x32xf32>
    %71 = arith.addf %4, %70 : vector<34x32xf32>
    %72 = vector.extract_strided_slice %7 {offsets = [1, 0], sizes = [1, 32], strides = [1, 1]} : vector<6x32xf32> to vector<1x32xf32>
    %73 = vector.extract_strided_slice %7 {offsets = [2, 0], sizes = [1, 32], strides = [1, 1]} : vector<6x32xf32> to vector<1x32xf32>
    %cst_24 = arith.constant dense<0.000000e+00> : vector<34xf32>
    %74 = vector.multi_reduction <add>, %71, %cst_24 [1] : vector<34x32xf32> to vector<34xf32>
    %75 = vector.shape_cast %74 : vector<34xf32> to vector<34x1xf32>
    %cst_25 = arith.constant 3.200000e+01 : f32
    %76 = vector.broadcast %cst_25 : f32 to vector<34x1xf32>
    %77 = arith.divf %75, %76 : vector<34x1xf32>
    %78 = vector.broadcast %77 : vector<34x1xf32> to vector<34x32xf32>
    %79 = arith.subf %71, %78 : vector<34x32xf32>
    %80 = arith.mulf %79, %79 : vector<34x32xf32>
    %cst_26 = arith.constant dense<0.000000e+00> : vector<34xf32>
    %81 = vector.multi_reduction <add>, %80, %cst_26 [1] : vector<34x32xf32> to vector<34xf32>
    %82 = vector.shape_cast %81 : vector<34xf32> to vector<34x1xf32>
    %cst_27 = arith.constant 3.200000e+01 : f32
    %83 = vector.broadcast %cst_27 : f32 to vector<34x1xf32>
    %84 = arith.divf %82, %83 : vector<34x1xf32>
    %85 = vector.broadcast %77 : vector<34x1xf32> to vector<34x32xf32>
    %86 = arith.subf %71, %85 : vector<34x32xf32>
    %cst_28 = arith.constant 9.99999974E-6 : f32
    %87 = vector.broadcast %cst_28 : f32 to vector<34x1xf32>
    %88 = arith.addf %84, %87 : vector<34x1xf32>
    %89 = math.rsqrt %88 : vector<34x1xf32>
    %90 = vector.broadcast %89 : vector<34x1xf32> to vector<34x32xf32>
    %91 = arith.mulf %86, %90 : vector<34x32xf32>
    %92 = vector.broadcast %72 : vector<1x32xf32> to vector<34x32xf32>
    %93 = arith.mulf %91, %92 : vector<34x32xf32>
    %94 = vector.broadcast %73 : vector<1x32xf32> to vector<34x32xf32>
    %95 = arith.addf %93, %94 : vector<34x32xf32>
    %c0_29 = arith.constant 0 : index
    %c0_30 = arith.constant 0 : index
    %c0_31 = arith.constant 0 : index
    %96 = vector.load %arg9[%c0_29, %c0_30, %c0_31] : memref<2x32x64xf32, #tpu.memory_space<vmem>>, vector<1x32x64xf32>
    %97 = vector.shape_cast %96 : vector<1x32x64xf32> to vector<32x64xf32>
    %cst_32 = arith.constant dense<0.000000e+00> : vector<34x64xf32>
    %98 = tpu.matmul %95, %97, %cst_32 {dimension_numbers = #tpu.dot_dimension_numbers<[1], [0], [0], [1], [0, 0, 1, 1], [], []>} : vector<34x32xf32>, vector<32x64xf32>, vector<34x64xf32> -> vector<34x64xf32>
    %c0_33 = arith.constant 0 : index
    %c0_34 = arith.constant 0 : index
    %99 = vector.load %arg10[%c0_33, %c0_34] : memref<2x64xf32, #tpu.memory_space<vmem>>, vector<1x64xf32>
    %100 = vector.broadcast %99 : vector<1x64xf32> to vector<34x64xf32>
    %101 = arith.addf %98, %100 : vector<34x64xf32>
    %cst_35 = arith.constant 0.000000e+00 : f32
    %102 = vector.broadcast %cst_35 : f32 to vector<34x64xf32>
    %103 = arith.maximumf %101, %102 : vector<34x64xf32>
    %c0_36 = arith.constant 0 : index
    %c0_37 = arith.constant 0 : index
    %c0_38 = arith.constant 0 : index
    %104 = vector.load %arg11[%c0_36, %c0_37, %c0_38] : memref<2x64x32xf32, #tpu.memory_space<vmem>>, vector<1x64x32xf32>
    %105 = vector.shape_cast %104 : vector<1x64x32xf32> to vector<64x32xf32>
    %cst_39 = arith.constant dense<0.000000e+00> : vector<34x32xf32>
    %106 = tpu.matmul %103, %105, %cst_39 {dimension_numbers = #tpu.dot_dimension_numbers<[1], [0], [0], [1], [0, 0, 1, 1], [], []>} : vector<34x64xf32>, vector<64x32xf32>, vector<34x32xf32> -> vector<34x32xf32>
    %107 = vector.extract_strided_slice %7 {offsets = [3, 0], sizes = [1, 32], strides = [1, 1]} : vector<6x32xf32> to vector<1x32xf32>
    %108 = vector.broadcast %107 : vector<1x32xf32> to vector<34x32xf32>
    %109 = arith.addf %106, %108 : vector<34x32xf32>
    %110 = arith.addf %95, %109 : vector<34x32xf32>
    %111 = vector.extract_strided_slice %7 {offsets = [4, 0], sizes = [1, 32], strides = [1, 1]} : vector<6x32xf32> to vector<1x32xf32>
    %112 = vector.extract_strided_slice %7 {offsets = [5, 0], sizes = [1, 32], strides = [1, 1]} : vector<6x32xf32> to vector<1x32xf32>
    %cst_40 = arith.constant dense<0.000000e+00> : vector<34xf32>
    %113 = vector.multi_reduction <add>, %110, %cst_40 [1] : vector<34x32xf32> to vector<34xf32>
    %114 = vector.shape_cast %113 : vector<34xf32> to vector<34x1xf32>
    %cst_41 = arith.constant 3.200000e+01 : f32
    %115 = vector.broadcast %cst_41 : f32 to vector<34x1xf32>
    %116 = arith.divf %114, %115 : vector<34x1xf32>
    %117 = vector.broadcast %116 : vector<34x1xf32> to vector<34x32xf32>
    %118 = arith.subf %110, %117 : vector<34x32xf32>
    %119 = arith.mulf %118, %118 : vector<34x32xf32>
    %cst_42 = arith.constant dense<0.000000e+00> : vector<34xf32>
    %120 = vector.multi_reduction <add>, %119, %cst_42 [1] : vector<34x32xf32> to vector<34xf32>
    %121 = vector.shape_cast %120 : vector<34xf32> to vector<34x1xf32>
    %cst_43 = arith.constant 3.200000e+01 : f32
    %122 = vector.broadcast %cst_43 : f32 to vector<34x1xf32>
    %123 = arith.divf %121, %122 : vector<34x1xf32>
    %124 = vector.broadcast %116 : vector<34x1xf32> to vector<34x32xf32>
    %125 = arith.subf %110, %124 : vector<34x32xf32>
    %cst_44 = arith.constant 9.99999974E-6 : f32
    %126 = vector.broadcast %cst_44 : f32 to vector<34x1xf32>
    %127 = arith.addf %123, %126 : vector<34x1xf32>
    %128 = math.rsqrt %127 : vector<34x1xf32>
    %129 = vector.broadcast %128 : vector<34x1xf32> to vector<34x32xf32>
    %130 = arith.mulf %125, %129 : vector<34x32xf32>
    %131 = vector.broadcast %111 : vector<1x32xf32> to vector<34x32xf32>
    %132 = arith.mulf %130, %131 : vector<34x32xf32>
    %133 = vector.broadcast %112 : vector<1x32xf32> to vector<34x32xf32>
    %134 = arith.addf %132, %133 : vector<34x32xf32>
    %c1 = arith.constant 1 : index
    %c0_45 = arith.constant 0 : index
    %c0_46 = arith.constant 0 : index
    %135 = vector.load %arg8[%c1, %c0_45, %c0_46] : memref<2x6x32xf32, #tpu.memory_space<vmem>>, vector<1x6x32xf32>
    %136 = vector.shape_cast %135 : vector<1x6x32xf32> to vector<6x32xf32>
    %c1_47 = arith.constant 1 : index
    %c0_48 = arith.constant 0 : index
    %c0_49 = arith.constant 0 : index
    %137 = vector.load %arg5[%c1_47, %c0_48, %c0_49] : memref<2x32x96xf32, #tpu.memory_space<vmem>>, vector<1x32x96xf32>
    %138 = vector.shape_cast %137 : vector<1x32x96xf32> to vector<32x96xf32>
    %cst_50 = arith.constant dense<0.000000e+00> : vector<34x96xf32>
    %139 = tpu.matmul %134, %138, %cst_50 {dimension_numbers = #tpu.dot_dimension_numbers<[1], [0], [0], [1], [0, 0, 1, 1], [], []>} : vector<34x32xf32>, vector<32x96xf32>, vector<34x96xf32> -> vector<34x96xf32>
    %c1_51 = arith.constant 1 : index
    %c0_52 = arith.constant 0 : index
    %140 = vector.load %arg6[%c1_51, %c0_52] : memref<2x96xf32, #tpu.memory_space<vmem>>, vector<1x96xf32>
    %141 = vector.broadcast %140 : vector<1x96xf32> to vector<34x96xf32>
    %142 = arith.addf %139, %141 : vector<34x96xf32>
    %143 = vector.extract_strided_slice %142 {offsets = [0, 0], sizes = [34, 8], strides = [1, 1]} : vector<34x96xf32> to vector<34x8xf32>
    %144 = vector.extract_strided_slice %142 {offsets = [0, 8], sizes = [34, 8], strides = [1, 1]} : vector<34x96xf32> to vector<34x8xf32>
    %145 = vector.extract_strided_slice %142 {offsets = [0, 16], sizes = [34, 8], strides = [1, 1]} : vector<34x96xf32> to vector<34x8xf32>
    %146 = vector.extract_strided_slice %142 {offsets = [0, 24], sizes = [34, 8], strides = [1, 1]} : vector<34x96xf32> to vector<34x8xf32>
    %147 = vector.shape_cast %143 : vector<34x8xf32> to vector<1x34x8xf32>
    %148 = vector.shape_cast %144 : vector<34x8xf32> to vector<1x34x8xf32>
    %149 = vector.shape_cast %145 : vector<34x8xf32> to vector<1x34x8xf32>
    %150 = vector.shape_cast %146 : vector<34x8xf32> to vector<1x34x8xf32>
    %151 = tpu.concatenate %147, %148, %149, %150 in 0 : vector<1x34x8xf32>, vector<1x34x8xf32>, vector<1x34x8xf32>, vector<1x34x8xf32> -> vector<4x34x8xf32>
    %152 = vector.extract_strided_slice %142 {offsets = [0, 32], sizes = [34, 8], strides = [1, 1]} : vector<34x96xf32> to vector<34x8xf32>
    %153 = vector.extract_strided_slice %142 {offsets = [0, 40], sizes = [34, 8], strides = [1, 1]} : vector<34x96xf32> to vector<34x8xf32>
    %154 = vector.extract_strided_slice %142 {offsets = [0, 48], sizes = [34, 8], strides = [1, 1]} : vector<34x96xf32> to vector<34x8xf32>
    %155 = vector.extract_strided_slice %142 {offsets = [0, 56], sizes = [34, 8], strides = [1, 1]} : vector<34x96xf32> to vector<34x8xf32>
    %156 = vector.shape_cast %152 : vector<34x8xf32> to vector<1x34x8xf32>
    %157 = vector.shape_cast %153 : vector<34x8xf32> to vector<1x34x8xf32>
    %158 = vector.shape_cast %154 : vector<34x8xf32> to vector<1x34x8xf32>
    %159 = vector.shape_cast %155 : vector<34x8xf32> to vector<1x34x8xf32>
    %160 = tpu.concatenate %156, %157, %158, %159 in 0 : vector<1x34x8xf32>, vector<1x34x8xf32>, vector<1x34x8xf32>, vector<1x34x8xf32> -> vector<4x34x8xf32>
    %161 = vector.extract_strided_slice %142 {offsets = [0, 64], sizes = [34, 8], strides = [1, 1]} : vector<34x96xf32> to vector<34x8xf32>
    %162 = vector.extract_strided_slice %142 {offsets = [0, 72], sizes = [34, 8], strides = [1, 1]} : vector<34x96xf32> to vector<34x8xf32>
    %163 = vector.extract_strided_slice %142 {offsets = [0, 80], sizes = [34, 8], strides = [1, 1]} : vector<34x96xf32> to vector<34x8xf32>
    %164 = vector.extract_strided_slice %142 {offsets = [0, 88], sizes = [34, 8], strides = [1, 1]} : vector<34x96xf32> to vector<34x8xf32>
    %165 = vector.shape_cast %161 : vector<34x8xf32> to vector<1x34x8xf32>
    %166 = vector.shape_cast %162 : vector<34x8xf32> to vector<1x34x8xf32>
    %167 = vector.shape_cast %163 : vector<34x8xf32> to vector<1x34x8xf32>
    %168 = vector.shape_cast %164 : vector<34x8xf32> to vector<1x34x8xf32>
    %169 = tpu.concatenate %165, %166, %167, %168 in 0 : vector<1x34x8xf32>, vector<1x34x8xf32>, vector<1x34x8xf32>, vector<1x34x8xf32> -> vector<4x34x8xf32>
    "tpu.trace_start"() <{level = 10 : i32, message = "hqd,hkd->hqk"}> : () -> ()
    %cst_53 = arith.constant dense<0.000000e+00> : vector<4x34x34xf32>
    %170 = tpu.matmul %151, %160, %cst_53 {dimension_numbers = #tpu.dot_dimension_numbers<[2], [2], [1], [1], [0, 0, 0, 1, 1, 1], [0], [0]>} : vector<4x34x8xf32>, vector<4x34x8xf32>, vector<4x34x34xf32> -> vector<4x34x34xf32>
    "tpu.trace_stop"() : () -> ()
    %171 = vector.shape_cast %5 : vector<34x34xf32> to vector<1x34x34xf32>
    %172 = vector.broadcast %171 : vector<1x34x34xf32> to vector<4x34x34xf32>
    %173 = arith.addf %170, %172 : vector<4x34x34xf32>
    %cst_54 = arith.constant dense<0xFF800000> : vector<4x34xf32>
    %174 = vector.multi_reduction <maximumf>, %173, %cst_54 [2] : vector<4x34x34xf32> to vector<4x34xf32>
    %175 = vector.shape_cast %174 : vector<4x34xf32> to vector<4x34x1xf32>
    %176 = vector.broadcast %175 : vector<4x34x1xf32> to vector<4x34x34xf32>
    %177 = arith.subf %173, %176 : vector<4x34x34xf32>
    %178 = math.exp %177 : vector<4x34x34xf32>
    %cst_55 = arith.constant dense<0.000000e+00> : vector<4x34xf32>
    %179 = vector.multi_reduction <add>, %178, %cst_55 [2] : vector<4x34x34xf32> to vector<4x34xf32>
    %180 = vector.shape_cast %179 : vector<4x34xf32> to vector<4x34x1xf32>
    %181 = tpu.reciprocal %180 {approx = true} : vector<4x34x1xf32> -> vector<4x34x1xf32>
    %182 = vector.broadcast %181 : vector<4x34x1xf32> to vector<4x34x34xf32>
    %183 = arith.mulf %178, %182 : vector<4x34x34xf32>
    "tpu.trace_start"() <{level = 10 : i32, message = "hqk,hkd->hqd"}> : () -> ()
    %cst_56 = arith.constant dense<0.000000e+00> : vector<4x34x8xf32>
    %184 = tpu.matmul %183, %169, %cst_56 {dimension_numbers = #tpu.dot_dimension_numbers<[2], [1], [1], [2], [0, 0, 0, 1, 1, 2], [0], [0]>} : vector<4x34x34xf32>, vector<4x34x8xf32>, vector<4x34x8xf32> -> vector<4x34x8xf32>
    "tpu.trace_stop"() : () -> ()
    %185 = vector.extract_strided_slice %184 {offsets = [0, 0, 0], sizes = [1, 34, 8], strides = [1, 1, 1]} : vector<4x34x8xf32> to vector<1x34x8xf32>
    %186 = vector.shape_cast %185 : vector<1x34x8xf32> to vector<34x8xf32>
    %187 = vector.extract_strided_slice %184 {offsets = [1, 0, 0], sizes = [1, 34, 8], strides = [1, 1, 1]} : vector<4x34x8xf32> to vector<1x34x8xf32>
    %188 = vector.shape_cast %187 : vector<1x34x8xf32> to vector<34x8xf32>
    %189 = vector.extract_strided_slice %184 {offsets = [2, 0, 0], sizes = [1, 34, 8], strides = [1, 1, 1]} : vector<4x34x8xf32> to vector<1x34x8xf32>
    %190 = vector.shape_cast %189 : vector<1x34x8xf32> to vector<34x8xf32>
    %191 = vector.extract_strided_slice %184 {offsets = [3, 0, 0], sizes = [1, 34, 8], strides = [1, 1, 1]} : vector<4x34x8xf32> to vector<1x34x8xf32>
    %192 = vector.shape_cast %191 : vector<1x34x8xf32> to vector<34x8xf32>
    %193 = tpu.concatenate %186, %188, %190, %192 in 1 : vector<34x8xf32>, vector<34x8xf32>, vector<34x8xf32>, vector<34x8xf32> -> vector<34x32xf32>
    %c1_57 = arith.constant 1 : index
    %c0_58 = arith.constant 0 : index
    %c0_59 = arith.constant 0 : index
    %194 = vector.load %arg7[%c1_57, %c0_58, %c0_59] : memref<2x32x32xf32, #tpu.memory_space<vmem>>, vector<1x32x32xf32>
    %195 = vector.shape_cast %194 : vector<1x32x32xf32> to vector<32x32xf32>
    %cst_60 = arith.constant dense<0.000000e+00> : vector<34x32xf32>
    %196 = tpu.matmul %193, %195, %cst_60 {dimension_numbers = #tpu.dot_dimension_numbers<[1], [0], [0], [1], [0, 0, 1, 1], [], []>} : vector<34x32xf32>, vector<32x32xf32>, vector<34x32xf32> -> vector<34x32xf32>
    %197 = vector.extract_strided_slice %136 {offsets = [0, 0], sizes = [1, 32], strides = [1, 1]} : vector<6x32xf32> to vector<1x32xf32>
    %198 = vector.broadcast %197 : vector<1x32xf32> to vector<34x32xf32>
    %199 = arith.addf %196, %198 : vector<34x32xf32>
    %200 = arith.addf %134, %199 : vector<34x32xf32>
    %201 = vector.extract_strided_slice %136 {offsets = [1, 0], sizes = [1, 32], strides = [1, 1]} : vector<6x32xf32> to vector<1x32xf32>
    %202 = vector.extract_strided_slice %136 {offsets = [2, 0], sizes = [1, 32], strides = [1, 1]} : vector<6x32xf32> to vector<1x32xf32>
    %cst_61 = arith.constant dense<0.000000e+00> : vector<34xf32>
    %203 = vector.multi_reduction <add>, %200, %cst_61 [1] : vector<34x32xf32> to vector<34xf32>
    %204 = vector.shape_cast %203 : vector<34xf32> to vector<34x1xf32>
    %cst_62 = arith.constant 3.200000e+01 : f32
    %205 = vector.broadcast %cst_62 : f32 to vector<34x1xf32>
    %206 = arith.divf %204, %205 : vector<34x1xf32>
    %207 = vector.broadcast %206 : vector<34x1xf32> to vector<34x32xf32>
    %208 = arith.subf %200, %207 : vector<34x32xf32>
    %209 = arith.mulf %208, %208 : vector<34x32xf32>
    %cst_63 = arith.constant dense<0.000000e+00> : vector<34xf32>
    %210 = vector.multi_reduction <add>, %209, %cst_63 [1] : vector<34x32xf32> to vector<34xf32>
    %211 = vector.shape_cast %210 : vector<34xf32> to vector<34x1xf32>
    %cst_64 = arith.constant 3.200000e+01 : f32
    %212 = vector.broadcast %cst_64 : f32 to vector<34x1xf32>
    %213 = arith.divf %211, %212 : vector<34x1xf32>
    %214 = vector.broadcast %206 : vector<34x1xf32> to vector<34x32xf32>
    %215 = arith.subf %200, %214 : vector<34x32xf32>
    %cst_65 = arith.constant 9.99999974E-6 : f32
    %216 = vector.broadcast %cst_65 : f32 to vector<34x1xf32>
    %217 = arith.addf %213, %216 : vector<34x1xf32>
    %218 = math.rsqrt %217 : vector<34x1xf32>
    %219 = vector.broadcast %218 : vector<34x1xf32> to vector<34x32xf32>
    %220 = arith.mulf %215, %219 : vector<34x32xf32>
    %221 = vector.broadcast %201 : vector<1x32xf32> to vector<34x32xf32>
    %222 = arith.mulf %220, %221 : vector<34x32xf32>
    %223 = vector.broadcast %202 : vector<1x32xf32> to vector<34x32xf32>
    %224 = arith.addf %222, %223 : vector<34x32xf32>
    %c1_66 = arith.constant 1 : index
    %c0_67 = arith.constant 0 : index
    %c0_68 = arith.constant 0 : index
    %225 = vector.load %arg9[%c1_66, %c0_67, %c0_68] : memref<2x32x64xf32, #tpu.memory_space<vmem>>, vector<1x32x64xf32>
    %226 = vector.shape_cast %225 : vector<1x32x64xf32> to vector<32x64xf32>
    %cst_69 = arith.constant dense<0.000000e+00> : vector<34x64xf32>
    %227 = tpu.matmul %224, %226, %cst_69 {dimension_numbers = #tpu.dot_dimension_numbers<[1], [0], [0], [1], [0, 0, 1, 1], [], []>} : vector<34x32xf32>, vector<32x64xf32>, vector<34x64xf32> -> vector<34x64xf32>
    %c1_70 = arith.constant 1 : index
    %c0_71 = arith.constant 0 : index
    %228 = vector.load %arg10[%c1_70, %c0_71] : memref<2x64xf32, #tpu.memory_space<vmem>>, vector<1x64xf32>
    %229 = vector.broadcast %228 : vector<1x64xf32> to vector<34x64xf32>
    %230 = arith.addf %227, %229 : vector<34x64xf32>
    %cst_72 = arith.constant 0.000000e+00 : f32
    %231 = vector.broadcast %cst_72 : f32 to vector<34x64xf32>
    %232 = arith.maximumf %230, %231 : vector<34x64xf32>
    %c1_73 = arith.constant 1 : index
    %c0_74 = arith.constant 0 : index
    %c0_75 = arith.constant 0 : index
    %233 = vector.load %arg11[%c1_73, %c0_74, %c0_75] : memref<2x64x32xf32, #tpu.memory_space<vmem>>, vector<1x64x32xf32>
    %234 = vector.shape_cast %233 : vector<1x64x32xf32> to vector<64x32xf32>
    %cst_76 = arith.constant dense<0.000000e+00> : vector<34x32xf32>
    %235 = tpu.matmul %232, %234, %cst_76 {dimension_numbers = #tpu.dot_dimension_numbers<[1], [0], [0], [1], [0, 0, 1, 1], [], []>} : vector<34x64xf32>, vector<64x32xf32>, vector<34x32xf32> -> vector<34x32xf32>
    %236 = vector.extract_strided_slice %136 {offsets = [3, 0], sizes = [1, 32], strides = [1, 1]} : vector<6x32xf32> to vector<1x32xf32>
    %237 = vector.broadcast %236 : vector<1x32xf32> to vector<34x32xf32>
    %238 = arith.addf %235, %237 : vector<34x32xf32>
    %239 = arith.addf %224, %238 : vector<34x32xf32>
    %240 = vector.extract_strided_slice %136 {offsets = [4, 0], sizes = [1, 32], strides = [1, 1]} : vector<6x32xf32> to vector<1x32xf32>
    %241 = vector.extract_strided_slice %136 {offsets = [5, 0], sizes = [1, 32], strides = [1, 1]} : vector<6x32xf32> to vector<1x32xf32>
    %cst_77 = arith.constant dense<0.000000e+00> : vector<34xf32>
    %242 = vector.multi_reduction <add>, %239, %cst_77 [1] : vector<34x32xf32> to vector<34xf32>
    %243 = vector.shape_cast %242 : vector<34xf32> to vector<34x1xf32>
    %cst_78 = arith.constant 3.200000e+01 : f32
    %244 = vector.broadcast %cst_78 : f32 to vector<34x1xf32>
    %245 = arith.divf %243, %244 : vector<34x1xf32>
    %246 = vector.broadcast %245 : vector<34x1xf32> to vector<34x32xf32>
    %247 = arith.subf %239, %246 : vector<34x32xf32>
    %248 = arith.mulf %247, %247 : vector<34x32xf32>
    %cst_79 = arith.constant dense<0.000000e+00> : vector<34xf32>
    %249 = vector.multi_reduction <add>, %248, %cst_79 [1] : vector<34x32xf32> to vector<34xf32>
    %250 = vector.shape_cast %249 : vector<34xf32> to vector<34x1xf32>
    %cst_80 = arith.constant 3.200000e+01 : f32
    %251 = vector.broadcast %cst_80 : f32 to vector<34x1xf32>
    %252 = arith.divf %250, %251 : vector<34x1xf32>
    %253 = vector.broadcast %245 : vector<34x1xf32> to vector<34x32xf32>
    %254 = arith.subf %239, %253 : vector<34x32xf32>
    %cst_81 = arith.constant 9.99999974E-6 : f32
    %255 = vector.broadcast %cst_81 : f32 to vector<34x1xf32>
    %256 = arith.addf %252, %255 : vector<34x1xf32>
    %257 = math.rsqrt %256 : vector<34x1xf32>
    %258 = vector.broadcast %257 : vector<34x1xf32> to vector<34x32xf32>
    %259 = arith.mulf %254, %258 : vector<34x32xf32>
    %260 = vector.broadcast %240 : vector<1x32xf32> to vector<34x32xf32>
    %261 = arith.mulf %259, %260 : vector<34x32xf32>
    %262 = vector.broadcast %241 : vector<1x32xf32> to vector<34x32xf32>
    %263 = arith.addf %261, %262 : vector<34x32xf32>
    %264 = vector.extract_strided_slice %263 {offsets = [0, 0], sizes = [1, 32], strides = [1, 1]} : vector<34x32xf32> to vector<1x32xf32>
    %265 = vector.extract_strided_slice %263 {offsets = [17, 0], sizes = [1, 32], strides = [1, 1]} : vector<34x32xf32> to vector<1x32xf32>
    %266 = tpu.concatenate %264, %265 in 0 : vector<1x32xf32>, vector<1x32xf32> -> vector<2x32xf32>
    %c0_82 = arith.constant 0 : index
    %c0_83 = arith.constant 0 : index
    %267 = vector.load %arg12[%c0_82, %c0_83] : memref<2x32xf32, #tpu.memory_space<vmem>>, vector<1x32xf32>
    %c1_84 = arith.constant 1 : index
    %c0_85 = arith.constant 0 : index
    %268 = vector.load %arg12[%c1_84, %c0_85] : memref<2x32xf32, #tpu.memory_space<vmem>>, vector<1x32xf32>
    %cst_86 = arith.constant dense<0.000000e+00> : vector<2xf32>
    %269 = vector.multi_reduction <add>, %266, %cst_86 [1] : vector<2x32xf32> to vector<2xf32>
    %270 = vector.shape_cast %269 : vector<2xf32> to vector<2x1xf32>
    %cst_87 = arith.constant 3.200000e+01 : f32
    %271 = vector.broadcast %cst_87 : f32 to vector<2x1xf32>
    %272 = arith.divf %270, %271 : vector<2x1xf32>
    %273 = vector.broadcast %272 : vector<2x1xf32> to vector<2x32xf32>
    %274 = arith.subf %266, %273 : vector<2x32xf32>
    %275 = arith.mulf %274, %274 : vector<2x32xf32>
    %cst_88 = arith.constant dense<0.000000e+00> : vector<2xf32>
    %276 = vector.multi_reduction <add>, %275, %cst_88 [1] : vector<2x32xf32> to vector<2xf32>
    %277 = vector.shape_cast %276 : vector<2xf32> to vector<2x1xf32>
    %cst_89 = arith.constant 3.200000e+01 : f32
    %278 = vector.broadcast %cst_89 : f32 to vector<2x1xf32>
    %279 = arith.divf %277, %278 : vector<2x1xf32>
    %280 = vector.broadcast %272 : vector<2x1xf32> to vector<2x32xf32>
    %281 = arith.subf %266, %280 : vector<2x32xf32>
    %cst_90 = arith.constant 9.99999974E-6 : f32
    %282 = vector.broadcast %cst_90 : f32 to vector<2x1xf32>
    %283 = arith.addf %279, %282 : vector<2x1xf32>
    %284 = math.rsqrt %283 : vector<2x1xf32>
    %285 = vector.broadcast %284 : vector<2x1xf32> to vector<2x32xf32>
    %286 = arith.mulf %281, %285 : vector<2x32xf32>
    %287 = vector.broadcast %267 : vector<1x32xf32> to vector<2x32xf32>
    %288 = arith.mulf %286, %287 : vector<2x32xf32>
    %289 = vector.broadcast %268 : vector<1x32xf32> to vector<2x32xf32>
    %290 = arith.addf %288, %289 : vector<2x32xf32>
    %c0_91 = arith.constant 0 : index
    %c0_92 = arith.constant 0 : index
    %291 = vector.load %arg13[%c0_91, %c0_92] : memref<32x5xf32, #tpu.memory_space<vmem>>, vector<32x5xf32>
    %cst_93 = arith.constant dense<0.000000e+00> : vector<2x5xf32>
    %292 = tpu.matmul %290, %291, %cst_93 {dimension_numbers = #tpu.dot_dimension_numbers<[1], [0], [0], [1], [0, 0, 1, 1], [], []>} : vector<2x32xf32>, vector<32x5xf32>, vector<2x5xf32> -> vector<2x5xf32>
    %c0_94 = arith.constant 0 : index
    %c0_95 = arith.constant 0 : index
    %293 = vector.load %arg14[%c0_94, %c0_95] : memref<1x5xf32, #tpu.memory_space<vmem>>, vector<1x5xf32>
    %294 = vector.broadcast %293 : vector<1x5xf32> to vector<2x5xf32>
    %295 = arith.addf %292, %294 : vector<2x5xf32>
    %c0_96 = arith.constant 0 : index
    %c0_97 = arith.constant 0 : index
    %296 = vector.load %arg15[%c0_96, %c0_97] : memref<2x5xf32, #tpu.memory_space<vmem>>, vector<2x5xf32>
    tpu.vector_store %arg15[%c0_96, %c0_97], %295 {strides = array<i32>} : memref<2x5xf32, #tpu.memory_space<vmem>>, vector<2x5xf32>,
    return
  }
  func.func @transform_0(%arg0: i32) -> (i32, i32) {
    %c0_i32 = arith.constant 0 : i32
    %c0_i32_0 = arith.constant 0 : i32
    %c0_i32_1 = arith.constant 0 : i32
    return %c0_i32, %c0_i32_0 : i32, i32
  }
  func.func @transform_1(%arg0: i32) -> (i32, i32) {
    %c0_i32 = arith.constant 0 : i32
    %c0_i32_0 = arith.constant 0 : i32
    %c0_i32_1 = arith.constant 0 : i32
    return %c0_i32, %c0_i32_0 : i32, i32
  }
  func.func @transform_2(%arg0: i32) -> (i32, i32) {
    %c0_i32 = arith.constant 0 : i32
    %c0_i32_0 = arith.constant 0 : i32
    %c0_i32_1 = arith.constant 0 : i32
    return %c0_i32, %c0_i32_0 : i32, i32
  }
  func.func @transform_3(%arg0: i32) -> (i32, i32) {
    %c0_i32 = arith.constant 0 : i32
    %c0_i32_0 = arith.constant 0 : i32
    %c0_i32_1 = arith.constant 0 : i32
    return %c0_i32, %c0_i32_0 : i32, i32
  }
  func.func @transform_4(%arg0: i32) -> (i32, i32, i32) {
    %c0_i32 = arith.constant 0 : i32
    %c0_i32_0 = arith.constant 0 : i32
    %c0_i32_1 = arith.constant 0 : i32
    %c0_i32_2 = arith.constant 0 : i32
    return %c0_i32, %c0_i32_0, %c0_i32_1 : i32, i32, i32
  }
  func.func @transform_5(%arg0: i32) -> (i32, i32) {
    %c0_i32 = arith.constant 0 : i32
    %c0_i32_0 = arith.constant 0 : i32
    %c0_i32_1 = arith.constant 0 : i32
    return %c0_i32, %c0_i32_0 : i32, i32
  }
  func.func @transform_6(%arg0: i32) -> (i32, i32, i32) {
    %c0_i32 = arith.constant 0 : i32
    %c0_i32_0 = arith.constant 0 : i32
    %c0_i32_1 = arith.constant 0 : i32
    %c0_i32_2 = arith.constant 0 : i32
    return %c0_i32, %c0_i32_0, %c0_i32_1 : i32, i32, i32
  }
  func.func @transform_7(%arg0: i32) -> (i32, i32, i32) {
    %c0_i32 = arith.constant 0 : i32
    %c0_i32_0 = arith.constant 0 : i32
    %c0_i32_1 = arith.constant 0 : i32
    %c0_i32_2 = arith.constant 0 : i32
    return %c0_i32, %c0_i32_0, %c0_i32_1 : i32, i32, i32
  }
  func.func @transform_8(%arg0: i32) -> (i32, i32, i32) {
    %c0_i32 = arith.constant 0 : i32
    %c0_i32_0 = arith.constant 0 : i32
    %c0_i32_1 = arith.constant 0 : i32
    %c0_i32_2 = arith.constant 0 : i32
    return %c0_i32, %c0_i32_0, %c0_i32_1 : i32, i32, i32
  }
  func.func @transform_9(%arg0: i32) -> (i32, i32) {
    %c0_i32 = arith.constant 0 : i32
    %c0_i32_0 = arith.constant 0 : i32
    %c0_i32_1 = arith.constant 0 : i32
    return %c0_i32, %c0_i32_0 : i32, i32
  }
  func.func @transform_10(%arg0: i32) -> (i32, i32, i32) {
    %c0_i32 = arith.constant 0 : i32
    %c0_i32_0 = arith.constant 0 : i32
    %c0_i32_1 = arith.constant 0 : i32
    %c0_i32_2 = arith.constant 0 : i32
    return %c0_i32, %c0_i32_0, %c0_i32_1 : i32, i32, i32
  }
  func.func @transform_11(%arg0: i32) -> (i32, i32) {
    %c0_i32 = arith.constant 0 : i32
    %c0_i32_0 = arith.constant 0 : i32
    %c0_i32_1 = arith.constant 0 : i32
    return %c0_i32, %c0_i32_0 : i32, i32
  }
  func.func @transform_12(%arg0: i32) -> (i32, i32) {
    %c0_i32 = arith.constant 0 : i32
    %c0_i32_0 = arith.constant 0 : i32
    %c0_i32_1 = arith.constant 0 : i32
    return %c0_i32, %c0_i32_0 : i32, i32
  }
  func.func @transform_13(%arg0: i32) -> (i32, i32) {
    %c0_i32 = arith.constant 0 : i32
    %c0_i32_0 = arith.constant 0 : i32
    %c0_i32_1 = arith.constant 0 : i32
    return %c0_i32, %c0_i32_0 : i32, i32
  }
  func.func @transform_14(%arg0: i32) -> (i32, i32) {
    %c0_i32 = arith.constant 0 : i32
    %c0_i32_0 = arith.constant 0 : i32
    %c0_i32_1 = arith.constant 0 : i32
    return %c0_i32, %c0_i32_0 : i32, i32
  }
}

</mosaic_0001>

<bundles_post_ra>
// kernel: tpu_custom_call.1
= control target key start
LH: loop header
LB: loop body
LE: loop exit
PB: predicated region body
PF: predicated region fallthrough
CT: control target
= control target key end

     0   :  { %s4847_s0 = inlined_call_operand.vmem [shape: f32[34,64], index: 0, kind: input, shape index: {}]   ;;  %s4848_s1 = inlined_call_operand.vmem [shape: f32[34,32], index: 1, kind: input, shape index: {}]   ;;  %s4849_s2 = inlined_call_operand.vmem [shape: f32[34,34], index: 2, kind: input, shape index: {}]   ;;  %s4850_s3 = inlined_call_operand.vmem [shape: f32[64,32], index: 3, kind: input, shape index: {}]   ;;  %s4851_s4 = inlined_call_operand.vmem [shape: f32[2,32,96], index: 4, kind: input, shape index: {}]   ;;  %s4852_s5 = inlined_call_operand.vmem [shape: f32[2,96], index: 5, kind: input, shape index: {}]   ;;  %s4853_s6 = inlined_call_operand.vmem [shape: f32[2,32,32], index: 6, kind: input, shape index: {}]   ;;  %s4854_s7 = inlined_call_operand.vmem [shape: f32[2,6,32], index: 7, kind: input, shape index: {}]   ;;  %s4855_s8 = inlined_call_operand.vmem [shape: f32[2,32,64], index: 8, kind: input, shape index: {}]   ;;  %s4856_s9 = inlined_call_operand.vmem [shape: f32[2,64], index: 9, kind: input, shape index: {}]   ;;  %s4857_s10 = inlined_call_operand.vmem [shape: f32[2,64,32], index: 10, kind: input, shape index: {}]   ;;  %s4858_s11 = inlined_call_operand.vmem [shape: f32[2,32], index: 11, kind: input, shape index: {}]   ;;  %s4859_s12 = inlined_call_operand.vmem [shape: f32[32,5], index: 12, kind: input, shape index: {}]   ;;  %s4860_s13 = inlined_call_operand.vmem [shape: f32[1,5], index: 13, kind: input, shape index: {}]   ;;  %s4861_s14 = inlined_call_operand.hbm [shape: f32[2,5], index: 14, kind: output, shape index: {}]  }
   0x1   :  { %v60_v0 = vld [vmem:[%s4850_s3 + $0x38] sm:$0xff]  ;;  %v59_v1 = vld [vmem:[%s4850_s3 + $0x30] sm:$0xff]  ;;  %v58_v2 = vld [vmem:[%s4850_s3 + $0x28] sm:$0xff] }
   0x2   :  { %90 = vmatpush.msra.mxu0 %v60_v0  ;;  %v57_v3 = vld [vmem:[%s4850_s3 + $0x20] sm:$0xff]  ;;  %v56_v4 = vld [vmem:[%s4850_s3 + $0x18] sm:$0xff] }
   0x4   :  { %91 = vmatpush.msra.mxu0 %v59_v1 }
   0x6   :  { %92 = vmatpush.msra.mxu0 %v58_v2 }
   0x7   :  { %19 = vsyncpa [#allocation3], 0  ;;  %v55_v5 = vld [vmem:[%s4850_s3 + $0x10] sm:$0xff]  ;;  %v54_v6 = vld [vmem:[%s4850_s3 + $0x8] sm:$0xff]  ;;  %vm66_vm0 = vcmask 523264   ;;  %vm126_vm1 = vcmask 261120  }
   0x8   :  { %93 = vmatpush.msra.mxu0 %v57_v3  ;;  %v53_v7 = vld [vmem:[%s4850_s3] sm:$0xff]  ;;  %v123_v9 = vld [vmem:[%s4851_s4 + $0x18] sm:$0xff]  ;;  %v122_v10 = vld [vmem:[%s4851_s4 + $0x10] sm:$0xff]  ;;  %s3273_s24 = smov 120   ;;  %s3275_s25 = smov 112   ;;  %vm219_vm2 = vcmask 64512  }
   0x9   :  { %v48_v8 = vld [vmem:[%s4847_s0] sm:$0xff]  ;;  %154 = vmatpush.msra.mxu1 %v123_v9  ;;  %2943 = vmatpush.msra.mxu2 %v123_v9  ;;  %v49_v11 = vld [vmem:[%s4847_s0 + $0x8] sm:$0xff]  ;;  %v50_v12 = vld [vmem:[%s4847_s0 + $0x10] sm:$0xff]  ;;  %s3276_s26 = smov 96   ;;  %s3277_s27 = smov 64   ;;  %vm709_vm3 = vcmask 1041408  }
   0xa   :  { %94 = vmatpush.msra.mxu0 %v56_v4  ;;  %v51_v13 = vld [vmem:[%s4847_s0 + $0x18] sm:$0xff]  ;;  %v52_v14 = vld [vmem:[%s4847_s0 + $0x20] sm:$0x3]  ;;  %v121_v15 = vld [vmem:[%s4851_s4 + $0x8] sm:$0xff]  ;;  %vm458_vm4 = vcmask 277504   ;;  %vm471_vm5 = vcmask 271360  }
   0xb   :  { %155 = vmatpush.msra.mxu1 %v122_v10  ;;  %2944 = vmatpush.msra.mxu2 %v122_v10  ;;  %v120_v16 = vld [vmem:[%s4851_s4] sm:$0xff]  ;;  %v62_v20 = vld [vmem:[%s4848_s1 + $0x8] sm:$0xff]  ;;  %v63_v23 = vld [vmem:[%s4848_s1 + $0x10] sm:$0xff]  ;;  %s3278_s20 = smov 16   ;;  %s3279_s21 = smov 24   ;;  %vm998_vm6 = vcmask 130048  }
   0xc   :  { %95 = vmatpush.msra.mxu0 %v55_v5  ;;  %v61_v17 = vld [vmem:[%s4848_s1] sm:$0xff]  ;;  %v64_v26 = vld [vmem:[%s4848_s1 + $0x18] sm:$0xff]  ;;  %s3280_s22 = smov 8   ;;  %vm1004_vm7 = vcmask 195584   ;;  %vm1079_vm8 = vcmask 254976   ;;  %s3282_s15 = smov [#allocation2]  }
   0xd   :  { %156 = vmatpush.msra.mxu1 %v121_v15  ;;  %2945 = vmatpush.msra.mxu2 %v121_v15  ;;  %v65_v29 = vld [vmem:[%s4848_s1 + $0x20] sm:$0x3]  ;;  %s3274_s1 = smov 104   ;;  %s2737_s0 = sshll.u32 %s3282_s15, 4  ;;  %s2738_s0 = int_to_ptr.vmem [resolvable:$true] %s2737_s0 }
   0xe   :  { %96 = vmatpush.msra.mxu0 %v54_v6  ;;  %v3037_v34 = vld [vmem:[%s4852_s5] ss:$0 sm:$0xff]  ;;  %s2739_s16 = sshll.u32 %s4861_s14, 4  ;;  %s2740_s16 = int_to_ptr.hbm [resolvable:$true] %s2739_s16 }
   0xf   :  { %157 = vmatpush.msra.mxu1 %v120_v16  ;;  %2946 = vmatpush.msra.mxu2 %v120_v16 }
  0x10   :  { %97 = vmatpush.msra.mxu0 %v53_v7 }
  0x11   :  { %2748 = vmatmul.msk.f32.vlgmr.msra.gmra.mxu0 %vm66_vm0, %v48_v8 }
  0x19   :  { %2749 = vmatmul.msk.f32.gmra.mxu0 %vm66_vm0, %v49_v11 }
  0x21   :  { %2750 = vmatmul.msk.f32.gmra.mxu0 %vm66_vm0, %v50_v12 }
  0x29   :  { %2751 = vmatmul.msk.f32.gmra.mxu0 %vm66_vm0, %v51_v13 }
  0x31   :  { %2752 = vmatmul.msk.f32.gmra.mxu0 %vm66_vm0, %v52_v14 }
  0x8e   :  { %v99_v18 = vpop.f32.mrf.mxu0 }
  0x8f   :  { %v3417_v19 = vadd.f32 %v99_v18, %v61_v17 }
  0x91   :  { %2753 = vmatmul.msk.f32.vlgmr.msra.gmra.mxu1 %vm126_vm1, %v3417_v19 }
  0x96   :  { %v102_v21 = vpop.f32.mrf.mxu0 }
  0x97   :  { %v3424_v22 = vadd.f32 %v102_v21, %v62_v20 }
  0x99   :  { %2754 = vmatmul.msk.f32.gmra.mxu1 %vm126_vm1, %v3424_v22 }
  0x9e   :  { %v105_v24 = vpop.f32.mrf.mxu0 }
  0x9f   :  { %v3431_v25 = vadd.f32 %v105_v24, %v63_v23 }
  0xa1   :  { %2755 = vmatmul.msk.f32.gmra.mxu1 %vm126_vm1, %v3431_v25 }
  0xa6   :  { %v108_v27 = vpop.f32.mrf.mxu0 }
  0xa7   :  { %v3438_v28 = vadd.f32 %v108_v27, %v64_v26 }
  0xa9   :  { %2756 = vmatmul.msk.f32.vlgmr.msra.gmra.mxu2 %vm126_vm1, %v3438_v28 }
  0xae   :  { %v111_v30 = vpop.f32.mrf.mxu0 }
  0xaf   :  { %v3445_v31 = vadd.f32 %v111_v30, %v65_v29 }
  0xb1   :  { %2757 = vmatmul.msk.f32.gmra.mxu2 %vm126_vm1, %v3445_v31 }
 0x10e   :  { %v159_v32 = vpop.f32.mrf.mxu1 }
 0x10f   :  { %v3474_v42 = vadd.f32 %v3037_v34, %v159_v32 }
 0x116   :  { %v162_v33 = vpop.f32.mrf.mxu1 }
 0x117   :  { %v3456_v37 = vadd.f32 %v3037_v34, %v162_v33 }
 0x11e   :  { %v165_v35 = vpop.f32.mrf.mxu1 }
 0x11f   :  { %v3452_v36 = vadd.f32 %v3037_v34, %v165_v35 }
 0x121   :  { %183 = vrot.lane.b32.xlu1 %v3452_v36, %s3273_s24 }
 0x129   :  { %181 = vrot.lane.b32.xlu1 %v3456_v37, %s3273_s24 }
 0x12c   :  { %v168_v38 = vpop.f32.mrf.mxu2 }
 0x12d   :  { %v3460_v39 = vadd.f32 %v3037_v34, %v168_v38 }
 0x12f   :  { %205 = vrot.lane.b32.xlu2 %v3460_v39, %s3274_s1 }
 0x131   :  { %195 = vrot.lane.b32.xlu1 %v3460_v39, %s3275_s25 }
 0x134   :  { %v171_v40 = vpop.f32.mrf.mxu2 }
 0x135   :  { %v3466_v41 = vadd.f32 %v3037_v34, %v171_v40 }
 0x137   :  { %187 = vrot.lane.b32.xlu0 %v3466_v41, %s3273_s24  ;;  %197 = vrot.lane.b32.xlu2 %v3466_v41, %s3275_s25 }
 0x139   :  { %203 = vrot.lane.b32.xlu1 %v3452_v36, %s3274_s1 }
 0x13f   :  { %207 = vrot.lane.b32.xlu2 %v3466_v41, %s3274_s1  ;;  %185 = vrot.lane.b32.xlu0 %v3460_v39, %s3273_s24 }
 0x141   :  { %189 = vrot.lane.b32.xlu1 %v3474_v42, %s3275_s25 }
 0x147   :  { %191 = vrot.lane.b32.xlu2 %v3456_v37, %s3275_s25  ;;  %179 = vrot.lane.b32.xlu0 %v3474_v42, %s3273_s24 }
 0x14f   :  { %199 = vrot.lane.b32.xlu2 %v3474_v42, %s3274_s1  ;;  %193 = vrot.lane.b32.xlu0 %v3452_v36, %s3275_s25 }
 0x157   :  { %201 = vrot.lane.b32.xlu0 %v3456_v37, %s3274_s1 }
 0x189   :  { %v3492_v43 = vpop.permute.xlu2 %205 }
 0x191   :  { %v3498_v45 = vpop.permute.xlu2 %197 }
 0x193   :  { %v3494_v44 = vpop.permute.xlu1 %183 }
 0x194   :  { %276 = vrot.lane.b32.xlu2 %v3494_v44, %s3276_s26 }
 0x199   :  { %v3502_v46 = vpop.permute.xlu2 %207 }
 0x19b   :  { %v3514_v49 = vpop.permute.xlu1 %181 }
 0x19c   :  { %402 = vrot.lane.b32.xlu2 %v3492_v43, %s3276_s26 }
 0x1a1   :  { %v3506_v47 = vpop.permute.xlu2 %191 }
 0x1a3   :  { %v3526_v52 = vpop.permute.xlu1 %195 }
 0x1a4   :  { %404 = vrot.lane.b32.xlu2 %v3502_v46, %s3276_s26  ;;  %v2967_v58 = vpack.i.bf16 %v3492_v43, %v3526_v52 }
 0x1a9   :  { %v3508_v48 = vpop.permute.xlu0 %187  ;;  %v3522_v51 = vpop.permute.xlu2 %199 }
 0x1aa   :  { %280 = vrot.lane.b32.xlu0 %v3508_v48, %s3276_s26 }
 0x1ab   :  { %v3541_v56 = vpop.permute.xlu1 %203 }
 0x1ac   :  { %336 = vrot.lane.b32.xlu2 %v3506_v47, %s3276_s26 }
 0x1b1   :  { %v3516_v50 = vpop.permute.xlu0 %185 }
 0x1b2   :  { %278 = vrot.lane.b32.xlu1 %v3516_v50, %s3276_s26  ;;  %274 = vrot.lane.b32.xlu0 %v3514_v49, %s3276_s26  ;;  %v2957_v61 = vpack.i.bf16 %v3494_v44, %v3516_v50 }
 0x1b3   :  { %v3552_v59 = vpop.permute.xlu1 %189 }
 0x1b4   :  { %396 = vrot.lane.b32.xlu2 %v3522_v51, %s3276_s26  ;;  %v2982_v0 = vpack.i.bf16 %v3522_v51, %v3552_v59 }
 0x1b9   :  { %v180_v53 = vpop.permute.xlu0 %179 }
 0x1ba   :  { %340 = vrot.lane.b32.xlu1 %v3526_v52, %s3276_s26  ;;  %272 = vrot.lane.b32.xlu0 %v180_v53, %s3276_s26  ;;  %v2962_v55 = vpack.i.bf16 %v180_v53, %v3514_v49 }
 0x1bc   :  { %213 = vrot.lane.b32.xlu2 %v3452_v36, %s3276_s26 }
 0x1c1   :  { %v3533_v54 = vpop.permute.xlu0 %193 }
 0x1c2   :  { %342 = vrot.lane.b32.xlu1 %v3498_v45, %s3276_s26  ;;  %338 = vrot.lane.b32.xlu0 %v3533_v54, %s3276_s26  ;;  %v2972_v62 = vpack.i.bf16 %v3541_v56, %v3533_v54 }
 0x1c4   :  { %2963 = vrot.lane.b32.xlu2 %v2962_v55, %s3277_s27  ;;  %v114_v55 = vld [vmem:[%s4849_s2] sm:$0xff] }
 0x1c9   :  { %v3543_v57 = vpop.permute.xlu0 %201 }
 0x1ca   :  { %400 = vrot.lane.b32.xlu1 %v3541_v56, %s3276_s26  ;;  %398 = vrot.lane.b32.xlu0 %v3543_v57, %s3276_s26  ;;  %v2977_v60 = vpack.i.bf16 %v3543_v57, %v3506_v47 }
 0x1cc   :  { %2968 = vrot.lane.b32.xlu2 %v2967_v58, %s3277_s27  ;;  %v3664_v58 = vld [vmem:[%s4849_s2 + $0x10] sm:$0xff] }
 0x1d2   :  { %334 = vrot.lane.b32.xlu1 %v3552_v59, %s3276_s26  ;;  %217 = vrot.lane.b32.xlu0 %v3466_v41, %s3276_s26 }
 0x1d4   :  { %2978 = vrot.lane.b32.xlu2 %v2977_v60, %s3277_s27 }
 0x1da   :  { %215 = vrot.lane.b32.xlu1 %v3460_v39, %s3276_s26  ;;  %211 = vrot.lane.b32.xlu0 %v3456_v37, %s3276_s26 }
 0x1dc   :  { %815 = vrot.lane.b32.xlu2 %v3498_v45, %s3277_s27 }
 0x1e2   :  { %209 = vrot.lane.b32.xlu1 %v3474_v42, %s3276_s26  ;;  %2958 = vrot.lane.b32.xlu0 %v2957_v61, %s3277_s27 }
 0x1e4   :  { %878 = vrot.lane.b32.xlu2 %v3502_v46, %s3277_s27 }
 0x1ea   :  { %752 = vrot.lane.b32.xlu1 %v3508_v48, %s3277_s27  ;;  %2973 = vrot.lane.b32.xlu0 %v2972_v62, %s3277_s27  ;;  %v3674_v62 = vld [vmem:[%s4849_s2 + $0x18] sm:$0xff] }
 0x1ee   :  { %v277_v63 = vpop.permute.xlu2 %276 }
 0x1f2   :  { %2983 = vrot.lane.b32.xlu0 %v2982_v0, %s3277_s27 }
 0x1f6   :  { %v403_v1 = vpop.permute.xlu2 %402 }
 0x1fe   :  { %v405_v2 = vpop.permute.xlu2 %404 }
 0x1ff   :  { %2788 = vmatpush.xpose.msk.msrb.mxu0 %vm219_vm2, %v405_v2 }
 0x203   :  { %2789 = vmatpush.xpose.msk.msrb.mxu0 %vm219_vm2, %v403_v1 }
 0x206   :  { %v337_v3 = vpop.permute.xlu2 %336 }
 0x20e   :  { %v397_v4 = vpop.permute.xlu2 %396 }
 0x216   :  { %v214_v5 = vpop.permute.xlu2 %213 }
 0x21c   :  { %v281_v6 = vpop.permute.xlu0 %280 }
 0x21d   :  { %2768 = vmatpush.xpose.msk.msra.mxu3 %vm219_vm2, %v281_v6 }
 0x21e   :  { %v3585_v7 = vpop.permute.xlu2 %2963 }
 0x224   :  { %v279_v8 = vpop.permute.xlu1 %278  ;;  %v275_v9 = vpop.permute.xlu0 %274 }
 0x225   :  { %2769 = vmatpush.xpose.msk.msra.mxu3 %vm219_vm2, %v279_v8 }
 0x226   :  { %v2969_v10 = vpop.permute.xlu2 %2968 }
 0x227   :  { %v2970_v24 = vunpack.i.l.bf16 %v2969_v10  ;;  %v2971_v26 = vunpack.i.h.bf16 %v2969_v10  ;;  %v115_v10 = vld [vmem:[%s4849_s2 + $0x8] sm:$0xff] }
 0x229   :  { %2770 = vmatpush.xpose.msk.msra.mxu3 %vm219_vm2, %v277_v63 }
 0x22c   :  { %v341_v11 = vpop.permute.xlu1 %340  ;;  %v273_v12 = vpop.permute.xlu0 %272 }
 0x22d   :  { %2771 = vmatpush.xpose.msk.msra.mxu3 %vm219_vm2, %v275_v9 }
 0x22e   :  { %v3590_v13 = vpop.permute.xlu2 %2978 }
 0x231   :  { %2772 = vmatpush.xpose.msk.msra.mxu3 %vm219_vm2, %v273_v12 }
 0x234   :  { %v343_v14 = vpop.permute.xlu1 %342  ;;  %2773 = vmatmul.msk.f32.vlgmr.msra.gmra.mxu3 %vm219_vm2, %v180_v53  ;;  %v339_v15 = vpop.permute.xlu0 %338 }
 0x235   :  { %2778 = vmatpush.xpose.msk.msrb.mxu1 %vm219_vm2, %v343_v14 }
 0x236   :  { %v816_v16 = vpop.permute.xlu2 %815 }
 0x239   :  { %2779 = vmatpush.xpose.msk.msrb.mxu1 %vm219_vm2, %v341_v11 }
 0x23c   :  { %v401_v17 = vpop.permute.xlu1 %400  ;;  %2774 = vmatmul.msk.f32.gmra.mxu3 %vm219_vm2, %v3514_v49  ;;  %v399_v18 = vpop.permute.xlu0 %398  ;;  %v2965_v49 = vunpack.i.l.bf16 %v3585_v7 }
 0x23d   :  { %2780 = vmatpush.xpose.msk.msrb.mxu1 %vm219_vm2, %v339_v15  ;;  %2790 = vmatpush.xpose.msk.msrb.mxu0 %vm219_vm2, %v401_v17 }
 0x23e   :  { %v879_v23 = vpop.permute.xlu2 %878 }
 0x241   :  { %2781 = vmatpush.xpose.msk.msrb.mxu1 %vm219_vm2, %v337_v3  ;;  %2791 = vmatpush.xpose.msk.msrb.mxu0 %vm219_vm2, %v399_v18 }
 0x244   :  { %v335_v20 = vpop.permute.xlu1 %334  ;;  %2775 = vmatmul.msk.f32.gmra.mxu3 %vm219_vm2, %v3494_v44  ;;  %v218_v21 = vpop.permute.xlu0 %217 }
 0x245   :  { %2758 = vmatpush.xpose.msk.msrb.mxu2 %vm219_vm2, %v218_v21  ;;  %2782 = vmatpush.xpose.msk.msrb.mxu1 %vm219_vm2, %v335_v20 }
 0x246   :  { %2792 = vmatpush.xpose.msk.msrb.mxu0 %vm219_vm2, %v397_v4 }
 0x248   :  { %2783 = vmatmul.msk.f32.vlgmr.msrb.gmra.mxu1 %vm219_vm2, %v3552_v59 }
 0x249   :  { %2810 = vmatpush.msk.msra.mxu1 %vm709_vm3, %v816_v16  ;;  %2793 = vmatmul.msk.f32.vlgmr.msrb.gmra.mxu0 %vm219_vm2, %v3522_v51 }
 0x24a   :  { %2816 = vmatpush.msk.msra.mxu0 %vm709_vm3, %v879_v23 }
 0x24b   :  { %850 = vmatpush.msra.mxu1 %v2970_v24 }
 0x24c   :  { %913 = vmatpush.msra.mxu0 %v2971_v26  ;;  %v216_v27 = vpop.permute.xlu1 %215  ;;  %2776 = vmatmul.msk.f32.gmra.mxu3 %vm219_vm2, %v3516_v50  ;;  %v212_v29 = vpop.permute.xlu0 %211  ;;  %v2966_v50 = vunpack.i.h.bf16 %v3585_v7  ;;  %v118_v7 = vld [vmem:[%s4849_s2 + $0x20] sm:$0x3] }
 0x24d   :  { %2759 = vmatpush.xpose.msk.msrb.mxu2 %vm219_vm2, %v216_v27 }
 0x250   :  { %2784 = vmatmul.msk.f32.gmra.mxu1 %vm219_vm2, %v3506_v47  ;;  %v2981_v47 = vunpack.i.h.bf16 %v3590_v13 }
 0x251   :  { %2794 = vmatmul.msk.f32.gmra.mxu0 %vm219_vm2, %v3543_v57  ;;  %2760 = vmatpush.xpose.msk.msrb.mxu2 %vm219_vm2, %v214_v5 }
 0x254   :  { %v210_v30 = vpop.permute.xlu1 %209  ;;  %2777 = vmatmul.msk.f32.gmra.mxu3 %vm219_vm2, %v3508_v48  ;;  %v2959_v32 = vpop.permute.xlu0 %2958  ;;  %v2980_v48 = vunpack.i.l.bf16 %v3590_v13 }
 0x255   :  { %2761 = vmatpush.xpose.msk.msrb.mxu2 %vm219_vm2, %v212_v29  ;;  %v2960_v40 = vunpack.i.l.bf16 %v2959_v32  ;;  %v2961_v44 = vunpack.i.h.bf16 %v2959_v32 }
 0x258   :  { %2785 = vmatmul.msk.f32.gmra.mxu1 %vm219_vm2, %v3533_v54 }
 0x259   :  { %2795 = vmatmul.msk.f32.gmra.mxu0 %vm219_vm2, %v3541_v56  ;;  %2762 = vmatpush.xpose.msk.msrb.mxu2 %vm219_vm2, %v210_v30 }
 0x25c   :  { %v753_v33 = vpop.permute.xlu1 %752  ;;  %2763 = vmatmul.msk.f32.vlgmr.msrb.gmra.mxu2 %vm219_vm2, %v3474_v42  ;;  %v2974_v34 = vpop.permute.xlu0 %2973 }
 0x25d   :  { %v2976_v35 = vunpack.i.h.bf16 %v2974_v34  ;;  %v2975_v38 = vunpack.i.l.bf16 %v2974_v34  ;;  %2804 = vmatpush.msk.msrb.mxu3 %vm709_vm3, %v753_v33 }
 0x25f   :  { %787 = vmatpush.msrb.mxu3 %v2960_v40  ;;  %851 = vmatpush.msra.mxu1 %v2975_v38 }
 0x260   :  { %914 = vmatpush.msra.mxu0 %v2976_v35  ;;  %2786 = vmatmul.msk.f32.gmra.mxu1 %vm219_vm2, %v3526_v52 }
 0x261   :  { %2796 = vmatmul.msk.f32.gmra.mxu0 %vm219_vm2, %v3492_v43  ;;  %788 = vmatpush.msrb.mxu3 %v2961_v44 }
 0x262   :  { %852 = vmatpush.msra.mxu1 %v2980_v48  ;;  %915 = vmatpush.msra.mxu0 %v2981_v47 }
 0x263   :  { %789 = vmatpush.msrb.mxu3 %v2965_v49 }
 0x264   :  { %2764 = vmatmul.msk.f32.gmra.mxu2 %vm219_vm2, %v3456_v37  ;;  %v2984_v51 = vpop.permute.xlu0 %2983 }
 0x265   :  { %v2986_v53 = vunpack.i.h.bf16 %v2984_v51  ;;  %v2985_v54 = vunpack.i.l.bf16 %v2984_v51  ;;  %790 = vmatpush.msrb.mxu3 %v2966_v50 }
 0x267   :  { %853 = vmatpush.msra.mxu1 %v2985_v54  ;;  %916 = vmatpush.msra.mxu0 %v2986_v53 }
 0x268   :  { %2787 = vmatmul.msk.f32.gmra.mxu1 %vm219_vm2, %v3498_v45 }
 0x269   :  { %2797 = vmatmul.msk.f32.gmra.mxu0 %vm219_vm2, %v3502_v46 }
 0x26c   :  { %2765 = vmatmul.msk.f32.gmra.mxu2 %vm219_vm2, %v3452_v36 }
 0x274   :  { %2766 = vmatmul.msk.f32.gmra.mxu2 %vm219_vm2, %v3460_v39 }
 0x27c   :  { %2767 = vmatmul.msk.f32.gmra.mxu2 %vm219_vm2, %v3466_v41 }
 0x2b7   :  { %v319_v43 = vpop.f32.mrf.mxu3 }
 0x2b8   :  { %v3719_v32 = vadd.f32 %v319_v43, %v114_v55 }
 0x2ba   :  { %v475_v38 = vsel %vm458_vm4, %v3719_v32, -inf }
 0x2bf   :  { %v3652_v52 = vpop.f32.mrf.mxu3 }
 0x2c0   :  { %v3736_v50 = vadd.f32 %v3652_v52, %v115_v10 }
 0x2c2   :  { %v478_v54 = vsel %vm458_vm4, %v3736_v50, -inf }
 0x2c5   :  { %v381_v45 = vpop.f32.mrf.mxu1 }
 0x2c6   :  { %v3657_v56 = vadd.f32 %v381_v45, %v114_v55  ;;  %v443_v23 = vpop.f32.mrf.mxu0 }
 0x2c7   :  { %v325_v46 = vpop.f32.mrf.mxu3  ;;  %v3710_v24 = vadd.f32 %v443_v23, %v114_v55 }
 0x2c8   :  { %v490_v57 = vsel %vm458_vm4, %v3657_v56, -inf  ;;  %v3667_v59 = vadd.f32 %v325_v46, %v3664_v58 }
 0x2c9   :  { %491 = vmax.xlane.f32.xlu0 %v490_v57  ;;  %v505_v30 = vsel %vm458_vm4, %v3710_v24, -inf }
 0x2ca   :  { %v481_v61 = vsel %vm458_vm4, %v3667_v59, -inf }
 0x2cd   :  { %v384_v60 = vpop.f32.mrf.mxu1 }
 0x2ce   :  { %v446_v40 = vpop.f32.mrf.mxu0  ;;  %v3727_v44 = vadd.f32 %v384_v60, %v115_v10 }
 0x2cf   :  { %v328_v63 = vpop.f32.mrf.mxu3  ;;  %v3729_v47 = vadd.f32 %v446_v40, %v115_v10 }
 0x2d0   :  { %v3677_v0 = vadd.f32 %v328_v63, %v3674_v62  ;;  %v493_v49 = vsel %vm458_vm4, %v3727_v44, -inf }
 0x2d1   :  { %482 = vmax.xlane.f32.xlu0 %v481_v61  ;;  %v508_v48 = vsel %vm458_vm4, %v3729_v47, -inf }
 0x2d2   :  { %v484_v2 = vsel %vm458_vm4, %v3677_v0, -inf }
 0x2d5   :  { %v387_v1 = vpop.f32.mrf.mxu1 }
 0x2d6   :  { %v3739_v51 = vadd.f32 %v387_v1, %v3664_v58  ;;  %v449_v53 = vpop.f32.mrf.mxu0 }
 0x2d7   :  { %v331_v14 = vpop.f32.mrf.mxu3 }
 0x2d8   :  { %v3701_v16 = vadd.f32 %v331_v14, %v118_v7  ;;  %v496_v43 = vsel %vm458_vm4, %v3739_v51, -inf }
 0x2d9   :  { %485 = vmax.xlane.f32.xlu0 %v484_v2 }
 0x2da   :  { %v487_v20 = vsel %vm471_vm5, %v3701_v16, -inf }
 0x2dd   :  { %v3681_v3 = vpop.f32.mrf.mxu1 }
 0x2de   :  { %v452_v45 = vpop.f32.mrf.mxu0 }
 0x2df   :  { %v257_v4 = vpop.f32.mrf.mxu2  ;;  %v3751_v46 = vadd.f32 %v452_v45, %v3674_v62 }
 0x2e0   :  { %v3683_v5 = vadd.f32 %v257_v4, %v114_v55  ;;  %v3746_v55 = vadd.f32 %v449_v53, %v3664_v58 }
 0x2e1   :  { %v514_v57 = vsel %vm458_vm4, %v3751_v46, -inf }
 0x2e2   :  { %v459_v6 = vsel %vm458_vm4, %v3683_v5, -inf  ;;  %v511_v52 = vsel %vm458_vm4, %v3746_v55, -inf }
 0x2e3   :  { %460 = vmax.xlane.f32.xlu2 %v459_v6 }
 0x2e5   :  { %v393_v8 = vpop.f32.mrf.mxu1 }
 0x2e6   :  { %v3690_v9 = vadd.f32 %v393_v8, %v118_v7  ;;  %v455_v60 = vpop.f32.mrf.mxu0 }
 0x2e7   :  { %v260_v11 = vpop.f32.mrf.mxu2  ;;  %v3755_v61 = vadd.f32 %v455_v60, %v118_v7 }
 0x2e8   :  { %v3695_v12 = vadd.f32 %v260_v11, %v115_v10  ;;  %v502_v13 = vsel %vm471_vm5, %v3690_v9, -inf }
 0x2e9   :  { %503 = vmax.xlane.f32.xlu0 %v502_v13  ;;  %v517_v63 = vsel %vm471_vm5, %v3755_v61, -inf  ;;  %v3769_v13 = vadd.f32 %v3681_v3, %v3674_v62 }
 0x2ea   :  { %v462_v15 = vsel %vm458_vm4, %v3695_v12, -inf }
 0x2eb   :  { %463 = vmax.xlane.f32.xlu2 %v462_v15 }
 0x2ef   :  { %v263_v17 = vpop.f32.mrf.mxu2 }
 0x2f0   :  { %v3704_v18 = vadd.f32 %v263_v17, %v3664_v58  ;;  %v499_v17 = vsel %vm458_vm4, %v3769_v13, -inf }
 0x2f1   :  { %488 = vmax.xlane.f32.xlu0 %v487_v20 }
 0x2f2   :  { %v465_v21 = vsel %vm458_vm4, %v3704_v18, -inf }
 0x2f3   :  { %466 = vmax.xlane.f32.xlu2 %v465_v21 }
 0x2f7   :  { %v266_v26 = vpop.f32.mrf.mxu2 }
 0x2f8   :  { %v3713_v27 = vadd.f32 %v266_v26, %v3674_v62 }
 0x2fa   :  { %v468_v29 = vsel %vm458_vm4, %v3713_v27, -inf }
 0x2fb   :  { %469 = vmax.xlane.f32.xlu1 %v468_v29  ;;  %506 = vmax.xlane.f32.xlu2 %v505_v30 }
 0x2ff   :  { %v269_v33 = vpop.f32.mrf.mxu2 }
 0x300   :  { %v3721_v34 = vadd.f32 %v269_v33, %v118_v7 }
 0x302   :  { %v472_v35 = vsel %vm471_vm5, %v3721_v34, -inf }
 0x303   :  { %473 = vmax.xlane.f32.xlu1 %v472_v35  ;;  %476 = vmax.xlane.f32.xlu2 %v475_v38 }
 0x30b   :  { %509 = vmax.xlane.f32.xlu1 %v508_v48  ;;  %494 = vmax.xlane.f32.xlu2 %v493_v49 }
 0x313   :  { %479 = vmax.xlane.f32.xlu1 %v478_v54  ;;  %497 = vmax.xlane.f32.xlu2 %v496_v43 }
 0x31b   :  { %512 = vmax.xlane.f32.xlu1 %v511_v52 }
 0x323   :  { %515 = vmax.xlane.f32.xlu1 %v514_v57 }
 0x32b   :  { %518 = vmax.xlane.f32.xlu1 %v517_v63 }
 0x33c   :  { %v492_v4 = vpop.xlane.xlu0 %491 }
 0x33d   :  { %v530_v10 = vsub.f32 %v3657_v56, %v492_v4 }
 0x33f   :  { %v560_v11 = vmul.f32 1.442695, %v530_v10 }
 0x344   :  { %v483_v14 = vpop.xlane.xlu0 %482 }
 0x345   :  { %v527_v15 = vsub.f32 %v3667_v59, %v483_v14 }
 0x347   :  { %v554_v56 = vmul.f32 1.442695, %v527_v15 }
 0x356   :  { %v461_v58 = vpop.xlane.xlu2 %460 }
 0x357   :  { %v520_v1 = vsub.f32 %v3683_v5, %v461_v58 }
 0x359   :  { %v540_v2 = vmul.f32 1.442695, %v520_v1 }
 0x35b   :  { %3044 = vpow2.f32 %v540_v2 }
 0x35c   :  { %3046 = vpow2.f32 %v560_v11 }
 0x35d   :  { %3048 = vpow2.f32 %v554_v56 }
 0x35e   :  { %v3760_v6 = vpop.xlane.xlu2 %463 }
 0x361   :  { %v3762_v8 = vpop.eup %3044 }
 0x362   :  { %v580_v7 = vsel %vm458_vm4, %v3762_v8, 0.0  ;;  %v3778_v23 = vpop.eup %3046 }
 0x363   :  { %581 = vadd.xlane.f32.xlu2 %v580_v7  ;;  %v610_v3 = vsel %vm458_vm4, %v3778_v23, 0.0  ;;  %v3785_v30 = vpop.eup %3048 }
 0x366   :  { %v3771_v5 = vpop.xlane.xlu2 %466 }
 0x36b   :  { %500 = vmax.xlane.f32.xlu2 %v499_v17 }
 0x36e   :  { %v3776_v20 = vpop.xlane.xlu1 %469  ;;  %v507_v21 = vpop.xlane.xlu2 %506 }
 0x36f   :  { %v535_v26 = vsub.f32 %v3710_v24, %v507_v21  ;;  %v601_v24 = vsel %vm458_vm4, %v3785_v30, 0.0 }
 0x371   :  { %v570_v62 = vmul.f32 1.442695, %v535_v26 }
 0x373   :  { %611 = vadd.xlane.f32.xlu2 %v610_v3  ;;  %3050 = vpow2.f32 %v570_v62 }
 0x376   :  { %v3783_v59 = vpop.xlane.xlu1 %473  ;;  %v477_v29 = vpop.xlane.xlu2 %476 }
 0x377   :  { %v525_v33 = vsub.f32 %v3719_v32, %v477_v29 }
 0x379   :  { %v550_v35 = vmul.f32 1.442695, %v525_v33  ;;  %v3788_v38 = vpop.eup %3050 }
 0x37a   :  { %v625_v40 = vsel %vm458_vm4, %v3788_v38, 0.0 }
 0x37b   :  { %602 = vadd.xlane.f32.xlu2 %v601_v24  ;;  %3052 = vpow2.f32 %v550_v35  ;;  %626 = vadd.xlane.f32.xlu0 %v625_v40 }
 0x37e   :  { %v510_v48 = vpop.xlane.xlu1 %509  ;;  %v495_v49 = vpop.xlane.xlu2 %494 }
 0x37f   :  { %v531_v53 = vsub.f32 %v3727_v44, %v495_v49  ;;  %v536_v32 = vsub.f32 %v3729_v47, %v510_v48  ;;  %v3806_v47 = vpop.xlane.xlu0 %485  ;;  %v2987_v48 = vpack.i.bf16 %v3452_v36, %v3460_v39  ;;  %v524_v36 = vsub.f32 %v3721_v34, %v3783_v59 }
 0x380   :  { %v2992_v39 = vpack.i.bf16 %v3474_v42, %v3456_v37 }
 0x381   :  { %v562_v54 = vmul.f32 1.442695, %v531_v53  ;;  %v3795_v43 = vpop.eup %3052  ;;  %v572_v52 = vmul.f32 1.442695, %v536_v32 }
 0x382   :  { %v595_v45 = vsel %vm458_vm4, %v3795_v43, 0.0 }
 0x383   :  { %3054 = vpow2.f32 %v562_v54  ;;  %596 = vadd.xlane.f32.xlu0 %v595_v45  ;;  %v521_v54 = vsub.f32 %v3695_v12, %v3760_v6  ;;  %v548_v45 = vmul.f32 1.442695, %v524_v36 }
 0x384   :  { %3056 = vpow2.f32 %v572_v52 }
 0x385   :  { %v542_v32 = vmul.f32 1.442695, %v521_v54 }
 0x386   :  { %v480_v57 = vpop.xlane.xlu1 %479  ;;  %v498_v60 = vpop.xlane.xlu2 %497 }
 0x387   :  { %v532_v63 = vsub.f32 %v3739_v51, %v498_v60  ;;  %v526_v44 = vsub.f32 %v3736_v50, %v480_v57  ;;  %v3817_v15 = vpop.xlane.xlu0 %503 }
 0x389   :  { %v564_v58 = vmul.f32 1.442695, %v532_v63  ;;  %v3801_v1 = vpop.eup %3054  ;;  %v552_v4 = vmul.f32 1.442695, %v526_v44  ;;  %v523_v63 = vsub.f32 %v3713_v27, %v3776_v20 }
 0x38a   :  { %v613_v2 = vsel %vm458_vm4, %v3801_v1, 0.0  ;;  %v3808_v7 = vpop.eup %3056 }
 0x38b   :  { %3058 = vpow2.f32 %v564_v58  ;;  %614 = vadd.xlane.f32.xlu1 %v613_v2  ;;  %v628_v14 = vsel %vm458_vm4, %v3808_v7, 0.0  ;;  %v546_v44 = vmul.f32 1.442695, %v523_v63 }
 0x38c   :  { %3060 = vpow2.f32 %v552_v4 }
 0x38e   :  { %v513_v10 = vpop.xlane.xlu1 %512 }
 0x38f   :  { %v537_v51 = vsub.f32 %v3746_v55, %v513_v10  ;;  %v489_v55 = vpop.xlane.xlu0 %488  ;;  %v528_v10 = vsub.f32 %v3677_v0, %v3806_v47  ;;  %v534_v0 = vsub.f32 %v3690_v9, %v3817_v15 }
 0x390   :  { %v529_v33 = vsub.f32 %v3701_v16, %v489_v55 }
 0x391   :  { %v3810_v11 = vpop.eup %3058  ;;  %v574_v17 = vmul.f32 1.442695, %v537_v51  ;;  %v556_v51 = vmul.f32 1.442695, %v528_v10 }
 0x392   :  { %v616_v50 = vsel %vm458_vm4, %v3810_v11, 0.0  ;;  %v3819_v21 = vpop.eup %3060  ;;  %v558_v40 = vmul.f32 1.442695, %v529_v33 }
 0x393   :  { %629 = vadd.xlane.f32.xlu1 %v628_v14  ;;  %617 = vadd.xlane.f32.xlu0 %v616_v50  ;;  %3062 = vpow2.f32 %v574_v17  ;;  %v598_v26 = vsel %vm458_vm4, %v3819_v21, 0.0 }
 0x396   :  { %v516_v56 = vpop.xlane.xlu1 %515 }
 0x397   :  { %v538_v42 = vsub.f32 %v3751_v46, %v516_v56 }
 0x399   :  { %v3824_v29 = vpop.eup %3062  ;;  %v576_v58 = vmul.f32 1.442695, %v538_v42 }
 0x39a   :  { %v631_v24 = vsel %vm458_vm4, %v3824_v29, 0.0 }
 0x39b   :  { %599 = vadd.xlane.f32.xlu1 %v598_v26 }
 0x39e   :  { %v519_v62 = vpop.xlane.xlu1 %518 }
 0x39f   :  { %v539_v3 = vsub.f32 %v3755_v61, %v519_v62 }
 0x3a1   :  { %v578_v35 = vmul.f32 1.442695, %v539_v3 }
 0x3a3   :  { %3064 = vpow2.f32 %v578_v35  ;;  %632 = vadd.xlane.f32.xlu1 %v631_v24 }
 0x3a4   :  { %3066 = vpow2.f32 %v558_v40 }
 0x3a5   :  { %3068 = vpow2.f32 %v542_v32 }
 0x3a6   :  { %3070 = vpow2.f32 %v548_v45 }
 0x3a7   :  { %2988 = vrot.lane.b32.xlu0 %v2987_v48, %s3277_s27 }
 0x3a9   :  { %v3832_v49 = vpop.eup %3064 }
 0x3aa   :  { %v637_v61 = vsel %vm471_vm5, %v3832_v49, 0.0  ;;  %v3836_v16 = vpop.eup %3066 }
 0x3ab   :  { %638 = vadd.xlane.f32.xlu2 %v637_v61  ;;  %v607_v53 = vsel %vm471_vm5, %v3836_v16, 0.0  ;;  %v3847_v52 = vpop.eup %3068 }
 0x3ac   :  { %v583_v57 = vsel %vm458_vm4, %v3847_v52, 0.0  ;;  %v3851_v60 = vpop.eup %3070 }
 0x3ad   :  { %v592_v34 = vsel %vm471_vm5, %v3851_v60, 0.0 }
 0x3b3   :  { %608 = vadd.xlane.f32.xlu2 %v607_v53 }
 0x3cb   :  { %2993 = vrot.lane.b32.xlu2 %v2992_v39, %s3277_s27 }
 0x3d1   :  { %584 = vadd.xlane.f32.xlu0 %v583_v57 }
 0x3d6   :  { %v3853_v12 = vpop.xlane.xlu2 %581 }
 0x3d9   :  { %593 = vadd.xlane.f32.xlu0 %v592_v34 }
 0x3de   :  { %v501_v6 = vpop.xlane.xlu2 %500 }
 0x3df   :  { %v533_v37 = vsub.f32 %v3769_v13, %v501_v6 }
 0x3e1   :  { %v566_v59 = vmul.f32 1.442695, %v533_v37  ;;  %v522_v37 = vsub.f32 %v3704_v18, %v3771_v5 }
 0x3e3   :  { %3072 = vpow2.f32 %v566_v59 }
 0x3e6   :  { %v612_v2 = vpop.xlane.xlu2 %611 }
 0x3e7   :  { %3074 = vrcp.f32 %v612_v2 }
 0x3e8   :  { %3076 = vpow2.f32 %v576_v58 }
 0x3e9   :  { %v3861_v4 = vpop.eup %3072  ;;  %3078 = vpow2.f32 %v546_v44 }
 0x3ea   :  { %v619_v13 = vsel %vm458_vm4, %v3861_v4, 0.0 }
 0x3eb   :  { %620 = vadd.xlane.f32.xlu1 %v619_v13 }
 0x3ed   :  { %v3075_v46 = vpop.eup %3074 }
 0x3ee   :  { %v670_v27 = vmul.f32 %v3075_v46, %v3778_v23  ;;  %v3868_v20 = vpop.eup %3076  ;;  %v627_v14 = vpop.xlane.xlu0 %626  ;;  %v568_v23 = vmul.f32 1.442695, %v534_v0 }
 0x3ef   :  { %v3870_v50 = vpop.eup %3078  ;;  %3080 = vrcp.f32 %v627_v14  ;;  %v634_v47 = vsel %vm458_vm4, %v3868_v20, 0.0  ;;  %v603_v39 = vpop.xlane.xlu2 %602 }
 0x3f0   :  { %2811 = vmatmul.msk.f32.vlgmr.msra.gmra.mxu1 %vm458_vm4, %v670_v27  ;;  %3082 = vpow2.f32 %v556_v51  ;;  %v589_v17 = vsel %vm458_vm4, %v3870_v50, 0.0 }
 0x3f3   :  { %635 = vadd.xlane.f32.xlu1 %v634_v47 }
 0x3f4   :  { %590 = vadd.xlane.f32.xlu2 %v589_v17 }
 0x3f5   :  { %v3081_v56 = vpop.eup %3080 }
 0x3f6   :  { %v3879_v26 = vpop.eup %3082  ;;  %v675_v55 = vmul.f32 %v3081_v56, %v3788_v38  ;;  %v597_v62 = vpop.xlane.xlu0 %596 }
 0x3f7   :  { %3084 = vrcp.f32 %v597_v62  ;;  %v604_v9 = vsel %vm458_vm4, %v3879_v26, 0.0 }
 0x3f8   :  { %3086 = vpow2.f32 %v568_v23  ;;  %2817 = vmatmul.msk.f32.vlgmr.msra.gmra.mxu0 %vm458_vm4, %v675_v55 }
 0x3fb   :  { %605 = vadd.xlane.f32.xlu1 %v604_v9 }
 0x3fd   :  { %v3085_v15 = vpop.eup %3084 }
 0x3fe   :  { %v3885_v3 = vpop.eup %3086  ;;  %v615_v33 = vpop.xlane.xlu1 %614  ;;  %v665_v35 = vmul.f32 %v3085_v15, %v3795_v43 }
 0x3ff   :  { %3088 = vrcp.f32 %v615_v33  ;;  %v622_v38 = vsel %vm471_vm5, %v3885_v3, 0.0 }
 0x400   :  { %2805 = vmatmul.msk.f32.vlgmr.msrb.gmra.mxu3 %vm458_vm4, %v665_v35 }
 0x403   :  { %623 = vadd.xlane.f32.xlu1 %v622_v38 }
 0x405   :  { %v3089_v24 = vpop.eup %3088 }
 0x406   :  { %v630_v40 = vpop.xlane.xlu1 %629  ;;  %v618_v48 = vpop.xlane.xlu0 %617  ;;  %v671_v61 = vmul.f32 %v3089_v24, %v3801_v1 }
 0x407   :  { %3090 = vrcp.f32 %v630_v40 }
 0x408   :  { %3092 = vrcp.f32 %v618_v48  ;;  %2812 = vmatmul.msk.f32.gmra.mxu1 %vm458_vm4, %v671_v61 }
 0x40d   :  { %v3091_v53 = vpop.eup %3090 }
 0x40e   :  { %v3093_v54 = vpop.eup %3092  ;;  %v600_v32 = vpop.xlane.xlu1 %599  ;;  %v676_v43 = vmul.f32 %v3091_v53, %v3808_v7 }
 0x40f   :  { %3094 = vrcp.f32 %v600_v32  ;;  %v672_v36 = vmul.f32 %v3093_v54, %v3810_v11 }
 0x410   :  { %2818 = vmatmul.msk.f32.gmra.mxu0 %vm458_vm4, %v676_v43  ;;  %3096 = vrcp.f32 %v603_v39 }
 0x411   :  { %2813 = vmatmul.msk.f32.gmra.mxu1 %vm458_vm4, %v672_v36 }
 0x415   :  { %v3095_v45 = vpop.eup %3094 }
 0x416   :  { %v633_v1 = vpop.xlane.xlu1 %632  ;;  %v666_v57 = vmul.f32 %v3095_v45, %v3819_v21  ;;  %v3097_v34 = vpop.eup %3096  ;;  %v544_v21 = vmul.f32 1.442695, %v522_v37  ;;  %v1011_v37 = vld [vmem:[%s4853_s6 + $0x8] sm:$0xff] }
 0x417   :  { %3098 = vrcp.f32 %v633_v1  ;;  %v667_v11 = vmul.f32 %v3097_v34, %v3785_v30 }
 0x418   :  { %2806 = vmatmul.msk.f32.gmra.mxu3 %vm458_vm4, %v666_v57  ;;  %3100 = vpow2.f32 %v544_v21  ;;  %v1010_v21 = vld [vmem:[%s4853_s6] sm:$0xff] }
 0x41c   :  { %688 = vrot.lane.b32.xlu1 %v3466_v41, %s3277_s27 }
 0x41d   :  { %v3099_v7 = vpop.eup %3098 }
 0x41e   :  { %v677_v6 = vmul.f32 %v3099_v7, %v3824_v29  ;;  %v3907_v42 = vpop.eup %3100  ;;  %v639_v58 = vpop.xlane.xlu2 %638 }
 0x41f   :  { %v586_v59 = vsel %vm458_vm4, %v3907_v42, 0.0 }
 0x420   :  { %2807 = vmatmul.msk.f32.gmra.mxu3 %vm458_vm4, %v667_v11  ;;  %2819 = vmatmul.msk.f32.gmra.mxu0 %vm458_vm4, %v677_v6  ;;  %v1012_v11 = vld [vmem:[%s4853_s6 + $0x10] sm:$0xff] }
 0x426   :  { %v609_v10 = vpop.xlane.xlu2 %608 }
 0x446   :  { %587 = vadd.xlane.f32.xlu1 %v586_v59 }
 0x45e   :  { %v621_v41 = vpop.xlane.xlu1 %620 }
 0x45f   :  { %3102 = vrcp.f32 %v621_v41 }
 0x465   :  { %v3103_v30 = vpop.eup %3102 }
 0x466   :  { %v636_v63 = vpop.xlane.xlu1 %635  ;;  %v673_v29 = vmul.f32 %v3103_v30, %v3861_v4 }
 0x467   :  { %3104 = vrcp.f32 %v636_v63 }
 0x468   :  { %2814 = vmatmul.msk.f32.gmra.mxu1 %vm458_vm4, %v673_v29  ;;  %3106 = vrcp.f32 %v639_v58 }
 0x46d   :  { %v3105_v44 = vpop.eup %3104  ;;  %v855_v18 = vpop.f32.mrf.mxu1 }
 0x46e   :  { %v606_v5 = vpop.xlane.xlu1 %605  ;;  %958 = vrot.lane.b32.xlu2 %v855_v18, %s3278_s20  ;;  %v678_v2 = vmul.f32 %v3105_v44, %v3868_v20  ;;  %v3107_v13 = vpop.eup %3106 }
 0x46f   :  { %3108 = vrcp.f32 %v606_v5  ;;  %v679_v14 = vmul.f32 %v3107_v13, %v3832_v49  ;;  %v2989_v49 = vpop.permute.xlu0 %2988 }
 0x470   :  { %2820 = vmatmul.msk.f32.gmra.mxu0 %vm458_vm4, %v678_v2  ;;  %3110 = vrcp.f32 %v609_v10  ;;  %v2990_v62 = vunpack.i.l.bf16 %v2989_v49  ;;  %v2991_v9 = vunpack.i.h.bf16 %v2989_v49 }
 0x475   :  { %v3109_v46 = vpop.eup %3108  ;;  %v918_v4 = vpop.f32.mrf.mxu0 }
 0x476   :  { %v624_v51 = vpop.xlane.xlu1 %623  ;;  %v668_v27 = vmul.f32 %v3109_v46, %v3879_v26  ;;  %978 = vrot.lane.b32.xlu0 %v918_v4, %s3279_s21  ;;  %v3111_v20 = vpop.eup %3110 }
 0x477   :  { %3112 = vrcp.f32 %v624_v51  ;;  %v669_v47 = vmul.f32 %v3111_v20, %v3836_v16  ;;  %v2994_v16 = vpop.permute.xlu2 %2993  ;;  %v585_v15 = vpop.xlane.xlu0 %584 }
 0x478   :  { %2808 = vmatmul.msk.f32.gmra.mxu3 %vm458_vm4, %v668_v27  ;;  %2821 = vmatmul.msk.f32.gmra.mxu0 %vm458_vm4, %v679_v14  ;;  %3114 = vrcp.f32 %v3853_v12  ;;  %v2995_v33 = vunpack.i.l.bf16 %v2994_v16  ;;  %v2996_v38 = vunpack.i.h.bf16 %v2994_v16 }
 0x479   :  { %3116 = vrcp.f32 %v585_v15 }
 0x47d   :  { %v3113_v0 = vpop.eup %3112 }
 0x47e   :  { %v674_v17 = vmul.f32 %v3113_v0, %v3885_v3  ;;  %v3115_v3 = vpop.eup %3114 }
 0x47f   :  { %v660_v12 = vmul.f32 %v3115_v3, %v3762_v8  ;;  %v3117_v24 = vpop.eup %3116  ;;  %v591_v8 = vpop.xlane.xlu2 %590 }
 0x480   :  { %2809 = vmatmul.msk.f32.gmra.mxu3 %vm458_vm4, %v669_v47  ;;  %2815 = vmatmul.msk.f32.gmra.mxu1 %vm458_vm4, %v674_v17  ;;  %v661_v61 = vmul.f32 %v3117_v24, %v3847_v52  ;;  %v594_v36 = vpop.xlane.xlu0 %593  ;;  %v3985_v24 = vld [vmem:[%s4854_s7] sm:$0x3f] }
 0x483   :  { %v792_v23 = vpop.f32.mrf.mxu3 }
 0x484   :  { %938 = vrot.lane.b32.xlu1 %v792_v23, %s3280_s22 }
 0x485   :  { %v858_v56 = vpop.f32.mrf.mxu1 }
 0x48c   :  { %960 = vrot.lane.b32.xlu1 %v858_v56, %s3278_s20 }
 0x48d   :  { %v921_v26 = vpop.f32.mrf.mxu0 }
 0x48e   :  { %v689_v55 = vpop.permute.xlu1 %688  ;;  %980 = vrot.lane.b32.xlu2 %v921_v26, %s3279_s21  ;;  %v861_v35 = vpop.f32.mrf.mxu1 }
 0x48f   :  { %2798 = vmatpush.msk.msra.mxu2 %vm709_vm3, %v689_v55 }
 0x491   :  { %724 = vmatpush.msra.mxu2 %v2990_v62 }
 0x493   :  { %725 = vmatpush.msra.mxu2 %v2991_v9 }
 0x494   :  { %962 = vrot.lane.b32.xlu1 %v861_v35, %s3278_s20 }
 0x495   :  { %726 = vmatpush.msra.mxu2 %v2995_v33 }
 0x497   :  { %727 = vmatpush.msra.mxu2 %v2996_v38 }
 0x498   :  { %2799 = vmatmul.msk.f32.vlgmr.msra.gmra.mxu2 %vm458_vm4, %v660_v12 }
 0x49b   :  { %v795_v40 = vpop.f32.mrf.mxu3 }
 0x49c   :  { %940 = vrot.lane.b32.xlu0 %v795_v40, %s3280_s22  ;;  %v1014_v40 = vperm.slane %v3985_v24, 0 }
 0x49d   :  { %v924_v48 = vpop.f32.mrf.mxu0 }
 0x49e   :  { %982 = vrot.lane.b32.xlu2 %v924_v48, %s3279_s21 }
 0x4a0   :  { %2800 = vmatmul.msk.f32.gmra.mxu2 %vm458_vm4, %v661_v61 }
 0x4a3   :  { %v798_v53 = vpop.f32.mrf.mxu3 }
 0x4a4   :  { %942 = vrot.lane.b32.xlu0 %v798_v53, %s3280_s22 }
 0x4b9   :  { %v588_v54 = vpop.xlane.xlu1 %587 }
 0x4ba   :  { %3118 = vrcp.f32 %v588_v54 }
 0x4bb   :  { %3120 = vrcp.f32 %v591_v8 }
 0x4bc   :  { %3122 = vrcp.f32 %v594_v36 }
 0x4c0   :  { %v3119_v32 = vpop.eup %3118 }
 0x4c1   :  { %v662_v43 = vmul.f32 %v3119_v32, %v3907_v42  ;;  %v3121_v39 = vpop.eup %3120 }
 0x4c2   :  { %v663_v52 = vmul.f32 %v3121_v39, %v3870_v50  ;;  %v3123_v45 = vpop.eup %3122  ;;  %v1013_v50 = vld [vmem:[%s4853_s6 + $0x18] sm:$0xff] }
 0x4c3   :  { %2801 = vmatmul.msk.f32.gmra.mxu2 %vm458_vm4, %v662_v43  ;;  %v664_v1 = vmul.f32 %v3123_v45, %v3851_v60 }
 0x4c4   :  { %1042 = vmatpush.msrb.mxu2 %v1013_v50 }
 0x4c6   :  { %1043 = vmatpush.msrb.mxu2 %v1012_v11 }
 0x4c8   :  { %1044 = vmatpush.msrb.mxu2 %v1011_v37  ;;  %v959_v63 = vpop.permute.xlu2 %958 }
 0x4ca   :  { %1045 = vmatpush.msrb.mxu2 %v1010_v21 }
 0x4cb   :  { %2802 = vmatmul.msk.f32.gmra.mxu2 %vm458_vm4, %v663_v52 }
 0x4d3   :  { %2803 = vmatmul.msk.f32.gmra.mxu2 %vm458_vm4, %v664_v1 }
 0x4e5   :  { %v864_v57 = vpop.f32.mrf.mxu1 }
 0x4e6   :  { %964 = vrot.lane.b32.xlu1 %v864_v57, %s3278_s20 }
 0x4e8   :  { %v979_v41 = vpop.permute.xlu0 %978  ;;  %v981_v13 = vpop.permute.xlu2 %980 }
 0x4ed   :  { %v927_v34 = vpop.f32.mrf.mxu0 }
 0x4ee   :  { %984 = vrot.lane.b32.xlu2 %v927_v34, %s3279_s21 }
 0x4f5   :  { %v930_v7 = vpop.f32.mrf.mxu0 }
 0x4f6   :  { %986 = vrot.lane.b32.xlu2 %v930_v7, %s3279_s21  ;;  %v939_v59 = vpop.permute.xlu1 %938 }
 0x4f8   :  { %v983_v0 = vpop.permute.xlu2 %982 }
 0x4fb   :  { %v801_v60 = vpop.f32.mrf.mxu3 }
 0x4fc   :  { %944 = vrot.lane.b32.xlu0 %v801_v60, %s3280_s22  ;;  %v3281_v60 = vmov 32.0  }
 0x4fd   :  { %v867_v6 = vpop.f32.mrf.mxu1  ;;  %3124 = vrcp.f32 %v3281_v60 }
 0x4fe   :  { %966 = vrot.lane.b32.xlu1 %v867_v6, %s3278_s20  ;;  %v961_v2 = vpop.permute.xlu1 %960 }
 0x503   :  { %v804_v42 = vpop.f32.mrf.mxu3 }
 0x504   :  { %946 = vrot.lane.b32.xlu0 %v804_v42, %s3280_s22 }
 0x506   :  { %v963_v14 = vpop.permute.xlu1 %962 }
 0x50e   :  { %v941_v18 = vpop.permute.xlu0 %940 }
 0x516   :  { %v943_v51 = vpop.permute.xlu0 %942 }
 0x51b   :  { %v729_v30 = vpop.f32.mrf.mxu2 }
 0x51c   :  { %v993_v29 = vsel %vm219_vm2, %v729_v30, %v939_v59 }
 0x51d   :  { %v999_v58 = vsel %vm998_vm6, %v993_v29, %v959_v63 }
 0x51e   :  { %v1005_v44 = vsel %vm1004_vm7, %v999_v58, %v979_v41 }
 0x51f   :  { %2822 = vmatmul.msk.f32.vlgmr.msrb.gmra.mxu2 %vm126_vm1, %v1005_v44 }
 0x523   :  { %v732_v5 = vpop.f32.mrf.mxu2 }
 0x524   :  { %v994_v10 = vsel %vm219_vm2, %v732_v5, %v941_v18 }
 0x525   :  { %v1000_v46 = vsel %vm998_vm6, %v994_v10, %v961_v2 }
 0x526   :  { %v1006_v4 = vsel %vm1004_vm7, %v1000_v46, %v981_v13 }
 0x527   :  { %2823 = vmatmul.msk.f32.gmra.mxu2 %vm126_vm1, %v1006_v4 }
 0x546   :  { %v735_v27 = vpop.f32.mrf.mxu2 }
 0x547   :  { %v995_v20 = vsel %vm219_vm2, %v735_v27, %v943_v51 }
 0x548   :  { %v1001_v47 = vsel %vm998_vm6, %v995_v20, %v963_v14  ;;  %v985_v49 = vpop.permute.xlu2 %984 }
 0x549   :  { %v1007_v17 = vsel %vm1004_vm7, %v1001_v47, %v983_v0 }
 0x54a   :  { %2824 = vmatmul.msk.f32.gmra.mxu2 %vm126_vm1, %v1007_v17 }
 0x54e   :  { %v738_v23 = vpop.f32.mrf.mxu2 }
 0x550   :  { %v987_v35 = vpop.permute.xlu2 %986 }
 0x556   :  { %v741_v9 = vpop.f32.mrf.mxu2 }
 0x558   :  { %v965_v26 = vpop.permute.xlu1 %964 }
 0x56e   :  { %v945_v56 = vpop.permute.xlu0 %944 }
 0x56f   :  { %v996_v55 = vsel %vm219_vm2, %v738_v23, %v945_v56 }
 0x570   :  { %v1002_v62 = vsel %vm998_vm6, %v996_v55, %v965_v26  ;;  %v967_v3 = vpop.permute.xlu1 %966  ;;  %v1200_v55 = vld [vmem:[%s4855_s8 + $0x18] sm:$0xff] }
 0x571   :  { %v1008_v16 = vsel %vm1004_vm7, %v1002_v62, %v985_v49  ;;  %1230 = vmatpush.msra.mxu3 %v1200_v55  ;;  %v1199_v62 = vld [vmem:[%s4855_s8 + $0x10] sm:$0xff] }
 0x572   :  { %2825 = vmatmul.msk.f32.gmra.mxu2 %vm126_vm1, %v1008_v16  ;;  %v1198_v16 = vld [vmem:[%s4855_s8 + $0x8] sm:$0xff] }
 0x573   :  { %1231 = vmatpush.msra.mxu3 %v1199_v62 }
 0x575   :  { %1232 = vmatpush.msra.mxu3 %v1198_v16 }
 0x576   :  { %v947_v15 = vpop.permute.xlu0 %946 }
 0x577   :  { %v997_v33 = vsel %vm219_vm2, %v741_v9, %v947_v15  ;;  %v1197_v9 = vld [vmem:[%s4855_s8] sm:$0xff] }
 0x578   :  { %v1003_v38 = vsel %vm998_vm6, %v997_v33, %v967_v3  ;;  %1233 = vmatpush.msra.mxu3 %v1197_v9 }
 0x579   :  { %v1009_v12 = vsel %vm1004_vm7, %v1003_v38, %v987_v35 }
 0x57a   :  { %2826 = vmatmul.msk.f32.gmra.mxu2 %vm126_vm1, %v1009_v12 }
 0x5a2   :  { %v1047_v48 = vpop.f32.mrf.mxu2 }
 0x5a3   :  { %v1048_v61 = vadd.f32 %v1047_v48, %v1014_v40 }
 0x5a5   :  { %v1062_v53 = vadd.f32 %v1048_v61, %v3417_v19 }
 0x5a7   :  { %v1067_v54 = vsel %vm126_vm1, %v1062_v53, 0.0 }
 0x5a8   :  { %1068 = vadd.xlane.f32.xlu0 %v1067_v54 }
 0x5aa   :  { %v1050_v8 = vpop.f32.mrf.mxu2 }
 0x5ab   :  { %v1051_v32 = vadd.f32 %v1050_v8, %v1014_v40 }
 0x5ad   :  { %v1063_v43 = vadd.f32 %v1051_v32, %v3424_v22 }
 0x5af   :  { %v1070_v36 = vsel %vm126_vm1, %v1063_v43, 0.0 }
 0x5b0   :  { %1071 = vadd.xlane.f32.xlu1 %v1070_v36  ;;  %v4041_v36 = vperm.slane %v3985_v24, 1 }
 0x5cd   :  { %v1053_v39 = vpop.f32.mrf.mxu2 }
 0x5ce   :  { %v1054_v52 = vadd.f32 %v1053_v39, %v1014_v40 }
 0x5d0   :  { %v1064_v45 = vadd.f32 %v1054_v52, %v3431_v25  ;;  %v3125_v25 = vpop.eup %3124 }
 0x5d1   :  { %v1084_v37 = vmul.f32 32.0, %v3125_v25  ;;  %vm1088_vm9 = vweird.f32 %v3125_v25 }
 0x5d2   :  { %v1073_v1 = vsel %vm126_vm1, %v1064_v45, 0.0 }
 0x5d3   :  { %1074 = vadd.xlane.f32.xlu2 %v1073_v1  ;;  %v1085_v21 = vsub.f32 1.0, %v1084_v37  ;;  %v4044_v1 = vperm.slane %v3985_v24, 2 }
 0x5d5   :  { %v1086_v42 = vmul.f32 %v3125_v25, %v1085_v21 }
 0x5d7   :  { %v1087_v59 = vadd.f32 %v3125_v25, %v1086_v42 }
 0x5f5   :  { %v1056_v57 = vpop.f32.mrf.mxu2 }
 0x5f6   :  { %v1057_v34 = vadd.f32 %v1056_v57, %v1014_v40 }
 0x5f8   :  { %v1065_v19 = vadd.f32 %v1057_v34, %v3438_v28  ;;  %v3998_v28 = vsel %vm1088_vm9, %v3125_v25, %v1087_v59 }
 0x5fa   :  { %v1076_v7 = vsel %vm126_vm1, %v1065_v19, 0.0 }
 0x5fb   :  { %1077 = vadd.xlane.f32.xlu0 %v1076_v7 }
 0x5fd   :  { %v1059_v50 = vpop.f32.mrf.mxu2 }
 0x5fe   :  { %v1060_v11 = vadd.f32 %v1059_v50, %v1014_v40 }
 0x600   :  { %v1066_v22 = vadd.f32 %v1060_v11, %v3445_v31 }
 0x602   :  { %v1080_v6 = vsel %vm1079_vm8, %v1066_v22, 0.0 }
 0x603   :  { %1081 = vadd.xlane.f32.xlu1 %v1080_v6 }
 0x61b   :  { %v1069_v41 = vpop.xlane.xlu0 %1068 }
 0x61c   :  { %v1090_v30 = vmul.f32 %v3998_v28, %v1069_v41 }
 0x61e   :  { %v1095_v63 = vsub.f32 %v1062_v53, %v1090_v30 }
 0x620   :  { %v1100_v29 = vmul.f32 %v1095_v63, %v1095_v63 }
 0x622   :  { %v1105_v31 = vsel %vm126_vm1, %v1100_v29, 0.0 }
 0x623   :  { %v1072_v58 = vpop.xlane.xlu1 %1071  ;;  %1106 = vadd.xlane.f32.xlu2 %v1105_v31 }
 0x624   :  { %v1091_v44 = vmul.f32 %v3998_v28, %v1072_v58 }
 0x626   :  { %v4003_v18 = vsub.f32 %v1063_v43, %v1091_v44 }
 0x628   :  { %v1101_v5 = vmul.f32 %v4003_v18, %v4003_v18 }
 0x62a   :  { %v1108_v2 = vsel %vm126_vm1, %v1101_v5, 0.0 }
 0x62b   :  { %1109 = vadd.xlane.f32.xlu0 %v1108_v2 }
 0x646   :  { %v1075_v10 = vpop.xlane.xlu2 %1074 }
 0x647   :  { %v1092_v13 = vmul.f32 %v3998_v28, %v1075_v10 }
 0x649   :  { %v4009_v46 = vsub.f32 %v1064_v45, %v1092_v13  ;;  %v1262_v13 = vld [vmem:[%s4857_s10 + $0x38] sm:$0xff] }
 0x64a   :  { %1287 = vmatpush.msrb.mxu1 %v1262_v13 }
 0x64b   :  { %v1102_v4 = vmul.f32 %v4009_v46, %v4009_v46 }
 0x64d   :  { %v1111_v51 = vsel %vm126_vm1, %v1102_v4, 0.0  ;;  %v1260_v4 = vld [vmem:[%s4857_s10 + $0x28] sm:$0xff] }
 0x64e   :  { %1112 = vadd.xlane.f32.xlu1 %v1111_v51 }
 0x66e   :  { %v1078_v27 = vpop.xlane.xlu0 %1077 }
 0x66f   :  { %v1093_v14 = vmul.f32 %v3998_v28, %v1078_v27 }
 0x671   :  { %v4015_v20 = vsub.f32 %v1065_v19, %v1093_v14  ;;  %v1259_v14 = vld [vmem:[%s4857_s10 + $0x20] sm:$0xff] }
 0x673   :  { %v1103_v0 = vmul.f32 %v4015_v20, %v4015_v20 }
 0x675   :  { %v1114_v47 = vsel %vm126_vm1, %v1103_v0, 0.0 }
 0x676   :  { %v1082_v17 = vpop.xlane.xlu1 %1081  ;;  %1115 = vadd.xlane.f32.xlu2 %v1114_v47 }
 0x677   :  { %v1094_v23 = vmul.f32 %v3998_v28, %v1082_v17  ;;  %v1258_v17 = vld [vmem:[%s4857_s10 + $0x18] sm:$0xff] }
 0x679   :  { %v4021_v49 = vsub.f32 %v1066_v22, %v1094_v23 }
 0x67b   :  { %v1104_v56 = vmul.f32 %v4021_v49, %v4021_v49 }
 0x67d   :  { %v1117_v26 = vsel %vm1079_vm8, %v1104_v56, 0.0 }
 0x67e   :  { %1118 = vadd.xlane.f32.xlu0 %v1117_v26 }
 0x696   :  { %v1107_v15 = vpop.xlane.xlu2 %1106 }
 0x697   :  { %v1120_v3 = vmul.f32 %v1107_v15, %v3998_v28 }
 0x699   :  { %v1125_v33 = vadd.f32 1e-05, %v1120_v3 }
 0x69b   :  { %3126 = vrsqrt.f32 %v1125_v33  ;;  %vm1136_vm11 = vweird.f32 %v1125_v33 }
 0x69e   :  { %v1110_v35 = vpop.xlane.xlu0 %1109 }
 0x69f   :  { %v1121_v38 = vmul.f32 %v1110_v35, %v3998_v28 }
 0x6a1   :  { %v3127_v12 = vpop.eup %3126  ;;  %v1126_v40 = vadd.f32 1e-05, %v1121_v38 }
 0x6a2   :  { %v1131_v48 = vmul.f32 %v3127_v12, %v1125_v33  ;;  %vm1137_vm10 = vweird.f32 %v3127_v12 }
 0x6a3   :  { %3128 = vrsqrt.f32 %v1126_v40  ;;  %vm1138_vm12 = vmor %vm1136_vm11, %vm1137_vm10  ;;  %vm1146_vm14 = vweird.f32 %v1126_v40 }
 0x6a4   :  { %v1132_v61 = vmul.f32 %v3127_v12, %v1131_v48 }
 0x6a6   :  { %v1133_v53 = vmul.f32 0.5, %v1132_v61 }
 0x6a8   :  { %v1134_v54 = vsub.f32 1.5, %v1133_v53 }
 0x6a9   :  { %v3129_v8 = vpop.eup %3128 }
 0x6aa   :  { %v1135_v32 = vmul.f32 %v3127_v12, %v1134_v54  ;;  %v1141_v43 = vmul.f32 %v3129_v8, %v1126_v40  ;;  %vm1147_vm13 = vweird.f32 %v3129_v8 }
 0x6ab   :  { %vm1148_vm15 = vmor %vm1146_vm14, %vm1147_vm13 }
 0x6ac   :  { %v1139_v39 = vsel %vm1138_vm12, %v3127_v12, %v1135_v32  ;;  %v1142_v52 = vmul.f32 %v3129_v8, %v1141_v43  ;;  %v1256_v32 = vld [vmem:[%s4857_s10 + $0x8] sm:$0xff]  ;;  %v1255_v43 = vld [vmem:[%s4857_s10] sm:$0xff] }
 0x6ad   :  { %v1180_v45 = vmul.f32 %v1139_v39, %v1095_v63 }
 0x6ae   :  { %v1143_v57 = vmul.f32 0.5, %v1142_v52 }
 0x6af   :  { %v1186_v34 = vmul.f32 %v4041_v36, %v1180_v45 }
 0x6b0   :  { %v1144_v19 = vsub.f32 1.5, %v1143_v57 }
 0x6b1   :  { %v4048_v7 = vadd.f32 %v4044_v1, %v1186_v34 }
 0x6b2   :  { %v1145_v50 = vmul.f32 %v3129_v8, %v1144_v19 }
 0x6b3   :  { %2827 = vmatmul.msk.f32.vlgmr.msra.gmra.mxu3 %vm126_vm1, %v4048_v7 }
 0x6b4   :  { %v1149_v11 = vsel %vm1148_vm15, %v3129_v8, %v1145_v50 }
 0x6b5   :  { %v1181_v22 = vmul.f32 %v1149_v11, %v4003_v18 }
 0x6b7   :  { %v1187_v60 = vmul.f32 %v4041_v36, %v1181_v22 }
 0x6b9   :  { %v4055_v6 = vadd.f32 %v4044_v1, %v1187_v60 }
 0x6bb   :  { %2828 = vmatmul.msk.f32.gmra.mxu3 %vm126_vm1, %v4055_v6 }
 0x6c1   :  { %v1113_v25 = vpop.xlane.xlu1 %1112 }
 0x6c2   :  { %v1122_v37 = vmul.f32 %v1113_v25, %v3998_v28 }
 0x6c4   :  { %v1127_v21 = vadd.f32 1e-05, %v1122_v37 }
 0x6c6   :  { %3130 = vrsqrt.f32 %v1127_v21  ;;  %vm1156_vm10 = vweird.f32 %v1127_v21 }
 0x6cc   :  { %v3131_v42 = vpop.eup %3130 }
 0x6cd   :  { %v1151_v59 = vmul.f32 %v3131_v42, %v1127_v21  ;;  %vm1157_vm9 = vweird.f32 %v3131_v42 }
 0x6ce   :  { %vm1158_vm11 = vmor %vm1156_vm10, %vm1157_vm9 }
 0x6cf   :  { %v1152_v41 = vmul.f32 %v3131_v42, %v1151_v59 }
 0x6d1   :  { %v1153_v30 = vmul.f32 0.5, %v1152_v41 }
 0x6d3   :  { %v1154_v63 = vsub.f32 1.5, %v1153_v30 }
 0x6d5   :  { %v1155_v29 = vmul.f32 %v3131_v42, %v1154_v63 }
 0x6d7   :  { %v1159_v31 = vsel %vm1158_vm11, %v3131_v42, %v1155_v29  ;;  %v1263_v42 = vperm.slane %v3985_v24, 3 }
 0x6d8   :  { %v1182_v58 = vmul.f32 %v1159_v31, %v4009_v46  ;;  %v1261_v46 = vld [vmem:[%s4857_s10 + $0x30] sm:$0xff] }
 0x6d9   :  { %1288 = vmatpush.msrb.mxu1 %v1261_v46 }
 0x6da   :  { %v1188_v44 = vmul.f32 %v4041_v36, %v1182_v58 }
 0x6db   :  { %1289 = vmatpush.msrb.mxu1 %v1260_v4 }
 0x6dc   :  { %v4063_v18 = vadd.f32 %v4044_v1, %v1188_v44 }
 0x6dd   :  { %1290 = vmatpush.msrb.mxu1 %v1259_v14 }
 0x6de   :  { %2829 = vmatmul.msk.f32.gmra.mxu3 %vm126_vm1, %v4063_v18 }
 0x6df   :  { %1291 = vmatpush.msrb.mxu1 %v1258_v17 }
 0x6e9   :  { %v1116_v5 = vpop.xlane.xlu2 %1115 }
 0x6ea   :  { %v1123_v2 = vmul.f32 %v1116_v5, %v3998_v28 }
 0x6ec   :  { %v1128_v10 = vadd.f32 1e-05, %v1123_v2 }
 0x6ee   :  { %3132 = vrsqrt.f32 %v1128_v10  ;;  %vm1166_vm13 = vweird.f32 %v1128_v10 }
 0x6f1   :  { %v1119_v51 = vpop.xlane.xlu0 %1118 }
 0x6f2   :  { %v1124_v27 = vmul.f32 %v1119_v51, %v3998_v28 }
 0x6f4   :  { %v3133_v0 = vpop.eup %3132  ;;  %v1129_v47 = vadd.f32 1e-05, %v1124_v27 }
 0x6f5   :  { %v1161_v23 = vmul.f32 %v3133_v0, %v1128_v10  ;;  %vm1167_vm12 = vweird.f32 %v3133_v0 }
 0x6f6   :  { %3134 = vrsqrt.f32 %v1129_v47  ;;  %vm1168_vm14 = vmor %vm1166_vm13, %vm1167_vm12  ;;  %vm1176_vm9 = vweird.f32 %v1129_v47 }
 0x6f7   :  { %v1162_v56 = vmul.f32 %v3133_v0, %v1161_v23 }
 0x6f9   :  { %v1163_v26 = vmul.f32 0.5, %v1162_v56 }
 0x6fb   :  { %v1164_v55 = vsub.f32 1.5, %v1163_v26 }
 0x6fc   :  { %v3135_v62 = vpop.eup %3134 }
 0x6fd   :  { %v1165_v16 = vmul.f32 %v3133_v0, %v1164_v55  ;;  %v1171_v9 = vmul.f32 %v3135_v62, %v1129_v47  ;;  %vm1177_vm15 = vweird.f32 %v3135_v62 }
 0x6fe   :  { %vm1178_vm10 = vmor %vm1176_vm9, %vm1177_vm15 }
 0x6ff   :  { %v1169_v15 = vsel %vm1168_vm14, %v3133_v0, %v1165_v16  ;;  %v1172_v3 = vmul.f32 %v3135_v62, %v1171_v9 }
 0x700   :  { %v1183_v33 = vmul.f32 %v1169_v15, %v4015_v20  ;;  %v1257_v20 = vld [vmem:[%s4857_s10 + $0x10] sm:$0xff] }
 0x701   :  { %v1173_v35 = vmul.f32 0.5, %v1172_v3  ;;  %1292 = vmatpush.msrb.mxu1 %v1257_v20 }
 0x702   :  { %v1189_v38 = vmul.f32 %v4041_v36, %v1183_v33 }
 0x703   :  { %v1174_v12 = vsub.f32 1.5, %v1173_v35  ;;  %1293 = vmatpush.msrb.mxu1 %v1256_v32 }
 0x704   :  { %v1195_v40 = vadd.f32 %v4044_v1, %v1189_v38 }
 0x705   :  { %v1175_v48 = vmul.f32 %v3135_v62, %v1174_v12  ;;  %1294 = vmatpush.msrb.mxu1 %v1255_v43 }
 0x706   :  { %2830 = vmatmul.msk.f32.gmra.mxu3 %vm126_vm1, %v1195_v40 }
 0x707   :  { %v1179_v61 = vsel %vm1178_vm10, %v3135_v62, %v1175_v48 }
 0x708   :  { %v1184_v53 = vmul.f32 %v1179_v61, %v4021_v49  ;;  %v3038_v49 = vld [vmem:[%s4856_s9] ss:$0 sm:$0xff] }
 0x70a   :  { %v1190_v54 = vmul.f32 %v4041_v36, %v1184_v53 }
 0x70c   :  { %v1196_v8 = vadd.f32 %v4044_v1, %v1190_v54 }
 0x70e   :  { %2831 = vmatmul.msk.f32.gmra.mxu3 %vm126_vm1, %v1196_v8 }
 0x736   :  { %v1235_v36 = vpop.f32.mrf.mxu3 }
 0x737   :  { %v1236_v39 = vadd.f32 %v3038_v49, %v1235_v36  ;;  %v2840_v36 = vld [vmem:[%s4851_s4 + $0x30] sm:$0xff] }
 0x739   :  { %v1250_v52 = vmax.f32 %v1236_v39, 0.0  ;;  %v2839_v39 = vld [vmem:[%s4851_s4 + $0x28] sm:$0xff] }
 0x73b   :  { %2832 = vmatmul.msk.f32.vlgmr.msrb.gmra.mxu1 %vm66_vm0, %v1250_v52  ;;  %v2838_v52 = vld [vmem:[%s4851_s4 + $0x20] sm:$0xff] }
 0x73e   :  { %v1238_v45 = vpop.f32.mrf.mxu3 }
 0x73f   :  { %v1239_v1 = vadd.f32 %v3038_v49, %v1238_v45 }
 0x741   :  { %v1251_v57 = vmax.f32 %v1239_v1, 0.0 }
 0x743   :  { %2833 = vmatmul.msk.f32.gmra.mxu1 %vm66_vm0, %v1251_v57 }
 0x761   :  { %v1241_v34 = vpop.f32.mrf.mxu3 }
 0x762   :  { %v1242_v19 = vadd.f32 %v3038_v49, %v1241_v34 }
 0x764   :  { %v1252_v50 = vmax.f32 %v1242_v19, 0.0 }
 0x766   :  { %2834 = vmatmul.msk.f32.gmra.mxu1 %vm66_vm0, %v1252_v50 }
 0x789   :  { %v1244_v11 = vpop.f32.mrf.mxu3 }
 0x78a   :  { %v1245_v22 = vadd.f32 %v3038_v49, %v1244_v11 }
 0x78c   :  { %v1253_v60 = vmax.f32 %v1245_v22, 0.0 }
 0x78e   :  { %2835 = vmatmul.msk.f32.gmra.mxu1 %vm66_vm0, %v1253_v60 }
 0x791   :  { %v1247_v25 = vpop.f32.mrf.mxu3 }
 0x792   :  { %v1248_v37 = vadd.f32 %v3038_v49, %v1247_v25  ;;  %v2841_v49 = vld [vmem:[%s4851_s4 + $0x38] sm:$0xff] }
 0x793   :  { %1474 = vmatpush.msrb.mxu0 %v2841_v49 }
 0x794   :  { %v1254_v21 = vmax.f32 %v1248_v37, 0.0 }
 0x795   :  { %1475 = vmatpush.msrb.mxu0 %v2840_v36 }
 0x796   :  { %2836 = vmatmul.msk.f32.gmra.mxu1 %vm66_vm0, %v1254_v21 }
 0x797   :  { %1476 = vmatpush.msrb.mxu0 %v2839_v39 }
 0x799   :  { %1477 = vmatpush.msrb.mxu0 %v2838_v52 }
 0x7b8   :  { %v1296_v59 = vpop.f32.mrf.mxu1 }
 0x7b9   :  { %v1297_v41 = vadd.f32 %v1296_v59, %v1263_v42 }
 0x7bb   :  { %v1311_v30 = vadd.f32 %v1297_v41, %v4048_v7  ;;  %v4159_v41 = vperm.slane %v3985_v24, 4 }
 0x7bd   :  { %v1316_v63 = vsel %vm126_vm1, %v1311_v30, 0.0 }
 0x7be   :  { %1317 = vadd.xlane.f32.xlu1 %v1316_v63 }
 0x7c0   :  { %v1299_v29 = vpop.f32.mrf.mxu1 }
 0x7c1   :  { %v1300_v31 = vadd.f32 %v1299_v29, %v1263_v42 }
 0x7c3   :  { %v1312_v58 = vadd.f32 %v1300_v31, %v4055_v6  ;;  %v4162_v31 = vperm.slane %v3985_v24, 5 }
 0x7c5   :  { %v1319_v44 = vsel %vm126_vm1, %v1312_v58, 0.0 }
 0x7c6   :  { %1320 = vadd.xlane.f32.xlu2 %v1319_v44 }
 0x7e3   :  { %v1302_v5 = vpop.f32.mrf.mxu1 }
 0x7e4   :  { %v1303_v2 = vadd.f32 %v1302_v5, %v1263_v42 }
 0x7e6   :  { %v1313_v10 = vadd.f32 %v1303_v2, %v4063_v18 }
 0x7e8   :  { %v1322_v13 = vsel %vm126_vm1, %v1313_v10, 0.0 }
 0x7e9   :  { %1323 = vadd.xlane.f32.xlu0 %v1322_v13 }
 0x80b   :  { %v1305_v46 = vpop.f32.mrf.mxu1 }
 0x80c   :  { %v1306_v4 = vadd.f32 %v1305_v46, %v1263_v42 }
 0x80e   :  { %v1314_v7 = vadd.f32 %v1306_v4, %v1195_v40 }
 0x810   :  { %v1325_v51 = vsel %vm126_vm1, %v1314_v7, 0.0 }
 0x811   :  { %1326 = vadd.xlane.f32.xlu1 %v1325_v51 }
 0x813   :  { %v1308_v27 = vpop.f32.mrf.mxu1 }
 0x814   :  { %v1309_v14 = vadd.f32 %v1308_v27, %v1263_v42 }
 0x816   :  { %v1315_v0 = vadd.f32 %v1309_v14, %v1196_v8 }
 0x818   :  { %v1328_v6 = vsel %vm1079_vm8, %v1315_v0, 0.0 }
 0x819   :  { %1329 = vadd.xlane.f32.xlu2 %v1328_v6 }
 0x831   :  { %v1318_v47 = vpop.xlane.xlu1 %1317 }
 0x832   :  { %v1331_v17 = vmul.f32 %v1318_v47, %v3998_v28 }
 0x834   :  { %v1336_v23 = vsub.f32 %v1311_v30, %v1331_v17 }
 0x836   :  { %v1341_v18 = vmul.f32 %v1336_v23, %v1336_v23 }
 0x838   :  { %v1346_v56 = vsel %vm126_vm1, %v1341_v18, 0.0 }
 0x839   :  { %1347 = vadd.xlane.f32.xlu0 %v1346_v56  ;;  %v1321_v26 = vpop.xlane.xlu2 %1320 }
 0x83a   :  { %v1332_v55 = vmul.f32 %v1321_v26, %v3998_v28 }
 0x83c   :  { %v4121_v62 = vsub.f32 %v1312_v58, %v1332_v55 }
 0x83e   :  { %v1342_v16 = vmul.f32 %v4121_v62, %v4121_v62 }
 0x840   :  { %v1349_v9 = vsel %vm126_vm1, %v1342_v16, 0.0 }
 0x841   :  { %1350 = vadd.xlane.f32.xlu1 %v1349_v9 }
 0x85c   :  { %v1324_v15 = vpop.xlane.xlu0 %1323 }
 0x85d   :  { %v1333_v3 = vmul.f32 %v1324_v15, %v3998_v28 }
 0x85f   :  { %v4127_v33 = vsub.f32 %v1313_v10, %v1333_v3 }
 0x861   :  { %v1343_v35 = vmul.f32 %v4127_v33, %v4127_v33 }
 0x863   :  { %v1352_v38 = vsel %vm126_vm1, %v1343_v35, 0.0 }
 0x864   :  { %1353 = vadd.xlane.f32.xlu2 %v1352_v38 }
 0x884   :  { %v1327_v12 = vpop.xlane.xlu1 %1326 }
 0x885   :  { %v1334_v40 = vmul.f32 %v1327_v12, %v3998_v28 }
 0x887   :  { %v4133_v48 = vsub.f32 %v1314_v7, %v1334_v40 }
 0x889   :  { %v1344_v61 = vmul.f32 %v4133_v48, %v4133_v48 }
 0x88b   :  { %v1355_v53 = vsel %vm126_vm1, %v1344_v61, 0.0 }
 0x88c   :  { %1356 = vadd.xlane.f32.xlu0 %v1355_v53  ;;  %v1330_v54 = vpop.xlane.xlu2 %1329 }
 0x88d   :  { %v1335_v8 = vmul.f32 %v1330_v54, %v3998_v28 }
 0x88f   :  { %v4139_v20 = vsub.f32 %v1315_v0, %v1335_v8 }
 0x891   :  { %v1345_v32 = vmul.f32 %v4139_v20, %v4139_v20 }
 0x893   :  { %v1358_v43 = vsel %vm1079_vm8, %v1345_v32, 0.0 }
 0x894   :  { %1359 = vadd.xlane.f32.xlu1 %v1358_v43 }
 0x8ac   :  { %v1348_v45 = vpop.xlane.xlu0 %1347 }
 0x8ad   :  { %v1361_v1 = vmul.f32 %v1348_v45, %v3998_v28 }
 0x8af   :  { %v1366_v57 = vadd.f32 1e-05, %v1361_v1 }
 0x8b1   :  { %3136 = vrsqrt.f32 %v1366_v57  ;;  %vm1377_vm12 = vweird.f32 %v1366_v57 }
 0x8b4   :  { %v1351_v34 = vpop.xlane.xlu1 %1350 }
 0x8b5   :  { %v1362_v19 = vmul.f32 %v1351_v34, %v3998_v28 }
 0x8b7   :  { %v3137_v50 = vpop.eup %3136  ;;  %v1367_v11 = vadd.f32 1e-05, %v1362_v19 }
 0x8b8   :  { %v1372_v22 = vmul.f32 %v3137_v50, %v1366_v57  ;;  %vm1378_vm11 = vweird.f32 %v3137_v50 }
 0x8b9   :  { %3138 = vrsqrt.f32 %v1367_v11  ;;  %vm1379_vm13 = vmor %vm1377_vm12, %vm1378_vm11  ;;  %vm1387_vm15 = vweird.f32 %v1367_v11 }
 0x8ba   :  { %v1373_v60 = vmul.f32 %v3137_v50, %v1372_v22 }
 0x8bc   :  { %v1374_v25 = vmul.f32 0.5, %v1373_v60 }
 0x8be   :  { %v1375_v37 = vsub.f32 1.5, %v1374_v25 }
 0x8bf   :  { %v3139_v21 = vpop.eup %3138 }
 0x8c0   :  { %v1376_v42 = vmul.f32 %v3137_v50, %v1375_v37  ;;  %v1382_v59 = vmul.f32 %v3139_v21, %v1367_v11  ;;  %vm1388_vm14 = vweird.f32 %v3139_v21 }
 0x8c1   :  { %vm1389_vm9 = vmor %vm1387_vm15, %vm1388_vm14 }
 0x8c2   :  { %v1380_v30 = vsel %vm1379_vm13, %v3137_v50, %v1376_v42  ;;  %v1383_v63 = vmul.f32 %v3139_v21, %v1382_v59  ;;  %v3039_v50 = vld [vmem:[%s4852_s5 + $0x1] ss:$0 sm:$0xff] }
 0x8c3   :  { %v1421_v29 = vmul.f32 %v1380_v30, %v1336_v23 }
 0x8c4   :  { %v1384_v58 = vmul.f32 0.5, %v1383_v63 }
 0x8c5   :  { %v1427_v44 = vmul.f32 %v4159_v41, %v1421_v29 }
 0x8c6   :  { %v1385_v5 = vsub.f32 1.5, %v1384_v58 }
 0x8c7   :  { %v4166_v2 = vadd.f32 %v4162_v31, %v1427_v44 }
 0x8c8   :  { %v1386_v10 = vmul.f32 %v3139_v21, %v1385_v5 }
 0x8c9   :  { %2842 = vmatmul.msk.f32.vlgmr.msrb.gmra.mxu0 %vm126_vm1, %v4166_v2 }
 0x8ca   :  { %v1390_v13 = vsel %vm1389_vm9, %v3139_v21, %v1386_v10 }
 0x8cb   :  { %v1422_v46 = vmul.f32 %v1390_v13, %v4121_v62 }
 0x8cd   :  { %v1428_v24 = vmul.f32 %v4159_v41, %v1422_v46 }
 0x8cf   :  { %v4173_v4 = vadd.f32 %v4162_v31, %v1428_v24 }
 0x8d1   :  { %2843 = vmatmul.msk.f32.gmra.mxu0 %vm126_vm1, %v4173_v4 }
 0x8d7   :  { %v1354_v7 = vpop.xlane.xlu2 %1353 }
 0x8d8   :  { %v1363_v51 = vmul.f32 %v1354_v7, %v3998_v28 }
 0x8da   :  { %v1368_v27 = vadd.f32 1e-05, %v1363_v51 }
 0x8dc   :  { %3140 = vrsqrt.f32 %v1368_v27  ;;  %vm1397_vm11 = vweird.f32 %v1368_v27 }
 0x8e2   :  { %v3141_v14 = vpop.eup %3140 }
 0x8e3   :  { %v1392_v0 = vmul.f32 %v3141_v14, %v1368_v27  ;;  %vm1398_vm10 = vweird.f32 %v3141_v14 }
 0x8e4   :  { %vm1399_vm12 = vmor %vm1397_vm11, %vm1398_vm10 }
 0x8e5   :  { %v1393_v6 = vmul.f32 %v3141_v14, %v1392_v0 }
 0x8e7   :  { %v1394_v47 = vmul.f32 0.5, %v1393_v6 }
 0x8e9   :  { %v1395_v17 = vsub.f32 1.5, %v1394_v47 }
 0x8eb   :  { %v1396_v23 = vmul.f32 %v3141_v14, %v1395_v17 }
 0x8ed   :  { %v1400_v18 = vsel %vm1399_vm12, %v3141_v14, %v1396_v23 }
 0x8ee   :  { %v1423_v56 = vmul.f32 %v1400_v18, %v4127_v33 }
 0x8f0   :  { %v1429_v26 = vmul.f32 %v4159_v41, %v1423_v56 }
 0x8f2   :  { %v4181_v55 = vadd.f32 %v4162_v31, %v1429_v26 }
 0x8f4   :  { %2844 = vmatmul.msk.f32.gmra.mxu0 %vm126_vm1, %v4181_v55 }
 0x8ff   :  { %v1357_v62 = vpop.xlane.xlu0 %1356 }
 0x900   :  { %v1364_v16 = vmul.f32 %v1357_v62, %v3998_v28 }
 0x902   :  { %v1369_v9 = vadd.f32 1e-05, %v1364_v16 }
 0x904   :  { %3142 = vrsqrt.f32 %v1369_v9  ;;  %vm1407_vm14 = vweird.f32 %v1369_v9 }
 0x907   :  { %v1360_v15 = vpop.xlane.xlu1 %1359 }
 0x908   :  { %v1365_v3 = vmul.f32 %v1360_v15, %v3998_v28 }
 0x90a   :  { %v3143_v35 = vpop.eup %3142  ;;  %v1370_v38 = vadd.f32 1e-05, %v1365_v3 }
 0x90b   :  { %v1402_v12 = vmul.f32 %v3143_v35, %v1369_v9  ;;  %vm1408_vm13 = vweird.f32 %v3143_v35 }
 0x90c   :  { %3144 = vrsqrt.f32 %v1370_v38  ;;  %vm1409_vm15 = vmor %vm1407_vm14, %vm1408_vm13  ;;  %vm1417_vm10 = vweird.f32 %v1370_v38 }
 0x90d   :  { %v1403_v33 = vmul.f32 %v3143_v35, %v1402_v12 }
 0x90f   :  { %v1404_v40 = vmul.f32 0.5, %v1403_v33 }
 0x911   :  { %v1405_v61 = vsub.f32 1.5, %v1404_v40 }
 0x912   :  { %v3145_v53 = vpop.eup %3144 }
 0x913   :  { %v1406_v54 = vmul.f32 %v3143_v35, %v1405_v61  ;;  %v1412_v8 = vmul.f32 %v3145_v53, %v1370_v38  ;;  %vm1418_vm9 = vweird.f32 %v3145_v53 }
 0x914   :  { %vm1419_vm11 = vmor %vm1417_vm10, %vm1418_vm9 }
 0x915   :  { %v1410_v32 = vsel %vm1409_vm15, %v3143_v35, %v1406_v54  ;;  %v1413_v43 = vmul.f32 %v3145_v53, %v1412_v8 }
 0x916   :  { %v1424_v49 = vmul.f32 %v1410_v32, %v4133_v48 }
 0x917   :  { %v1414_v36 = vmul.f32 0.5, %v1413_v43 }
 0x918   :  { %v1430_v39 = vmul.f32 %v4159_v41, %v1424_v49 }
 0x919   :  { %v1415_v52 = vsub.f32 1.5, %v1414_v36 }
 0x91a   :  { %v4190_v45 = vadd.f32 %v4162_v31, %v1430_v39 }
 0x91b   :  { %v1416_v1 = vmul.f32 %v3145_v53, %v1415_v52 }
 0x91c   :  { %2845 = vmatmul.msk.f32.gmra.mxu0 %vm126_vm1, %v4190_v45 }
 0x91d   :  { %v1420_v57 = vsel %vm1419_vm11, %v3145_v53, %v1416_v1 }
 0x91e   :  { %v1425_v34 = vmul.f32 %v1420_v57, %v4139_v20 }
 0x920   :  { %v1431_v19 = vmul.f32 %v4159_v41, %v1425_v34 }
 0x922   :  { %v4197_v48 = vadd.f32 %v4162_v31, %v1431_v19 }
 0x924   :  { %2846 = vmatmul.msk.f32.gmra.mxu0 %vm126_vm1, %v4197_v48 }
 0x946   :  { %v1479_v11 = vpop.f32.mrf.mxu0 }
 0x947   :  { %v4204_v22 = vadd.f32 %v3039_v50, %v1479_v11 }
 0x94e   :  { %v1482_v60 = vpop.f32.mrf.mxu0 }
 0x94f   :  { %v4224_v41 = vadd.f32 %v3039_v50, %v1482_v60 }
 0x971   :  { %v1485_v25 = vpop.f32.mrf.mxu0 }
 0x972   :  { %v4206_v37 = vadd.f32 %v3039_v50, %v1485_v25 }
 0x974   :  { %1503 = vrot.lane.b32.xlu1 %v4206_v37, %s3273_s24 }
 0x999   :  { %v1488_v20 = vpop.f32.mrf.mxu0 }
 0x99a   :  { %v4210_v21 = vadd.f32 %v3039_v50, %v1488_v20 }
 0x99c   :  { %1525 = vrot.lane.b32.xlu1 %v4210_v21, %s3274_s1  ;;  %1505 = vrot.lane.b32.xlu0 %v4210_v21, %s3273_s24 }
 0x9a1   :  { %v1491_v42 = vpop.f32.mrf.mxu0 }
 0x9a2   :  { %v4216_v59 = vadd.f32 %v3039_v50, %v1491_v42 }
 0x9a4   :  { %1507 = vrot.lane.b32.xlu2 %v4216_v59, %s3273_s24  ;;  %1527 = vrot.lane.b32.xlu1 %v4216_v59, %s3274_s1 }
 0x9a5   :  { %1515 = vrot.lane.b32.xlu0 %v4210_v21, %s3275_s25 }
 0x9ac   :  { %1501 = vrot.lane.b32.xlu2 %v4224_v41, %s3273_s24  ;;  %1511 = vrot.lane.b32.xlu1 %v4224_v41, %s3275_s25 }
 0x9ad   :  { %1517 = vrot.lane.b32.xlu0 %v4216_v59, %s3275_s25 }
 0x9b4   :  { %1499 = vrot.lane.b32.xlu2 %v4204_v22, %s3273_s24  ;;  %1519 = vrot.lane.b32.xlu1 %v4204_v22, %s3274_s1 }
 0x9b5   :  { %1523 = vrot.lane.b32.xlu0 %v4206_v37, %s3274_s1 }
 0x9bc   :  { %1513 = vrot.lane.b32.xlu2 %v4206_v37, %s3275_s25 }
 0x9bd   :  { %1509 = vrot.lane.b32.xlu0 %v4204_v22, %s3275_s25 }
 0x9c4   :  { %1521 = vrot.lane.b32.xlu2 %v4224_v41, %s3274_s1 }
 0x9e6   :  { %v4244_v30 = vpop.permute.xlu1 %1503 }
 0x9e7   :  { %1595 = vrot.lane.b32.xlu1 %v4244_v30, %s3276_s26 }
 0x9fe   :  { %v4248_v63 = vpop.permute.xlu2 %1507 }
 0x9ff   :  { %1599 = vrot.lane.b32.xlu2 %v4248_v63, %s3276_s26 }
 0xa06   :  { %v4252_v29 = vpop.permute.xlu2 %1501 }
 0xa07   :  { %1593 = vrot.lane.b32.xlu2 %v4252_v29, %s3276_s26 }
 0xa0e   :  { %v4256_v31 = vpop.permute.xlu2 %1499  ;;  %v4258_v58 = vpop.permute.xlu1 %1525 }
 0xa0f   :  { %v4260_v44 = vpop.permute.xlu0 %1505  ;;  %1591 = vrot.lane.b32.xlu2 %v4256_v31, %s3276_s26  ;;  %1721 = vrot.lane.b32.xlu1 %v4258_v58, %s3276_s26  ;;  %v3002_v0 = vpack.i.bf16 %v4256_v31, %v4252_v29 }
 0xa10   :  { %1597 = vrot.lane.b32.xlu0 %v4260_v44, %s3276_s26  ;;  %v2997_v17 = vpack.i.bf16 %v4244_v30, %v4260_v44 }
 0xa16   :  { %v4268_v5 = vpop.permute.xlu2 %1513  ;;  %v4270_v10 = vpop.permute.xlu1 %1527 }
 0xa17   :  { %v4272_v13 = vpop.permute.xlu0 %1515  ;;  %1657 = vrot.lane.b32.xlu2 %v4268_v5, %s3276_s26  ;;  %1723 = vrot.lane.b32.xlu1 %v4270_v10, %s3276_s26 }
 0xa18   :  { %1659 = vrot.lane.b32.xlu0 %v4272_v13, %s3276_s26  ;;  %v3007_v47 = vpack.i.bf16 %v4258_v58, %v4272_v13 }
 0xa1e   :  { %v4280_v46 = vpop.permute.xlu2 %1521  ;;  %v4282_v24 = vpop.permute.xlu1 %1511 }
 0xa1f   :  { %v4284_v7 = vpop.permute.xlu0 %1517  ;;  %1717 = vrot.lane.b32.xlu2 %v4280_v46, %s3276_s26  ;;  %1655 = vrot.lane.b32.xlu1 %v4282_v24, %s3276_s26  ;;  %v3017_v6 = vpack.i.bf16 %v4280_v46, %v4282_v24 }
 0xa20   :  { %1661 = vrot.lane.b32.xlu0 %v4284_v7, %s3276_s26 }
 0xa26   :  { %v4292_v51 = vpop.permute.xlu1 %1519 }
 0xa27   :  { %v4294_v27 = vpop.permute.xlu0 %1523  ;;  %1537 = vrot.lane.b32.xlu2 %v4216_v59, %s3276_s26  ;;  %1715 = vrot.lane.b32.xlu1 %v4292_v51, %s3276_s26 }
 0xa28   :  { %1719 = vrot.lane.b32.xlu0 %v4294_v27, %s3276_s26  ;;  %v3012_v23 = vpack.i.bf16 %v4294_v27, %v4268_v5 }
 0xa2f   :  { %v4302_v14 = vpop.permute.xlu0 %1509  ;;  %1531 = vrot.lane.b32.xlu2 %v4224_v41, %s3276_s26  ;;  %1533 = vrot.lane.b32.xlu1 %v4206_v37, %s3276_s26 }
 0xa30   :  { %1653 = vrot.lane.b32.xlu0 %v4302_v14, %s3276_s26 }
 0xa37   :  { %3018 = vrot.lane.b32.xlu2 %v3017_v6, %s3277_s27  ;;  %3003 = vrot.lane.b32.xlu1 %v3002_v0, %s3277_s27  ;;  %v3243_v0 = vld [vmem:[%s4849_s2 + $0x10] sm:$0xff] }
 0xa38   :  { %1535 = vrot.lane.b32.xlu0 %v4210_v21, %s3276_s26 }
 0xa3f   :  { %2068 = vrot.lane.b32.xlu2 %v4248_v63, %s3277_s27  ;;  %3008 = vrot.lane.b32.xlu1 %v3007_v47, %s3277_s27 }
 0xa40   :  { %1529 = vrot.lane.b32.xlu0 %v4204_v22, %s3276_s26 }
 0xa47   :  { %2131 = vrot.lane.b32.xlu1 %v4284_v7, %s3277_s27 }
 0xa48   :  { %2998 = vrot.lane.b32.xlu0 %v2997_v17, %s3277_s27 }
 0xa4f   :  { %2194 = vrot.lane.b32.xlu1 %v4270_v10, %s3277_s27 }
 0xa50   :  { %3013 = vrot.lane.b32.xlu0 %v3012_v23, %s3277_s27 }
 0xa59   :  { %v1600_v18 = vpop.permute.xlu2 %1599  ;;  %v1596_v16 = vpop.permute.xlu1 %1595 }
 0xa5a   :  { %2857 = vmatpush.xpose.msk.msrb.mxu3 %vm219_vm2, %v1600_v18 }
 0xa61   :  { %v1594_v56 = vpop.permute.xlu2 %1593 }
 0xa69   :  { %v1592_v26 = vpop.permute.xlu2 %1591 }
 0xa71   :  { %v1658_v62 = vpop.permute.xlu2 %1657 }
 0xa79   :  { %v1718_v9 = vpop.permute.xlu2 %1717 }
 0xa81   :  { %v1538_v15 = vpop.permute.xlu2 %1537  ;;  %v1722_v3 = vpop.permute.xlu1 %1721 }
 0xa82   :  { %v1598_v35 = vpop.permute.xlu0 %1597  ;;  %2847 = vmatpush.xpose.msk.msra.mxu2 %vm219_vm2, %v1538_v15 }
 0xa83   :  { %2858 = vmatpush.xpose.msk.msrb.mxu3 %vm219_vm2, %v1598_v35 }
 0xa87   :  { %2859 = vmatpush.xpose.msk.msrb.mxu3 %vm219_vm2, %v1596_v16 }
 0xa89   :  { %v1532_v38 = vpop.permute.xlu2 %1531  ;;  %v1724_v12 = vpop.permute.xlu1 %1723 }
 0xa8a   :  { %v1660_v33 = vpop.permute.xlu0 %1659  ;;  %2877 = vmatpush.xpose.msk.msra.mxu0 %vm219_vm2, %v1724_v12 }
 0xa8b   :  { %2860 = vmatpush.xpose.msk.msrb.mxu3 %vm219_vm2, %v1594_v56  ;;  %v3244_v56 = vld [vmem:[%s4849_s2] sm:$0xff] }
 0xa8e   :  { %2878 = vmatpush.xpose.msk.msra.mxu0 %vm219_vm2, %v1722_v3 }
 0xa8f   :  { %2861 = vmatpush.xpose.msk.msrb.mxu3 %vm219_vm2, %v1592_v26 }
 0xa91   :  { %v4343_v40 = vpop.permute.xlu2 %3018  ;;  %v1656_v61 = vpop.permute.xlu1 %1655 }
 0xa92   :  { %2862 = vmatmul.msk.f32.vlgmr.msrb.gmra.mxu3 %vm219_vm2, %v4256_v31  ;;  %v1662_v53 = vpop.permute.xlu0 %1661 }
 0xa93   :  { %2867 = vmatpush.xpose.msk.msra.mxu1 %vm219_vm2, %v1662_v53 }
 0xa97   :  { %2868 = vmatpush.xpose.msk.msra.mxu1 %vm219_vm2, %v1660_v33 }
 0xa99   :  { %v2069_v54 = vpop.permute.xlu2 %2068  ;;  %v1716_v8 = vpop.permute.xlu1 %1715 }
 0xa9a   :  { %2863 = vmatmul.msk.f32.gmra.mxu3 %vm219_vm2, %v4252_v29  ;;  %v1720_v32 = vpop.permute.xlu0 %1719  ;;  %v3020_v29 = vunpack.i.l.bf16 %v4343_v40 }
 0xa9b   :  { %2869 = vmatpush.xpose.msk.msra.mxu1 %vm219_vm2, %v1658_v62  ;;  %2879 = vmatpush.xpose.msk.msra.mxu0 %vm219_vm2, %v1720_v32 }
 0xa9c   :  { %2893 = vmatpush.msk.msra.mxu3 %vm709_vm3, %v2069_v54 }
 0xa9f   :  { %2870 = vmatpush.xpose.msk.msra.mxu1 %vm219_vm2, %v1656_v61  ;;  %2880 = vmatpush.xpose.msk.msra.mxu0 %vm219_vm2, %v1718_v9 }
 0xaa1   :  { %v1534_v43 = vpop.permute.xlu1 %1533 }
 0xaa2   :  { %2864 = vmatmul.msk.f32.gmra.mxu3 %vm219_vm2, %v4244_v30  ;;  %v1654_v49 = vpop.permute.xlu0 %1653 }
 0xaa3   :  { %2871 = vmatpush.xpose.msk.msra.mxu1 %vm219_vm2, %v1654_v49  ;;  %2881 = vmatpush.xpose.msk.msra.mxu0 %vm219_vm2, %v1716_v8 }
 0xaa6   :  { %2872 = vmatmul.msk.f32.vlgmr.msra.gmra.mxu1 %vm219_vm2, %v4302_v14  ;;  %2882 = vmatmul.msk.f32.vlgmr.msra.gmra.mxu0 %vm219_vm2, %v4292_v51 }
 0xaa9   :  { %v3004_v36 = vpop.permute.xlu1 %3003 }
 0xaaa   :  { %2865 = vmatmul.msk.f32.gmra.mxu3 %vm219_vm2, %v4260_v44  ;;  %v1536_v39 = vpop.permute.xlu0 %1535  ;;  %v3005_v60 = vunpack.i.l.bf16 %v3004_v36  ;;  %v3006_v25 = vunpack.i.h.bf16 %v3004_v36 }
 0xaab   :  { %2848 = vmatpush.xpose.msk.msra.mxu2 %vm219_vm2, %v1536_v39 }
 0xaae   :  { %2873 = vmatmul.msk.f32.gmra.mxu1 %vm219_vm2, %v4282_v24  ;;  %2883 = vmatmul.msk.f32.gmra.mxu0 %vm219_vm2, %v4280_v46 }
 0xaaf   :  { %2849 = vmatpush.xpose.msk.msra.mxu2 %vm219_vm2, %v1534_v43 }
 0xab1   :  { %v3009_v52 = vpop.permute.xlu1 %3008 }
 0xab2   :  { %2866 = vmatmul.msk.f32.gmra.mxu3 %vm219_vm2, %v4248_v63  ;;  %v1530_v1 = vpop.permute.xlu0 %1529  ;;  %v3010_v34 = vunpack.i.l.bf16 %v3009_v52  ;;  %v3011_v42 = vunpack.i.h.bf16 %v3009_v52 }
 0xab3   :  { %2850 = vmatpush.xpose.msk.msra.mxu2 %vm219_vm2, %v1532_v38 }
 0xab6   :  { %2874 = vmatmul.msk.f32.gmra.mxu1 %vm219_vm2, %v4268_v5  ;;  %2884 = vmatmul.msk.f32.gmra.mxu0 %vm219_vm2, %v4294_v27 }
 0xab7   :  { %2851 = vmatpush.xpose.msk.msra.mxu2 %vm219_vm2, %v1530_v1 }
 0xab9   :  { %v2132_v57 = vpop.permute.xlu1 %2131 }
 0xaba   :  { %2852 = vmatmul.msk.f32.vlgmr.msra.gmra.mxu2 %vm219_vm2, %v4204_v22  ;;  %v2999_v19 = vpop.permute.xlu0 %2998  ;;  %2899 = vmatpush.msk.msrb.mxu1 %vm709_vm3, %v2132_v57 }
 0xabb   :  { %v3000_v50 = vunpack.i.l.bf16 %v2999_v19  ;;  %v3001_v11 = vunpack.i.h.bf16 %v2999_v19 }
 0xabc   :  { %2166 = vmatpush.msrb.mxu1 %v3010_v34 }
 0xabd   :  { %2103 = vmatpush.msra.mxu3 %v3000_v50 }
 0xabe   :  { %2875 = vmatmul.msk.f32.gmra.mxu1 %vm219_vm2, %v4272_v13  ;;  %2885 = vmatmul.msk.f32.gmra.mxu0 %vm219_vm2, %v4258_v58  ;;  %v3021_v58 = vunpack.i.h.bf16 %v4343_v40 }
 0xabf   :  { %2104 = vmatpush.msra.mxu3 %v3001_v11 }
 0xac1   :  { %2105 = vmatpush.msra.mxu3 %v3005_v60  ;;  %v2195_v20 = vpop.permute.xlu1 %2194 }
 0xac2   :  { %2853 = vmatmul.msk.f32.gmra.mxu2 %vm219_vm2, %v4224_v41  ;;  %v3014_v30 = vpop.permute.xlu0 %3013  ;;  %2905 = vmatpush.msk.msrb.mxu0 %vm709_vm3, %v2195_v20 }
 0xac3   :  { %v3015_v63 = vunpack.i.l.bf16 %v3014_v30  ;;  %2106 = vmatpush.msra.mxu3 %v3006_v25  ;;  %v3016_v31 = vunpack.i.h.bf16 %v3014_v30 }
 0xac4   :  { %2229 = vmatpush.msrb.mxu0 %v3011_v42 }
 0xac5   :  { %2167 = vmatpush.msrb.mxu1 %v3015_v63 }
 0xac6   :  { %2876 = vmatmul.msk.f32.gmra.mxu1 %vm219_vm2, %v4284_v7  ;;  %2886 = vmatmul.msk.f32.gmra.mxu0 %vm219_vm2, %v4270_v10  ;;  %v3242_v10 = vld [vmem:[%s4849_s2 + $0x8] sm:$0xff] }
 0xac7   :  { %2168 = vmatpush.msrb.mxu1 %v3020_v29  ;;  %2230 = vmatpush.msrb.mxu0 %v3016_v31 }
 0xac9   :  { %2231 = vmatpush.msrb.mxu0 %v3021_v58 }
 0xaca   :  { %2854 = vmatmul.msk.f32.gmra.mxu2 %vm219_vm2, %v4206_v37 }
 0xad2   :  { %2855 = vmatmul.msk.f32.gmra.mxu2 %vm219_vm2, %v4210_v21 }
 0xada   :  { %2856 = vmatmul.msk.f32.gmra.mxu2 %vm219_vm2, %v4216_v59 }
 0xb15   :  { %v1638_v44 = vpop.f32.mrf.mxu3 }
 0xb16   :  { %v1639_v8 = vadd.f32 %v3244_v56, %v1638_v44 }
 0xb18   :  { %v1792_v49 = vsel %vm458_vm4, %v1639_v8, -inf }
 0xb1d   :  { %v1641_v5 = vpop.f32.mrf.mxu3 }
 0xb1e   :  { %v4405_v13 = vadd.f32 %v3242_v10, %v1641_v5 }
 0xb20   :  { %v1795_v46 = vsel %vm458_vm4, %v4405_v13, -inf }
 0xb21   :  { %1796 = vmax.xlane.f32.xlu0 %v1795_v46 }
 0xb23   :  { %v1762_v24 = vpop.f32.mrf.mxu0  ;;  %v1700_v9 = vpop.f32.mrf.mxu1 }
 0xb24   :  { %v1701_v15 = vadd.f32 %v3244_v56, %v1700_v9  ;;  %v1763_v33 = vadd.f32 %v3244_v56, %v1762_v24 }
 0xb25   :  { %v1644_v17 = vpop.f32.mrf.mxu3 }
 0xb26   :  { %v4416_v23 = vadd.f32 %v3243_v0, %v1644_v17  ;;  %v1807_v12 = vsel %vm458_vm4, %v1701_v15, -inf  ;;  %v1822_v54 = vsel %vm458_vm4, %v1763_v33, -inf }
 0xb28   :  { %v1798_v62 = vsel %vm458_vm4, %v4416_v23, -inf }
 0xb2b   :  { %v1765_v7 = vpop.f32.mrf.mxu0  ;;  %v1703_v43 = vpop.f32.mrf.mxu1 }
 0xb2c   :  { %v1766_v32 = vadd.f32 %v3242_v10, %v1765_v7  ;;  %v1704_v39 = vadd.f32 %v3242_v10, %v1703_v43 }
 0xb2e   :  { %v1825_v36 = vsel %vm458_vm4, %v1766_v32, -inf  ;;  %v1810_v52 = vsel %vm458_vm4, %v1704_v39, -inf }
 0xb33   :  { %v1768_v27 = vpop.f32.mrf.mxu0  ;;  %v1706_v1 = vpop.f32.mrf.mxu1 }
 0xb34   :  { %v4412_v6 = vadd.f32 %v3243_v0, %v1768_v27  ;;  %v1707_v57 = vadd.f32 %v3243_v0, %v1706_v1 }
 0xb36   :  { %v1828_v47 = vsel %vm458_vm4, %v4412_v6, -inf  ;;  %v1813_v34 = vsel %vm458_vm4, %v1707_v57, -inf }
 0xb37   :  { %1829 = vmax.xlane.f32.xlu0 %v1828_v47 }
 0xb3d   :  { %v1576_v18 = vpop.f32.mrf.mxu2 }
 0xb3e   :  { %v4421_v26 = vadd.f32 %v3244_v56, %v1576_v18 }
 0xb3f   :  { %1799 = vmax.xlane.f32.xlu0 %v1798_v62 }
 0xb40   :  { %v1777_v16 = vsel %vm458_vm4, %v4421_v26, -inf }
 0xb41   :  { %1778 = vmax.xlane.f32.xlu2 %v1777_v16 }
 0xb45   :  { %v1579_v3 = vpop.f32.mrf.mxu2 }
 0xb46   :  { %v4427_v35 = vadd.f32 %v3242_v10, %v1579_v3 }
 0xb48   :  { %v1780_v38 = vsel %vm458_vm4, %v4427_v35, -inf }
 0xb49   :  { %1781 = vmax.xlane.f32.xlu1 %v1780_v38  ;;  %1808 = vmax.xlane.f32.xlu2 %v1807_v12 }
 0xb4d   :  { %v1582_v40 = vpop.f32.mrf.mxu2 }
 0xb4e   :  { %v4432_v61 = vadd.f32 %v3243_v0, %v1582_v40 }
 0xb50   :  { %v1783_v53 = vsel %vm458_vm4, %v4432_v61, -inf }
 0xb51   :  { %1784 = vmax.xlane.f32.xlu1 %v1783_v53  ;;  %1823 = vmax.xlane.f32.xlu2 %v1822_v54  ;;  %v3022_v53 = vpack.i.bf16 %v4292_v51, %v4302_v14  ;;  %v3027_v54 = vpack.i.bf16 %v4206_v37, %v4210_v21 }
 0xb59   :  { %1793 = vmax.xlane.f32.xlu1 %v1792_v49  ;;  %1826 = vmax.xlane.f32.xlu2 %v1825_v36 }
 0xb61   :  { %1811 = vmax.xlane.f32.xlu1 %v1810_v52 }
 0xb69   :  { %1814 = vmax.xlane.f32.xlu1 %v1813_v34  ;;  %v1585_v34 = vpop.f32.mrf.mxu2 }
 0xb94   :  { %v1797_v30 = vpop.xlane.xlu0 %1796 }
 0xbaa   :  { %v1830_v10 = vpop.xlane.xlu0 %1829 }
 0xbab   :  { %v1854_v47 = vsub.f32 %v4412_v6, %v1830_v10 }
 0xbad   :  { %v1891_v18 = vmul.f32 1.442695, %v1854_v47 }
 0xbb4   :  { %v4441_v19 = vpop.xlane.xlu2 %1778 }
 0xbb5   :  { %v1837_v51 = vsub.f32 %v4421_v26, %v4441_v19 }
 0xbb7   :  { %v1857_v52 = vmul.f32 1.442695, %v1837_v51 }
 0xbbc   :  { %v1782_v50 = vpop.xlane.xlu1 %1781  ;;  %v1809_v11 = vpop.xlane.xlu2 %1808 }
 0xbbd   :  { %v1847_v60 = vsub.f32 %v1701_v15, %v1809_v11  ;;  %v1838_v36 = vsub.f32 %v4427_v35, %v1782_v50 }
 0xbbf   :  { %v1877_v25 = vmul.f32 1.442695, %v1847_v60  ;;  %v1859_v21 = vmul.f32 1.442695, %v1838_v36 }
 0xbc1   :  { %3146 = vpow2.f32 %v1877_v25  ;;  %v4506_v25 = vld [vmem:[%s4849_s2 + $0x18] sm:$0xff] }
 0xbc4   :  { %v4443_v20 = vpop.xlane.xlu1 %1784  ;;  %v1824_v42 = vpop.xlane.xlu2 %1823 }
 0xbc5   :  { %v1852_v63 = vsub.f32 %v1763_v33, %v1824_v42  ;;  %v4509_v42 = vadd.f32 %v4506_v25, %v1585_v34 }
 0xbc7   :  { %v1887_v29 = vmul.f32 1.442695, %v1852_v63  ;;  %v4445_v31 = vpop.eup %3146  ;;  %v1588_v63 = vpop.f32.mrf.mxu2 }
 0xbc8   :  { %v1927_v58 = vsel %vm458_vm4, %v4445_v31, 0.0 }
 0xbc9   :  { %3148 = vpow2.f32 %v1887_v29  ;;  %1928 = vadd.xlane.f32.xlu1 %v1927_v58  ;;  %v4516_v29 = vld [vmem:[%s4849_s2 + $0x20] sm:$0x3] }
 0xbca   :  { %v4519_v58 = vadd.f32 %v4516_v29, %v1588_v63 }
 0xbcc   :  { %v1794_v44 = vpop.xlane.xlu1 %1793  ;;  %v1827_v5 = vpop.xlane.xlu2 %1826 }
 0xbcd   :  { %v1842_v46 = vsub.f32 %v1639_v8, %v1794_v44  ;;  %v1853_v24 = vsub.f32 %v1766_v32, %v1827_v5  ;;  %v1843_v8 = vsub.f32 %v4405_v13, %v1797_v30  ;;  %v1786_v30 = vsel %vm458_vm4, %v4509_v42, -inf }
 0xbce   :  { %v1789_v44 = vsel %vm471_vm5, %v4519_v58, -inf  ;;  %v3032_v5 = vpack.i.bf16 %v4204_v22, %v4224_v41 }
 0xbcf   :  { %v1867_v7 = vmul.f32 1.442695, %v1842_v46  ;;  %v1889_v27 = vmul.f32 1.442695, %v1853_v24  ;;  %v4449_v0 = vpop.eup %3148  ;;  %v1869_v32 = vmul.f32 1.442695, %v1843_v8 }
 0xbd0   :  { %v1942_v17 = vsel %vm458_vm4, %v4449_v0, 0.0 }
 0xbd1   :  { %3150 = vpow2.f32 %v1867_v7  ;;  %1943 = vadd.xlane.f32.xlu2 %v1942_v17 }
 0xbd2   :  { %3152 = vpow2.f32 %v1889_v27  ;;  %v1839_v27 = vsub.f32 %v4432_v61, %v4443_v20 }
 0xbd3   :  { %3154 = vpow2.f32 %v1891_v18 }
 0xbd4   :  { %v1812_v56 = vpop.xlane.xlu1 %1811  ;;  %v1861_v18 = vmul.f32 1.442695, %v1839_v27 }
 0xbd5   :  { %v1848_v62 = vsub.f32 %v1704_v39, %v1812_v56 }
 0xbd7   :  { %v4454_v16 = vpop.eup %3150  ;;  %v1879_v9 = vmul.f32 1.442695, %v1848_v62 }
 0xbd8   :  { %v4456_v15 = vpop.eup %3152  ;;  %v1912_v3 = vsel %vm458_vm4, %v4454_v16, 0.0 }
 0xbd9   :  { %3156 = vpow2.f32 %v1879_v9  ;;  %1913 = vadd.xlane.f32.xlu0 %v1912_v3  ;;  %v1945_v6 = vsel %vm458_vm4, %v4456_v15, 0.0  ;;  %v4462_v38 = vpop.eup %3154 }
 0xbda   :  { %1946 = vadd.xlane.f32.xlu2 %v1945_v6  ;;  %v1948_v40 = vsel %vm458_vm4, %v4462_v38, 0.0  ;;  %3158 = vpow2.f32 %v1869_v32 }
 0xbdc   :  { %v1815_v43 = vpop.xlane.xlu1 %1814 }
 0xbdd   :  { %v1849_v49 = vsub.f32 %v1707_v57, %v1815_v43 }
 0xbdf   :  { %v4464_v12 = vpop.eup %3156  ;;  %v1881_v39 = vmul.f32 1.442695, %v1849_v49 }
 0xbe0   :  { %v1930_v33 = vsel %vm458_vm4, %v4464_v12, 0.0  ;;  %v4482_v14 = vpop.eup %3158 }
 0xbe1   :  { %1931 = vadd.xlane.f32.xlu1 %v1930_v33  ;;  %3160 = vpow2.f32 %v1881_v39  ;;  %v1915_v13 = vsel %vm458_vm4, %v4482_v14, 0.0 }
 0xbe2   :  { %1949 = vadd.xlane.f32.xlu2 %v1948_v40  ;;  %3162 = vpow2.f32 %v1859_v21 }
 0xbe3   :  { %3164 = vpow2.f32 %v1857_v52 }
 0xbe7   :  { %v4487_v35 = vpop.eup %3160 }
 0xbe8   :  { %v1933_v26 = vsel %vm458_vm4, %v4487_v35, 0.0  ;;  %v4491_v57 = vpop.eup %3162 }
 0xbe9   :  { %v1900_v19 = vsel %vm458_vm4, %v4491_v57, 0.0 }
 0xbed   :  { %2005 = vrot.lane.b32.xlu0 %v4216_v59, %s3277_s27  ;;  %v1800_v59 = vpop.xlane.xlu0 %1799 }
 0xbee   :  { %v1844_v37 = vsub.f32 %v4416_v23, %v1800_v59  ;;  %v4493_v23 = vpop.eup %3164 }
 0xbef   :  { %v1897_v11 = vsel %vm458_vm4, %v4493_v23, 0.0 }
 0xbf0   :  { %v1871_v1 = vmul.f32 1.442695, %v1844_v37 }
 0xbf2   :  { %3166 = vpow2.f32 %v1871_v1 }
 0xbf8   :  { %v4497_v50 = vpop.eup %3166 }
 0xbf9   :  { %v1918_v60 = vsel %vm458_vm4, %v4497_v50, 0.0 }
 0xbfa   :  { %3028 = vrot.lane.b32.xlu2 %v3027_v54, %s3277_s27  ;;  %3023 = vrot.lane.b32.xlu1 %v3022_v53, %s3277_s27 }
 0xc17   :  { %1916 = vadd.xlane.f32.xlu0 %v1915_v13 }
 0xc1f   :  { %1934 = vadd.xlane.f32.xlu0 %v1933_v26 }
 0xc23   :  { %1901 = vadd.xlane.f32.xlu2 %v1900_v19 }
 0xc24   :  { %1898 = vadd.xlane.f32.xlu1 %v1897_v11 }
 0xc27   :  { %1919 = vadd.xlane.f32.xlu0 %v1918_v60 }
 0xc2c   :  { %1787 = vmax.xlane.f32.xlu1 %v1786_v30 }
 0xc34   :  { %1790 = vmax.xlane.f32.xlu1 %v1789_v44 }
 0xc3b   :  { %3033 = vrot.lane.b32.xlu0 %v3032_v5, %s3277_s27 }
 0xc3c   :  { %v1929_v56 = vpop.xlane.xlu1 %1928 }
 0xc44   :  { %v1944_v10 = vpop.xlane.xlu2 %1943 }
 0xc4c   :  { %v1914_v46 = vpop.xlane.xlu0 %1913 }
 0xc4d   :  { %v1947_v24 = vpop.xlane.xlu2 %1946  ;;  %3168 = vrcp.f32 %v1914_v46 }
 0xc4e   :  { %3170 = vpow2.f32 %v1861_v18  ;;  %v1771_v18 = vpop.f32.mrf.mxu0 }
 0xc4f   :  { %3172 = vrcp.f32 %v1929_v56 }
 0xc50   :  { %3174 = vrcp.f32 %v1944_v10 }
 0xc51   :  { %3176 = vrcp.f32 %v1947_v24 }
 0xc53   :  { %v3169_v7 = vpop.eup %3168 }
 0xc54   :  { %v1982_v47 = vmul.f32 %v3169_v7, %v4454_v16  ;;  %v4531_v9 = vpop.eup %3170  ;;  %v1932_v6 = vpop.xlane.xlu1 %1931 }
 0xc55   :  { %v1950_v17 = vpop.xlane.xlu2 %1949  ;;  %v1903_v61 = vsel %vm458_vm4, %v4531_v9, 0.0  ;;  %v3173_v20 = vpop.eup %3172  ;;  %3178 = vrcp.f32 %v1932_v6 }
 0xc56   :  { %2894 = vmatmul.msk.f32.vlgmr.msra.gmra.mxu3 %vm458_vm4, %v1982_v47  ;;  %v3175_v16 = vpop.eup %3174  ;;  %v1987_v54 = vmul.f32 %v3173_v20, %v4445_v31  ;;  %3180 = vrcp.f32 %v1950_v17  ;;  %v1647_v7 = vpop.f32.mrf.mxu3 }
 0xc57   :  { %v1992_v8 = vmul.f32 %v3175_v16, %v4449_v0  ;;  %v3177_v32 = vpop.eup %3176 }
 0xc58   :  { %v1993_v36 = vmul.f32 %v3177_v32, %v4456_v15 }
 0xc5b   :  { %v3179_v43 = vpop.eup %3178 }
 0xc5c   :  { %v1988_v49 = vmul.f32 %v3179_v43, %v4464_v12  ;;  %v3181_v31 = vpop.eup %3180 }
 0xc5d   :  { %v3029_v62 = vpop.permute.xlu2 %3028  ;;  %v1994_v0 = vmul.f32 %v3181_v31, %v4462_v38 }
 0xc5e   :  { %v3030_v41 = vunpack.i.l.bf16 %v3029_v62  ;;  %v3031_v3 = vunpack.i.h.bf16 %v3029_v62  ;;  %v1650_v27 = vpop.f32.mrf.mxu3 }
 0xc5f   :  { %v2006_v22 = vpop.permute.xlu0 %2005 }
 0xc60   :  { %2887 = vmatpush.msk.msrb.mxu2 %vm709_vm3, %v2006_v22 }
 0xc62   :  { %2040 = vmatpush.msrb.mxu2 %v3030_v41  ;;  %v1774_v41 = vpop.f32.mrf.mxu0 }
 0xc64   :  { %2041 = vmatpush.msrb.mxu2 %v3031_v3 }
 0xc65   :  { %1904 = vadd.xlane.f32.xlu0 %v1903_v61 }
 0xc6c   :  { %v3024_v33 = vpop.permute.xlu1 %3023 }
 0xc6d   :  { %v3026_v40 = vunpack.i.h.bf16 %v3024_v33  ;;  %v3025_v53 = vunpack.i.l.bf16 %v3024_v33 }
 0xc6f   :  { %2169 = vmatpush.msrb.mxu1 %v3025_v53  ;;  %2232 = vmatpush.msrb.mxu0 %v3026_v40  ;;  %v4570_v40 = vadd.f32 %v4516_v29, %v1650_v27 }
 0xc70   :  { %2900 = vmatmul.msk.f32.vlgmr.msrb.gmra.mxu1 %vm458_vm4, %v1987_v54  ;;  %2906 = vmatmul.msk.f32.vlgmr.msrb.gmra.mxu0 %vm458_vm4, %v1992_v8 }
 0xc71   :  { %v1804_v32 = vsel %vm471_vm5, %v4570_v40, -inf }
 0xc78   :  { %2901 = vmatmul.msk.f32.gmra.mxu1 %vm458_vm4, %v1988_v49  ;;  %2907 = vmatmul.msk.f32.gmra.mxu0 %vm458_vm4, %v1993_v36  ;;  %v4577_v49 = vadd.f32 %v4516_v29, %v1774_v41 }
 0xc7a   :  { %v1834_v31 = vsel %vm471_vm5, %v4577_v49, -inf }
 0xc80   :  { %2908 = vmatmul.msk.f32.gmra.mxu0 %vm458_vm4, %v1994_v0 }
 0xc8a   :  { %v1917_v39 = vpop.xlane.xlu0 %1916 }
 0xc8b   :  { %3182 = vrcp.f32 %v1917_v39  ;;  %v2914_v39 = vld [vmem:[%s4853_s6 + $0x38] sm:$0xff] }
 0xc91   :  { %v3183_v59 = vpop.eup %3182 }
 0xc92   :  { %v1935_v51 = vpop.xlane.xlu0 %1934  ;;  %v1983_v37 = vmul.f32 %v3183_v59, %v4482_v14  ;;  %v2913_v59 = vld [vmem:[%s4853_s6 + $0x30] sm:$0xff] }
 0xc93   :  { %3184 = vrcp.f32 %v1935_v51  ;;  %v2912_v51 = vld [vmem:[%s4853_s6 + $0x28] sm:$0xff] }
 0xc94   :  { %2895 = vmatmul.msk.f32.gmra.mxu3 %vm458_vm4, %v1983_v37 }
 0xc96   :  { %v1902_v30 = vpop.xlane.xlu2 %1901 }
 0xc97   :  { %v1899_v12 = vpop.xlane.xlu1 %1898 }
 0xc99   :  { %v3185_v15 = vpop.eup %3184 }
 0xc9a   :  { %v1920_v21 = vpop.xlane.xlu0 %1919  ;;  %v1989_v52 = vmul.f32 %v3185_v15, %v4487_v35  ;;  %v2911_v15 = vld [vmem:[%s4853_s6 + $0x20] sm:$0xff] }
 0xc9b   :  { %3186 = vrcp.f32 %v1920_v21 }
 0xc9c   :  { %2902 = vmatmul.msk.f32.gmra.mxu1 %vm458_vm4, %v1989_v52 }
 0xc9f   :  { %v1788_v38 = vpop.xlane.xlu1 %1787 }
 0xca0   :  { %v1840_v13 = vsub.f32 %v4509_v42, %v1788_v38  ;;  %v1648_v38 = vadd.f32 %v4506_v25, %v1647_v7 }
 0xca1   :  { %v3187_v1 = vpop.eup %3186 }
 0xca2   :  { %v1863_v26 = vmul.f32 1.442695, %v1840_v13  ;;  %v1984_v34 = vmul.f32 %v3187_v1, %v4497_v50  ;;  %v1801_v13 = vsel %vm458_vm4, %v1648_v38, -inf  ;;  %v4607_v1 = vadd.f32 %v4506_v25, %v1771_v18 }
 0xca4   :  { %3188 = vpow2.f32 %v1863_v26  ;;  %2896 = vmatmul.msk.f32.gmra.mxu3 %vm458_vm4, %v1984_v34  ;;  %v1831_v26 = vsel %vm458_vm4, %v4607_v1, -inf }
 0xca5   :  { %3190 = vrcp.f32 %v1899_v12 }
 0xca7   :  { %v1791_v14 = vpop.xlane.xlu1 %1790 }
 0xca8   :  { %v1841_v19 = vsub.f32 %v4519_v58, %v1791_v14 }
 0xcaa   :  { %v3189_v11 = vpop.eup %3188  ;;  %v1865_v60 = vmul.f32 1.442695, %v1841_v19 }
 0xcab   :  { %v1906_v35 = vsel %vm458_vm4, %v3189_v11, 0.0  ;;  %v3191_v42 = vpop.eup %3190 }
 0xcac   :  { %3192 = vpow2.f32 %v1865_v60  ;;  %1907 = vadd.xlane.f32.xlu1 %v1906_v35  ;;  %v1977_v50 = vmul.f32 %v3191_v42, %v4493_v23  ;;  %v1709_v23 = vpop.f32.mrf.mxu1 }
 0xcad   :  { %v3034_v63 = vpop.permute.xlu0 %3033  ;;  %3194 = vrcp.f32 %v1902_v30  ;;  %v4592_v37 = vadd.f32 %v4506_v25, %v1709_v23 }
 0xcae   :  { %v3035_v44 = vunpack.i.l.bf16 %v3034_v63  ;;  %v3036_v5 = vunpack.i.h.bf16 %v3034_v63 }
 0xcaf   :  { %v1816_v12 = vsel %vm458_vm4, %v4592_v37, -inf }
 0xcb0   :  { %2042 = vmatpush.msrb.mxu2 %v3035_v44 }
 0xcb2   :  { %v3193_v10 = vpop.eup %3192  ;;  %2043 = vmatpush.msrb.mxu2 %v3036_v5 }
 0xcb3   :  { %2888 = vmatmul.msk.f32.vlgmr.msrb.gmra.mxu2 %vm458_vm4, %v1977_v50  ;;  %v1909_v58 = vsel %vm471_vm5, %v3193_v10, 0.0  ;;  %v3195_v46 = vpop.eup %3194 }
 0xcb4   :  { %1910 = vadd.xlane.f32.xlu1 %v1909_v58  ;;  %v1978_v24 = vmul.f32 %v3195_v46, %v4491_v57  ;;  %v1712_v22 = vpop.f32.mrf.mxu1  ;;  %2357 = vmatpush.msra.mxu2 %v2914_v39 }
 0xcb5   :  { %v4600_v21 = vadd.f32 %v4516_v29, %v1712_v22 }
 0xcb6   :  { %2358 = vmatpush.msra.mxu2 %v2913_v59 }
 0xcb7   :  { %v1819_v52 = vsel %vm471_vm5, %v4600_v21, -inf }
 0xcb8   :  { %2359 = vmatpush.msra.mxu2 %v2912_v51 }
 0xcba   :  { %2360 = vmatpush.msra.mxu2 %v2911_v15 }
 0xcbb   :  { %2889 = vmatmul.msk.f32.gmra.mxu2 %vm458_vm4, %v1978_v24 }
 0xcd8   :  { %v1905_v47 = vpop.xlane.xlu0 %1904 }
 0xcd9   :  { %3196 = vrcp.f32 %v1905_v47  ;;  %v2108_v17 = vpop.f32.mrf.mxu3 }
 0xcda   :  { %2254 = vrot.lane.b32.xlu2 %v2108_v17, %s3280_s22 }
 0xcdf   :  { %v3197_v56 = vpop.eup %3196 }
 0xce0   :  { %v1979_v62 = vmul.f32 %v3197_v56, %v4531_v9 }
 0xce2   :  { %2890 = vmatmul.msk.f32.gmra.mxu2 %vm458_vm4, %v1979_v62 }
 0xced   :  { %v2171_v3 = vpop.f32.mrf.mxu1  ;;  %v2234_v57 = vpop.f32.mrf.mxu0 }
 0xcee   :  { %2294 = vrot.lane.b32.xlu1 %v2234_v57, %s3279_s21  ;;  %2274 = vrot.lane.b32.xlu0 %v2171_v3, %s3278_s20 }
 0xcf5   :  { %v2174_v6 = vpop.f32.mrf.mxu1  ;;  %v2237_v61 = vpop.f32.mrf.mxu0 }
 0xcf6   :  { %2296 = vrot.lane.b32.xlu1 %v2237_v61, %s3279_s21  ;;  %2276 = vrot.lane.b32.xlu2 %v2174_v6, %s3278_s20 }
 0xcfd   :  { %v2240_v20 = vpop.f32.mrf.mxu0 }
 0xcfe   :  { %2298 = vrot.lane.b32.xlu1 %v2240_v20, %s3279_s21 }
 0xd17   :  { %v2111_v9 = vpop.f32.mrf.mxu3 }
 0xd18   :  { %2256 = vrot.lane.b32.xlu0 %v2111_v9, %s3280_s22 }
 0xd19   :  { %v2177_v16 = vpop.f32.mrf.mxu1 }
 0xd1a   :  { %2278 = vrot.lane.b32.xlu2 %v2177_v16, %s3278_s20 }
 0xd1f   :  { %v1908_v33 = vpop.xlane.xlu1 %1907 }
 0xd20   :  { %3198 = vrcp.f32 %v1908_v33 }
 0xd26   :  { %v3199_v53 = vpop.eup %3198 }
 0xd27   :  { %v1911_v54 = vpop.xlane.xlu1 %1910  ;;  %v2114_v8 = vpop.f32.mrf.mxu3  ;;  %v1980_v43 = vmul.f32 %v3199_v53, %v3189_v11  ;;  %v4636_v53 = vld [vmem:[%s4854_s7 + $0x8] sm:$0x3f] }
 0xd28   :  { %3200 = vrcp.f32 %v1911_v54  ;;  %1805 = vmax.xlane.f32.xlu1 %v1804_v32  ;;  %2258 = vrot.lane.b32.xlu0 %v2114_v8, %s3280_s22  ;;  %v4641_v8 = vperm.slane %v4636_v53, 0 }
 0xd29   :  { %2891 = vmatmul.msk.f32.gmra.mxu2 %vm458_vm4, %v1980_v43 }
 0xd2e   :  { %v3201_v36 = vpop.eup %3200 }
 0xd2f   :  { %v1981_v0 = vmul.f32 %v3201_v36, %v3193_v10 }
 0xd30   :  { %1835 = vmax.xlane.f32.xlu1 %v1834_v31 }
 0xd31   :  { %2892 = vmatmul.msk.f32.gmra.mxu2 %vm458_vm4, %v1981_v0 }
 0xd34   :  { %v2255_v14 = vpop.permute.xlu2 %2254 }
 0xd36   :  { %v2045_v34 = vpop.f32.mrf.mxu2 }
 0xd37   :  { %v2309_v29 = vsel %vm219_vm2, %v2045_v34, %v2255_v14 }
 0xd3e   :  { %v2048_v30 = vpop.f32.mrf.mxu2 }
 0xd43   :  { %1817 = vmax.xlane.f32.xlu2 %v1816_v12 }
 0xd4b   :  { %1820 = vmax.xlane.f32.xlu2 %v1819_v52 }
 0xd50   :  { %v2277_v25 = vpop.permute.xlu2 %2276 }
 0xd52   :  { %1802 = vmax.xlane.f32.xlu0 %v1801_v13 }
 0xd5a   :  { %1832 = vmax.xlane.f32.xlu0 %v1831_v26 }
 0xd60   :  { %v2295_v19 = vpop.permute.xlu1 %2294  ;;  %v2275_v11 = vpop.permute.xlu0 %2274 }
 0xd61   :  { %v2314_v60 = vsel %vm998_vm6, %v2309_v29, %v2275_v11 }
 0xd62   :  { %v2319_v35 = vsel %vm1004_vm7, %v2314_v60, %v2295_v19 }
 0xd63   :  { %2915 = vmatmul.msk.f32.vlgmr.msra.gmra.mxu2 %vm126_vm1, %v2319_v35 }
 0xd65   :  { %v2051_v10 = vpop.f32.mrf.mxu2 }
 0xd68   :  { %v2297_v44 = vpop.permute.xlu1 %2296 }
 0xd70   :  { %v2299_v7 = vpop.permute.xlu1 %2298 }
 0xd74   :  { %v2279_v46 = vpop.permute.xlu2 %2278 }
 0xd8a   :  { %v2257_v63 = vpop.permute.xlu0 %2256 }
 0xd8b   :  { %v2310_v42 = vsel %vm219_vm2, %v2048_v30, %v2257_v63 }
 0xd8c   :  { %v2315_v5 = vsel %vm998_vm6, %v2310_v42, %v2277_v25 }
 0xd8d   :  { %v2320_v50 = vsel %vm1004_vm7, %v2315_v5, %v2297_v44 }
 0xd8e   :  { %2916 = vmatmul.msk.f32.gmra.mxu2 %vm126_vm1, %v2320_v50 }
 0xd9a   :  { %v2259_v58 = vpop.permute.xlu0 %2258 }
 0xd9b   :  { %v2311_v24 = vsel %vm219_vm2, %v2051_v10, %v2259_v58  ;;  %v1806_v17 = vpop.xlane.xlu1 %1805 }
 0xd9c   :  { %v2316_v27 = vsel %vm998_vm6, %v2311_v24, %v2279_v46  ;;  %v1846_v56 = vsub.f32 %v4570_v40, %v1806_v17 }
 0xd9d   :  { %v2321_v47 = vsel %vm1004_vm7, %v2316_v27, %v2299_v7 }
 0xd9e   :  { %2917 = vmatmul.msk.f32.gmra.mxu2 %vm126_vm1, %v2321_v47  ;;  %v1875_v22 = vmul.f32 1.442695, %v1846_v56 }
 0xda3   :  { %v1836_v41 = vpop.xlane.xlu1 %1835 }
 0xda4   :  { %v1856_v57 = vsub.f32 %v4577_v49, %v1836_v41 }
 0xda6   :  { %v1895_v61 = vmul.f32 1.442695, %v1856_v57 }
 0xdac   :  { %v4626_v20 = vpop.f32.mrf.mxu2 }
 0xdb4   :  { %v4631_v40 = vpop.f32.mrf.mxu2 }
 0xdb6   :  { %v1818_v31 = vpop.xlane.xlu2 %1817 }
 0xdb7   :  { %v1850_v0 = vsub.f32 %v4592_v37, %v1818_v31  ;;  %v2923_v31 = vld [vmem:[%s4855_s8 + $0x38] sm:$0xff] }
 0xdb8   :  { %2538 = vmatpush.msrb.mxu3 %v2923_v31  ;;  %v2930_v31 = vld [vmem:[%s4857_s10 + $0x48] sm:$0xff] }
 0xdb9   :  { %v1883_v39 = vmul.f32 1.442695, %v1850_v0 }
 0xdbe   :  { %v1821_v51 = vpop.xlane.xlu2 %1820 }
 0xdbf   :  { %v1851_v52 = vsub.f32 %v4600_v21, %v1821_v51 }
 0xdc5   :  { %v1803_v23 = vpop.xlane.xlu0 %1802 }
 0xdc6   :  { %v1845_v18 = vsub.f32 %v1648_v38, %v1803_v23 }
 0xdc8   :  { %v1873_v62 = vmul.f32 1.442695, %v1845_v18 }
 0xdca   :  { %3202 = vpow2.f32 %v1873_v62 }
 0xdcb   :  { %3204 = vpow2.f32 %v1875_v22 }
 0xdcc   :  { %3206 = vpow2.f32 %v1895_v61 }
 0xdcd   :  { %3208 = vpow2.f32 %v1883_v39  ;;  %v1833_v13 = vpop.xlane.xlu0 %1832  ;;  %v2922_v39 = vld [vmem:[%s4855_s8 + $0x30] sm:$0xff] }
 0xdce   :  { %v1855_v34 = vsub.f32 %v4607_v1, %v1833_v13  ;;  %2539 = vmatpush.msrb.mxu3 %v2922_v39  ;;  %v4755_v39 = vld [vmem:[%s4856_s9 + $0x1] ss:$0 sm:$0xff] }
 0xdd0   :  { %v3203_v3 = vpop.eup %3202  ;;  %v1893_v14 = vmul.f32 1.442695, %v1855_v34 }
 0xdd1   :  { %v1921_v6 = vsel %vm458_vm4, %v3203_v3, 0.0  ;;  %v3205_v9 = vpop.eup %3204 }
 0xdd2   :  { %1922 = vadd.xlane.f32.xlu1 %v1921_v6  ;;  %v1924_v16 = vsel %vm471_vm5, %v3205_v9, 0.0  ;;  %v4629_v33 = vpop.eup %3206 }
 0xdd3   :  { %v1954_v54 = vsel %vm471_vm5, %v4629_v33, 0.0  ;;  %v3209_v26 = vpop.eup %3208 }
 0xdd4   :  { %v1936_v37 = vsel %vm458_vm4, %v3209_v26, 0.0 }
 0xdda   :  { %1925 = vadd.xlane.f32.xlu1 %v1924_v16 }
 0xde2   :  { %1955 = vadd.xlane.f32.xlu1 %v1954_v54 }
 0xde6   :  { %v2362_v32 = vpop.f32.mrf.mxu2 }
 0xde7   :  { %v2363_v43 = vadd.f32 %v2362_v32, %v4641_v8 }
 0xde9   :  { %v2377_v49 = vadd.f32 %v2363_v43, %v4166_v2  ;;  %v1885_v2 = vmul.f32 1.442695, %v1851_v52 }
 0xdeb   :  { %v2382_v36 = vsel %vm126_vm1, %v2377_v49, 0.0  ;;  %3210 = vpow2.f32 %v1885_v2 }
 0xdec   :  { %2383 = vadd.xlane.f32.xlu0 %v2382_v36  ;;  %3212 = vpow2.f32 %v1893_v14  ;;  %v4699_v14 = vperm.slane %v4636_v53, 1 }
 0xe11   :  { %v2365_v59 = vpop.f32.mrf.mxu2 }
 0xe12   :  { %v2366_v12 = vadd.f32 %v2365_v59, %v4641_v8  ;;  %v2921_v59 = vld [vmem:[%s4855_s8 + $0x28] sm:$0xff] }
 0xe13   :  { %2540 = vmatpush.msrb.mxu3 %v2921_v59 }
 0xe14   :  { %v2378_v15 = vadd.f32 %v2366_v12, %v4173_v4  ;;  %v3211_v4 = vpop.eup %3210 }
 0xe15   :  { %v1939_v21 = vsel %vm471_vm5, %v3211_v4, 0.0  ;;  %v3213_v35 = vpop.eup %3212 }
 0xe16   :  { %v2385_v38 = vsel %vm126_vm1, %v2378_v15, 0.0  ;;  %v1951_v1 = vsel %vm458_vm4, %v3213_v35, 0.0 }
 0xe17   :  { %2386 = vadd.xlane.f32.xlu2 %v2385_v38 }
 0xe1f   :  { %1937 = vadd.xlane.f32.xlu2 %v1936_v37 }
 0xe21   :  { %v2368_v29 = vpop.f32.mrf.mxu2 }
 0xe22   :  { %v2369_v19 = vadd.f32 %v2368_v29, %v4641_v8 }
 0xe24   :  { %v2379_v11 = vadd.f32 %v2369_v19, %v4181_v55  ;;  %v4702_v19 = vperm.slane %v4636_v53, 2 }
 0xe26   :  { %v2388_v60 = vsel %vm126_vm1, %v2379_v11, 0.0 }
 0xe27   :  { %1940 = vadd.xlane.f32.xlu2 %v1939_v21  ;;  %2389 = vadd.xlane.f32.xlu0 %v2388_v60 }
 0xe2f   :  { %1952 = vadd.xlane.f32.xlu0 %v1951_v1 }
 0xe45   :  { %v1923_v30 = vpop.xlane.xlu1 %1922 }
 0xe46   :  { %3214 = vrcp.f32 %v1923_v30 }
 0xe4c   :  { %v3215_v63 = vpop.eup %3214 }
 0xe4d   :  { %v1926_v25 = vpop.xlane.xlu1 %1925  ;;  %v1985_v42 = vmul.f32 %v3215_v63, %v3203_v3 }
 0xe4e   :  { %3216 = vrcp.f32 %v1926_v25 }
 0xe4f   :  { %2897 = vmatmul.msk.f32.gmra.mxu3 %vm458_vm4, %v1985_v42 }
 0xe54   :  { %v3217_v55 = vpop.eup %3216 }
 0xe55   :  { %v1986_v44 = vmul.f32 %v3217_v55, %v3205_v9  ;;  %v1956_v54 = vpop.xlane.xlu1 %1955 }
 0xe57   :  { %2898 = vmatmul.msk.f32.gmra.mxu3 %vm458_vm4, %v1986_v44 }
 0xe5f   :  { %v2384_v5 = vpop.xlane.xlu0 %2383 }
 0xe60   :  { %v2397_v50 = vmul.f32 %v2384_v5, %v3998_v28 }
 0xe62   :  { %v4661_v10 = vsub.f32 %v2377_v49, %v2397_v50 }
 0xe64   :  { %v2407_v58 = vmul.f32 %v4661_v10, %v4661_v10 }
 0xe66   :  { %v2412_v46 = vsel %vm126_vm1, %v2407_v58, 0.0 }
 0xe67   :  { %2413 = vadd.xlane.f32.xlu0 %v2412_v46 }
 0xe8a   :  { %v2387_v24 = vpop.xlane.xlu2 %2386 }
 0xe8b   :  { %v2398_v7 = vmul.f32 %v2387_v24, %v3998_v28 }
 0xe8d   :  { %v4667_v27 = vsub.f32 %v2378_v15, %v2398_v7 }
 0xe8f   :  { %v2408_v47 = vmul.f32 %v4667_v27, %v4667_v27 }
 0xe91   :  { %v2415_v17 = vsel %vm126_vm1, %v2408_v47, 0.0 }
 0xe92   :  { %2416 = vadd.xlane.f32.xlu2 %v2415_v17  ;;  %v1938_v23 = vpop.xlane.xlu2 %1937 }
 0xe93   :  { %3218 = vrcp.f32 %v1938_v23 }
 0xe99   :  { %v3219_v18 = vpop.eup %3218 }
 0xe9a   :  { %v1941_v56 = vpop.xlane.xlu2 %1940  ;;  %v2390_v62 = vpop.xlane.xlu0 %2389  ;;  %v1990_v22 = vmul.f32 %v3219_v18, %v3209_v26 }
 0xe9b   :  { %3220 = vrcp.f32 %v1941_v56  ;;  %v2399_v41 = vmul.f32 %v2390_v62, %v3998_v28 }
 0xe9c   :  { %2903 = vmatmul.msk.f32.gmra.mxu1 %vm458_vm4, %v1990_v22 }
 0xe9d   :  { %v4674_v3 = vsub.f32 %v2379_v11, %v2399_v41 }
 0xe9f   :  { %v2409_v57 = vmul.f32 %v4674_v3, %v4674_v3 }
 0xea1   :  { %v3221_v6 = vpop.eup %3220  ;;  %v2418_v61 = vsel %vm126_vm1, %v2409_v57, 0.0 }
 0xea2   :  { %2419 = vadd.xlane.f32.xlu1 %v2418_v61  ;;  %v1953_v9 = vpop.xlane.xlu0 %1952  ;;  %v1991_v16 = vmul.f32 %v3221_v6, %v3211_v4 }
 0xea3   :  { %3222 = vrcp.f32 %v1953_v9  ;;  %v2936_v9 = vld [vmem:[%s4857_s10 + $0x78] sm:$0xff] }
 0xea4   :  { %2904 = vmatmul.msk.f32.gmra.mxu1 %vm458_vm4, %v1991_v16  ;;  %3224 = vrcp.f32 %v1956_v54  ;;  %v2935_v16 = vld [vmem:[%s4857_s10 + $0x70] sm:$0xff] }
 0xea5   :  { %2596 = vmatpush.msra.mxu1 %v2936_v9 }
 0xea7   :  { %2597 = vmatpush.msra.mxu1 %v2935_v16 }
 0xea9   :  { %v3223_v32 = vpop.eup %3222 }
 0xeaa   :  { %v1995_v43 = vmul.f32 %v3223_v32, %v3213_v35  ;;  %v3225_v49 = vpop.eup %3224  ;;  %v2934_v32 = vld [vmem:[%s4857_s10 + $0x68] sm:$0xff] }
 0xeab   :  { %v1996_v36 = vmul.f32 %v3225_v49, %v4629_v33  ;;  %v2920_v33 = vld [vmem:[%s4855_s8 + $0x20] sm:$0xff]  ;;  %2598 = vmatpush.msra.mxu1 %v2934_v32  ;;  %v2932_v49 = vld [vmem:[%s4857_s10 + $0x58] sm:$0xff] }
 0xeac   :  { %2909 = vmatmul.msk.f32.gmra.mxu0 %vm458_vm4, %v1995_v43  ;;  %2541 = vmatpush.msrb.mxu3 %v2920_v33 }
 0xeb4   :  { %2910 = vmatmul.msk.f32.gmra.mxu0 %vm458_vm4, %v1996_v36  ;;  %v2931_v36 = vld [vmem:[%s4857_s10 + $0x50] sm:$0xff] }
 0xed2   :  { %v2117_v0 = vpop.f32.mrf.mxu3 }
 0xed3   :  { %2260 = vrot.lane.b32.xlu0 %v2117_v0, %s3280_s22  ;;  %v2929_v0 = vld [vmem:[%s4857_s10 + $0x40] sm:$0xff] }
 0xeda   :  { %v2120_v51 = vpop.f32.mrf.mxu3  ;;  %v2414_v12 = vpop.xlane.xlu0 %2413 }
 0xedb   :  { %v2427_v15 = vmul.f32 %v2414_v12, %v3998_v28  ;;  %2262 = vrot.lane.b32.xlu0 %v2120_v51, %s3280_s22 }
 0xedd   :  { %v2432_v52 = vadd.f32 1e-05, %v2427_v15 }
 0xedf   :  { %3226 = vrsqrt.f32 %v2432_v52  ;;  %vm2443_vm4 = vweird.f32 %v2432_v52 }
 0xee5   :  { %v3227_v38 = vpop.eup %3226 }
 0xee6   :  { %v2438_v2 = vmul.f32 %v3227_v38, %v2432_v52  ;;  %vm2444_vm3 = vweird.f32 %v3227_v38 }
 0xee7   :  { %vm2445_vm5 = vmor %vm2443_vm4, %vm2444_vm3 }
 0xee8   :  { %v2439_v13 = vmul.f32 %v3227_v38, %v2438_v2 }
 0xeea   :  { %v2440_v26 = vmul.f32 0.5, %v2439_v13 }
 0xeec   :  { %v2441_v34 = vsub.f32 1.5, %v2440_v26 }
 0xeee   :  { %v2442_v37 = vmul.f32 %v3227_v38, %v2441_v34 }
 0xef0   :  { %v2446_v29 = vsel %vm2445_vm5, %v3227_v38, %v2442_v37 }
 0xef1   :  { %v2487_v4 = vmul.f32 %v2446_v29, %v4661_v10 }
 0xef3   :  { %v2493_v11 = vmul.f32 %v4699_v14, %v2487_v4 }
 0xef5   :  { %v4707_v21 = vadd.f32 %v4702_v19, %v2493_v11 }
 0xef7   :  { %2924 = vmatmul.msk.f32.vlgmr.msrb.gmra.mxu3 %vm126_vm1, %v4707_v21 }
 0xf05   :  { %v2417_v60 = vpop.xlane.xlu2 %2416 }
 0xf06   :  { %v2428_v35 = vmul.f32 %v2417_v60, %v3998_v28 }
 0xf08   :  { %v2433_v1 = vadd.f32 1e-05, %v2428_v35 }
 0xf0a   :  { %3228 = vrsqrt.f32 %v2433_v1  ;;  %vm2453_vm13 = vweird.f32 %v2433_v1 }
 0xf10   :  { %v3229_v30 = vpop.eup %3228 }
 0xf11   :  { %v2448_v63 = vmul.f32 %v3229_v30, %v2433_v1  ;;  %vm2454_vm12 = vweird.f32 %v3229_v30 }
 0xf12   :  { %vm2455_vm14 = vmor %vm2453_vm13, %vm2454_vm12 }
 0xf13   :  { %v2449_v25 = vmul.f32 %v3229_v30, %v2448_v63 }
 0xf15   :  { %v2450_v42 = vmul.f32 0.5, %v2449_v25  ;;  %v2420_v55 = vpop.xlane.xlu1 %2419 }
 0xf16   :  { %v2429_v44 = vmul.f32 %v2420_v55, %v3998_v28 }
 0xf17   :  { %v2451_v5 = vsub.f32 1.5, %v2450_v42 }
 0xf18   :  { %v2434_v50 = vadd.f32 1e-05, %v2429_v44 }
 0xf19   :  { %v2452_v10 = vmul.f32 %v3229_v30, %v2451_v5  ;;  %v2180_v58 = vpop.f32.mrf.mxu1 }
 0xf1a   :  { %3230 = vrsqrt.f32 %v2434_v50  ;;  %2280 = vrot.lane.b32.xlu2 %v2180_v58, %s3278_s20  ;;  %vm2463_vm9 = vweird.f32 %v2434_v50 }
 0xf1b   :  { %v2456_v46 = vsel %vm2455_vm14, %v3229_v30, %v2452_v10 }
 0xf1c   :  { %v2488_v24 = vmul.f32 %v2456_v46, %v4667_v27 }
 0xf1e   :  { %v2494_v7 = vmul.f32 %v4699_v14, %v2488_v24 }
 0xf20   :  { %v3231_v47 = vpop.eup %3230  ;;  %v2500_v17 = vadd.f32 %v4702_v19, %v2494_v7 }
 0xf21   :  { %v2458_v23 = vmul.f32 %v3231_v47, %v2434_v50  ;;  %v2183_v18 = vpop.f32.mrf.mxu1  ;;  %vm2464_vm15 = vweird.f32 %v3231_v47 }
 0xf22   :  { %2282 = vrot.lane.b32.xlu2 %v2183_v18, %s3278_s20  ;;  %2925 = vmatmul.msk.f32.gmra.mxu3 %vm126_vm1, %v2500_v17  ;;  %vm2465_vm10 = vmor %vm2463_vm9, %vm2464_vm15 }
 0xf23   :  { %v2459_v56 = vmul.f32 %v3231_v47, %v2458_v23 }
 0xf25   :  { %v2460_v62 = vmul.f32 0.5, %v2459_v56 }
 0xf27   :  { %v2461_v22 = vsub.f32 1.5, %v2460_v62 }
 0xf29   :  { %v2462_v41 = vmul.f32 %v3231_v47, %v2461_v22  ;;  %v2243_v57 = vpop.f32.mrf.mxu0 }
 0xf2a   :  { %2300 = vrot.lane.b32.xlu1 %v2243_v57, %s3279_s21 }
 0xf2b   :  { %v2466_v27 = vsel %vm2465_vm10, %v3231_v47, %v2462_v41  ;;  %vm2669_vm10 = vcmask 1040384  }
 0xf2c   :  { %v2489_v6 = vmul.f32 %v2466_v27, %v4674_v3  ;;  %v2933_v3 = vld [vmem:[%s4857_s10 + $0x60] sm:$0xff] }
 0xf2d   :  { %2599 = vmatpush.msra.mxu1 %v2933_v3 }
 0xf2e   :  { %v2495_v61 = vmul.f32 %v4699_v14, %v2489_v6 }
 0xf2f   :  { %2600 = vmatpush.msra.mxu1 %v2932_v49 }
 0xf30   :  { %v4729_v54 = vadd.f32 %v4702_v19, %v2495_v61 }
 0xf31   :  { %v2246_v43 = vpop.f32.mrf.mxu0  ;;  %2601 = vmatpush.msra.mxu1 %v2931_v36 }
 0xf32   :  { %2302 = vrot.lane.b32.xlu0 %v2246_v43, %s3279_s21  ;;  %2926 = vmatmul.msk.f32.gmra.mxu3 %vm126_vm1, %v4729_v54 }
 0xf33   :  { %2602 = vmatpush.msra.mxu1 %v2930_v31 }
 0xf35   :  { %2603 = vmatpush.msra.mxu1 %v2929_v0 }
 0xf45   :  { %v2261_v12 = vpop.permute.xlu0 %2260 }
 0xf46   :  { %v2312_v52 = vsel %vm219_vm2, %v4626_v20, %v2261_v12 }
 0xf4d   :  { %v2263_v38 = vpop.permute.xlu0 %2262 }
 0xf4e   :  { %v2313_v37 = vsel %vm219_vm2, %v4631_v40, %v2263_v38  ;;  %v2572_v40 = vperm.slane %v4636_v53, 3 }
 0xf74   :  { %v2281_v15 = vpop.permute.xlu2 %2280 }
 0xf75   :  { %v2317_v2 = vsel %vm998_vm6, %v2312_v52, %v2281_v15 }
 0xf7a   :  { %v2543_v59 = vpop.f32.mrf.mxu3 }
 0xf7b   :  { %v2544_v33 = vadd.f32 %v4755_v39, %v2543_v59 }
 0xf7c   :  { %v2283_v34 = vpop.permute.xlu2 %2282 }
 0xf7d   :  { %v2558_v51 = vmax.f32 %v2544_v33, 0.0  ;;  %v2318_v29 = vsel %vm998_vm6, %v2313_v37, %v2283_v34 }
 0xf7f   :  { %2937 = vmatmul.msk.f32.vlgmr.msra.gmra.mxu1 %vm66_vm0, %v2558_v51 }
 0xf9c   :  { %v2301_v13 = vpop.permute.xlu1 %2300 }
 0xf9d   :  { %v2322_v26 = vsel %vm1004_vm7, %v2317_v2, %v2301_v13 }
 0xf9e   :  { %2918 = vmatmul.msk.f32.gmra.mxu2 %vm126_vm1, %v2322_v26 }
 0xfa4   :  { %v2303_v4 = vpop.permute.xlu0 %2302 }
 0xfa5   :  { %v2323_v11 = vsel %vm1004_vm7, %v2318_v29, %v2303_v4  ;;  %v2546_v60 = vpop.f32.mrf.mxu3 }
 0xfa6   :  { %v2547_v20 = vadd.f32 %v4755_v39, %v2546_v60  ;;  %2919 = vmatmul.msk.f32.gmra.mxu2 %vm126_vm1, %v2323_v11 }
 0xfa8   :  { %v2559_v35 = vmax.f32 %v2547_v20, 0.0 }
 0xfaa   :  { %2938 = vmatmul.msk.f32.gmra.mxu1 %vm66_vm0, %v2559_v35 }
 0xfb5   :  { %v2549_v1 = vpop.f32.mrf.mxu3 }
 0xfb6   :  { %v2550_v30 = vadd.f32 %v4755_v39, %v2549_v1 }
 0xfb8   :  { %v2560_v63 = vmax.f32 %v2550_v30, 0.0 }
 0xfba   :  { %2939 = vmatmul.msk.f32.gmra.mxu1 %vm66_vm0, %v2560_v63 }
 0xffc   :  { %v2605_v25 = vpop.f32.mrf.mxu1 }
 0xffd   :  { %v2606_v42 = vadd.f32 %v2605_v25, %v2572_v40 }
 0xfff   :  { %v2617_v55 = vadd.f32 %v2606_v42, %v4707_v21 }
0x1001   :  { %v2619_v44 = vsel %vm126_vm1, %v2617_v55, 0.0 }
0x1002   :  { %2620 = vadd.xlane.f32.xlu0 %v2619_v44 }
0x1021   :  { %v2371_v5 = vpop.f32.mrf.mxu2 }
0x1022   :  { %v2372_v50 = vadd.f32 %v2371_v5, %v4641_v8 }
0x1024   :  { %v2380_v10 = vadd.f32 %v2372_v50, %v4190_v45 }
0x1026   :  { %v2391_v58 = vsel %vm126_vm1, %v2380_v10, 0.0 }
0x1027   :  { %v2608_v46 = vpop.f32.mrf.mxu1  ;;  %2392 = vadd.xlane.f32.xlu1 %v2391_v58 }
0x1029   :  { %v2374_v24 = vpop.f32.mrf.mxu2 }
0x102a   :  { %v2375_v7 = vadd.f32 %v2374_v24, %v4641_v8 }
0x102c   :  { %v2381_v47 = vadd.f32 %v2375_v7, %v4197_v48 }
0x102e   :  { %v2394_v17 = vsel %vm1079_vm8, %v2381_v47, 0.0 }
0x102f   :  { %2395 = vadd.xlane.f32.xlu2 %v2394_v17 }
0x1037   :  { %v2610_v21 = vpop.f32.mrf.mxu1 }
0x1038   :  { %v2611_v23 = vadd.f32 %v2610_v21, %v2572_v40 }
0x103a   :  { %v2618_v18 = vadd.f32 %v2611_v23, %v4729_v54 }
0x103c   :  { %v2622_v56 = vsel %vm126_vm1, %v2618_v18, 0.0 }
0x103d   :  { %2623 = vadd.xlane.f32.xlu1 %v2622_v56 }
0x1075   :  { %v2621_v45 = vpop.xlane.xlu0 %2620 }
0x1076   :  { %v2625_v62 = vmul.f32 %v2621_v45, %v3998_v28 }
0x1078   :  { %v4785_v22 = vsub.f32 %v2617_v55, %v2625_v62 }
0x107a   :  { %v2629_v8 = vmul.f32 %v4785_v22, %v4785_v22 }
0x107c   :  { %v2631_v48 = vsel %vm126_vm1, %v2629_v8, 0.0 }
0x107d   :  { %2632 = vadd.xlane.f32.xlu1 %v2631_v48 }
0x109a   :  { %v2393_v41 = vpop.xlane.xlu1 %2392 }
0x109b   :  { %v2400_v57 = vmul.f32 %v2393_v41, %v3998_v28 }
0x109d   :  { %v2405_v27 = vsub.f32 %v2380_v10, %v2400_v57 }
0x109f   :  { %v2410_v6 = vmul.f32 %v2405_v27, %v2405_v27 }
0x10a1   :  { %v2421_v61 = vsel %vm126_vm1, %v2410_v6, 0.0 }
0x10a2   :  { %2422 = vadd.xlane.f32.xlu2 %v2421_v61  ;;  %v2396_v9 = vpop.xlane.xlu2 %2395 }
0x10a3   :  { %v2401_v16 = vmul.f32 %v2396_v9, %v3998_v28  ;;  %v2666_v9 = vperm.slane %v4636_v53, 5 }
0x10a5   :  { %v2406_v54 = vsub.f32 %v2381_v47, %v2401_v16 }
0x10a7   :  { %v2411_v32 = vmul.f32 %v2406_v54, %v2406_v54 }
0x10a9   :  { %v2424_v43 = vsel %vm1079_vm8, %v2411_v32, 0.0 }
0x10aa   :  { %2425 = vadd.xlane.f32.xlu0 %v2424_v43 }
0x10b0   :  { %v2624_v3 = vpop.xlane.xlu1 %2623 }
0x10b1   :  { %v2626_v49 = vmul.f32 %v2624_v3, %v3998_v28 }
0x10b3   :  { %v4795_v36 = vsub.f32 %v2618_v18, %v2626_v49 }
0x10b5   :  { %v2630_v31 = vmul.f32 %v4795_v36, %v4795_v36 }
0x10b7   :  { %v2634_v0 = vsel %vm126_vm1, %v2630_v31, 0.0 }
0x10b8   :  { %2635 = vadd.xlane.f32.xlu2 %v2634_v0 }
0x10f0   :  { %v2633_v59 = vpop.xlane.xlu1 %2632 }
0x10f1   :  { %v2637_v51 = vmul.f32 %v2633_v59, %v3998_v28 }
0x10f3   :  { %v2639_v52 = vadd.f32 1e-05, %v2637_v51 }
0x10f5   :  { %vm2647_vm12 = vweird.f32 %v2639_v52 }
0x1115   :  { %v2423_v33 = vpop.xlane.xlu2 %2422 }
0x1116   :  { %v2430_v12 = vmul.f32 %v2423_v33, %v3998_v28 }
0x1118   :  { %v2435_v15 = vadd.f32 1e-05, %v2430_v12 }
0x111a   :  { %3232 = vrsqrt.f32 %v2435_v15  ;;  %vm2473_vm6 = vweird.f32 %v2435_v15 }
0x111b   :  { %3234 = vrsqrt.f32 %v2639_v52 }
0x111d   :  { %v2426_v38 = vpop.xlane.xlu0 %2425 }
0x111e   :  { %v2431_v2 = vmul.f32 %v2426_v38, %v3998_v28  ;;  %v2701_v38 = vld [vmem:[%s4859_s12 + $0x10] sm:$0xff] }
0x1120   :  { %v3233_v13 = vpop.eup %3232  ;;  %v2436_v26 = vadd.f32 1e-05, %v2431_v2  ;;  %v2699_v2 = vld [vmem:[%s4859_s12] sm:$0xff] }
0x1121   :  { %v2468_v34 = vmul.f32 %v3233_v13, %v2435_v15  ;;  %v3235_v29 = vpop.eup %3234  ;;  %vm2474_vm2 = vweird.f32 %v3233_v13 }
0x1122   :  { %3236 = vrsqrt.f32 %v2436_v26  ;;  %v2642_v11 = vmul.f32 %v3235_v29, %v2639_v52  ;;  %vm2475_vm7 = vmor %vm2473_vm6, %vm2474_vm2  ;;  %vm2483_vm3 = vweird.f32 %v2436_v26  ;;  %vm2648_vm5 = vweird.f32 %v3235_v29  ;;  %v2702_v52 = vld [vmem:[%s4859_s12 + $0x18] sm:$0xff] }
0x1123   :  { %v2469_v37 = vmul.f32 %v3233_v13, %v2468_v34  ;;  %vm2649_vm13 = vmor %vm2647_vm12, %vm2648_vm5  ;;  %2722 = vmatpush.msra.mxu0 %v2702_v52  ;;  %vm2730_vm6 = vcmask 33792  }
0x1124   :  { %v2643_v30 = vmul.f32 %v3235_v29, %v2642_v11 }
0x1125   :  { %v2470_v4 = vmul.f32 0.5, %v2469_v37  ;;  %2723 = vmatpush.msra.mxu0 %v2701_v38 }
0x1126   :  { %v2644_v10 = vmul.f32 0.5, %v2643_v30  ;;  %v3041_v30 = vld [vmem:[%s4858_s11] ss:$0 sm:$0xff] }
0x1127   :  { %v2471_v60 = vsub.f32 1.5, %v2470_v4 }
0x1128   :  { %v3237_v20 = vpop.eup %3236  ;;  %v2645_v7 = vsub.f32 1.5, %v2644_v10 }
0x1129   :  { %v2472_v35 = vmul.f32 %v3233_v13, %v2471_v60  ;;  %v2478_v1 = vmul.f32 %v3237_v20, %v2436_v26  ;;  %vm2484_vm11 = vweird.f32 %v3237_v20 }
0x112a   :  { %vm2485_vm4 = vmor %vm2483_vm3, %vm2484_vm11  ;;  %v2646_v18 = vmul.f32 %v3235_v29, %v2645_v7 }
0x112b   :  { %v2476_v63 = vsel %vm2475_vm7, %v3233_v13, %v2472_v35  ;;  %v2479_v40 = vmul.f32 %v3237_v20, %v2478_v1  ;;  %v2636_v25 = vpop.xlane.xlu2 %2635 }
0x112c   :  { %v2490_v42 = vmul.f32 %v2476_v63, %v2405_v27  ;;  %v2638_v55 = vmul.f32 %v2636_v25, %v3998_v28  ;;  %v2650_v8 = vsel %vm2649_vm13, %v3235_v29, %v2646_v18  ;;  %v2663_v27 = vperm.slane %v4636_v53, 4 }
0x112d   :  { %v2480_v44 = vmul.f32 0.5, %v2479_v40  ;;  %v2661_v57 = vmul.f32 %v2650_v8, %v4785_v22 }
0x112e   :  { %v2640_v5 = vadd.f32 1e-05, %v2638_v55  ;;  %v2496_v50 = vmul.f32 %v4699_v14, %v2490_v42  ;;  %v3043_v55 = vld [vmem:[%s4860_s13] ss:$0 sm:$0xff] }
0x112f   :  { %v2481_v58 = vsub.f32 1.5, %v2480_v44 }
0x1130   :  { %3238 = vrsqrt.f32 %v2640_v5  ;;  %v2502_v46 = vadd.f32 %v4702_v19, %v2496_v50  ;;  %vm2657_vm15 = vweird.f32 %v2640_v5 }
0x1131   :  { %v2482_v24 = vmul.f32 %v3237_v20, %v2481_v58 }
0x1132   :  { %2927 = vmatmul.msk.f32.gmra.mxu3 %vm126_vm1, %v2502_v46 }
0x1133   :  { %v2486_v47 = vsel %vm2485_vm4, %v3237_v20, %v2482_v24 }
0x1134   :  { %v2491_v17 = vmul.f32 %v2486_v47, %v2406_v54 }
0x1136   :  { %v3239_v21 = vpop.eup %3238  ;;  %v2497_v23 = vmul.f32 %v4699_v14, %v2491_v17 }
0x1137   :  { %v2652_v56 = vmul.f32 %v3239_v21, %v2640_v5  ;;  %vm2658_vm14 = vweird.f32 %v3239_v21 }
0x1138   :  { %v2503_v45 = vadd.f32 %v4702_v19, %v2497_v23  ;;  %vm2659_vm9 = vmor %vm2657_vm15, %vm2658_vm14  ;;  %v2664_v19 = vmul.f32 %v2663_v27, %v2661_v57 }
0x1139   :  { %v2653_v62 = vmul.f32 %v3239_v21, %v2652_v56 }
0x113a   :  { %2928 = vmatmul.msk.f32.gmra.mxu3 %vm126_vm1, %v2503_v45  ;;  %v2667_v54 = vadd.f32 %v2666_v9, %v2664_v19 }
0x113b   :  { %v2654_v48 = vmul.f32 0.5, %v2653_v62 }
0x113d   :  { %v2655_v41 = vsub.f32 1.5, %v2654_v48 }
0x113f   :  { %v2656_v6 = vmul.f32 %v3239_v21, %v2655_v41 }
0x1141   :  { %v2660_v14 = vsel %vm2659_vm9, %v3239_v21, %v2656_v6 }
0x1142   :  { %v2662_v61 = vmul.f32 %v2660_v14, %v4795_v36 }
0x1144   :  { %v2665_v16 = vmul.f32 %v2663_v27, %v2662_v61 }
0x1146   :  { %v2668_v32 = vadd.f32 %v2666_v9, %v2665_v16 }
0x1148   :  { %v2670_v43 = vsel %vm2669_vm10, %v2667_v54, %v2668_v32 }
0x1149   :  { %v2673_v3 = vsel %vm1079_vm8, %v2670_v43, 0.0 }
0x114a   :  { %2674 = vadd.xlane.f32.xlu0 %v2673_v3 }
0x11b5   :  { %v2552_v22 = vpop.f32.mrf.mxu3 }
0x11b6   :  { %v2553_v49 = vadd.f32 %v4755_v39, %v2552_v22 }
0x11b8   :  { %v2561_v31 = vmax.f32 %v2553_v49, 0.0 }
0x11ba   :  { %2940 = vmatmul.msk.f32.gmra.mxu1 %vm66_vm0, %v2561_v31 }
0x11bd   :  { %v2555_v0 = vpop.f32.mrf.mxu3  ;;  %v2675_v59 = vpop.xlane.xlu0 %2674 }
0x11be   :  { %v2556_v36 = vadd.f32 %v4755_v39, %v2555_v0  ;;  %v2676_v53 = vmul.f32 %v2675_v59, %v3998_v28  ;;  %v2700_v39 = vld [vmem:[%s4859_s12 + $0x8] sm:$0xff] }
0x11bf   :  { %2724 = vmatpush.msra.mxu0 %v2700_v39 }
0x11c0   :  { %v2562_v33 = vmax.f32 %v2556_v36, 0.0  ;;  %v2677_v51 = vsub.f32 %v2670_v43, %v2676_v53 }
0x11c1   :  { %2725 = vmatpush.msra.mxu0 %v2699_v2 }
0x11c2   :  { %2941 = vmatmul.msk.f32.gmra.mxu1 %vm66_vm0, %v2562_v33  ;;  %v2678_v12 = vmul.f32 %v2677_v51, %v2677_v51 }
0x11c4   :  { %v2679_v15 = vsel %vm1079_vm8, %v2678_v12, 0.0 }
0x11c5   :  { %2680 = vadd.xlane.f32.xlu1 %v2679_v15 }
0x1237   :  { %v2613_v13 = vpop.f32.mrf.mxu1 }
0x1238   :  { %v2681_v26 = vpop.xlane.xlu1 %2680 }
0x1239   :  { %v2682_v34 = vmul.f32 %v2681_v26, %v3998_v28  ;;  %v3042_v28 = vld [vmem:[%s4858_s11 + $0x1] ss:$0 sm:$0xff] }
0x123b   :  { %v2683_v37 = vadd.f32 1e-05, %v2682_v34 }
0x123d   :  { %3240 = vrsqrt.f32 %v2683_v37  ;;  %vm2690_vm8 = vweird.f32 %v2683_v37 }
0x123f   :  { %v2615_v29 = vpop.f32.mrf.mxu1 }
0x1243   :  { %v3241_v4 = vpop.eup %3240 }
0x1244   :  { %v2685_v11 = vmul.f32 %v3241_v4, %v2683_v37  ;;  %vm2691_vm0 = vweird.f32 %v3241_v4 }
0x1245   :  { %vm2692_vm2 = vmor %vm2690_vm8, %vm2691_vm0 }
0x1246   :  { %v2686_v60 = vmul.f32 %v3241_v4, %v2685_v11 }
0x1248   :  { %v2687_v20 = vmul.f32 0.5, %v2686_v60 }
0x124a   :  { %v2688_v35 = vsub.f32 1.5, %v2687_v20 }
0x124c   :  { %v2689_v1 = vmul.f32 %v3241_v4, %v2688_v35 }
0x124e   :  { %v2693_v63 = vsel %vm2692_vm2, %v3241_v4, %v2689_v1 }
0x124f   :  { %v2694_v40 = vmul.f32 %v2693_v63, %v2677_v51 }
0x1251   :  { %v2696_v25 = vmul.f32 %v3041_v30, %v2694_v40 }
0x1253   :  { %v2698_v42 = vadd.f32 %v3042_v28, %v2696_v25 }
0x1255   :  { %2942 = vmatmul.msk.f32.vlgmr.msra.gmra.mxu0 %vm126_vm1, %v2698_v42 }
0x12d2   :  { %v2727_v44 = vpop.f32.mrf.mxu0 }
0x12d3   :  { %v2728_v5 = vadd.f32 %v3043_v55, %v2727_v44 }
0x12d5   :  { %2731 = vst.msk [vmem:[#allocation2] sm:$0x3] %vm2730_vm6, %v2728_v5 }
0x12d6   :  { %2742 = dma.vmem_to_hbm [thread:$0]  %s2738_s0, 32, %s2740_s16, [#allocation3]  }
0x12d7   :  { %3271 = dma.done.wait [#allocation3], 32  }
0x12d8   :  { %3272 = vsyncadd [#allocation3], 4294967264 }
0x12d9   :  { %2747 = vsyncpa [#allocation3], 1 }

</bundles_post_ra>
